<compile_context>
chip_gen: v7x
topology: tpu7x:2x2x1
jax: 0.10.0
libtpu: 0.0.40
codegen_flags: <defaults>
</compile_context>

<pallas_src>
import math

import jax
import jax.numpy as jnp
from jax import lax
from jax.experimental import pallas as pl
from jax.experimental.pallas import tpu as pltpu

SEQ = 41            # n_features chunking in the PyTorch forward (fixed)
PLM_DIM = 1024      # plm_head = nn.Linear(1024, hidden)  (fixed)
HIDDEN = 32
NUM_HEADS = 4
HEAD_DIM = HIDDEN // NUM_HEADS
NUM_CLASSES = 2
LN_EPS = 1e-5
BN_EPS = 1e-5
MAX_BATCH_BLOCK = 16
NEG_INF = -1e9

# Rows of the packed small-parameter matrix (shape (SMALL_ROWS, SMALL_COLS)).
(ROW_B_PLM, ROW_LN_G, ROW_LN_B, ROW_BQ,
 ROW_B_KV, ROW_BN_SCALE, ROW_BN_SHIFT, ROW_B_OUT) = range(8)
SMALL_ROWS = 8
SMALL_COLS = 2 * HIDDEN


def _cross_model_attention_kernel(plm_ref, graph_ref, w_plm_ref, wq_ref,
                                  w_kv_ref, small_ref, mask_ref, w_out_ref,
                                  sel_ref, out_ref):
    small = small_ref[...]                                   # (8, 64) f32
    b_plm = small[ROW_B_PLM:ROW_B_PLM + 1, :HIDDEN]
    ln_g = small[ROW_LN_G:ROW_LN_G + 1, :HIDDEN]
    ln_b = small[ROW_LN_B:ROW_LN_B + 1, :HIDDEN]
    bq = small[ROW_BQ:ROW_BQ + 1, :HIDDEN]
    b_kv = small[ROW_B_KV:ROW_B_KV + 1, :]
    bn_scale = small[ROW_BN_SCALE:ROW_BN_SCALE + 1, :HIDDEN]
    bn_shift = small[ROW_BN_SHIFT:ROW_BN_SHIFT + 1, :HIDDEN]
    b_out = small[ROW_B_OUT:ROW_B_OUT + 1, :NUM_CLASSES]

    # ---- plm_head: one (BB*41, 1024) @ (1024, 32) bf16 matmul + ReLU --------
    plm = jnp.dot(plm_ref[...], w_plm_ref[...],
                  preferred_element_type=jnp.float32)        # f32 accumulate
    plm = jnp.maximum(plm + b_plm, 0.0)

    # ---- LayerNorm over hidden (f32) ----------------------------------------
    mu = jnp.mean(plm, axis=-1, keepdims=True)
    var = jnp.mean(jnp.square(plm - mu), axis=-1, keepdims=True)
    plm = (plm - mu) * lax.rsqrt(var + LN_EPS) * ln_g + ln_b

    # ---- projections: Q from graph, fused K|V from plm ----------------------
    q = jnp.dot(graph_ref[...], wq_ref[...],
                preferred_element_type=jnp.float32) + bq       # (rows, 32)
    kv = jnp.dot(plm, w_kv_ref[...],
                 preferred_element_type=jnp.float32) + b_kv    # (rows, 64)

    # ---- multi-head attention with a block-diagonal mask --------------------
    mask = mask_ref[...]                                       # (rows, rows)
    inv_scale = 1.0 / math.sqrt(HEAD_DIM)
    ctx_heads = []
    for h in range(NUM_HEADS):                 # static unroll over 4 heads
        lo = h * HEAD_DIM
        qh = q[:, lo:lo + HEAD_DIM]
        kh = kv[:, lo:lo + HEAD_DIM]
        vh = kv[:, HIDDEN + lo:HIDDEN + lo + HEAD_DIM]
        s = lax.dot_general(qh, kh, (((1,), (1,)), ((), ())),
                            preferred_element_type=jnp.float32)
        s = s * inv_scale + mask
        s = s - jnp.max(s, axis=-1, keepdims=True)
        p = jnp.exp(s)
        p = p * pl.reciprocal(jnp.sum(p, axis=-1, keepdims=True), approx=True)
        # attention dropout = identity (eval mode)
        ctx_heads.append(jnp.dot(p, vh, preferred_element_type=jnp.float32))
    ctx = jnp.concatenate(ctx_heads, axis=-1)                  # (rows, 32)

    # ---- residual + BatchNorm1d (eval, pre-folded); dropout = identity ------
    fused = (ctx + plm) * bn_scale + bn_shift                  # (rows, 32)

    # ---- output_layer: Linear(41*H -> 2), vectorized -------------------------
    # rowvals[r, c] = sum_h fused[r, h] * W_out[c, r%41, h]   (lane reductions)
    w_out = w_out_ref[...]                                     # (rows, 64)
    r0 = jnp.sum(fused * w_out[:, :HIDDEN], axis=-1, keepdims=True)
    r1 = jnp.sum(fused * w_out[:, HIDDEN:], axis=-1, keepdims=True)
    rowvals = jnp.concatenate([r0, r1], axis=-1)               # (rows, 2)
    # logits[b, c] = sum over the 41 rows of batch b (segment-sum matmul)
    out_ref[...] = jnp.dot(sel_ref[...], rowvals,
                           preferred_element_type=jnp.float32) + b_out


def make_params(key):
    ks = jax.random.split(key, 5)

    def linear_init(k, fan_in, fan_out):
        # mimics nn.Linear default init: U(-1/sqrt(fan_in), 1/sqrt(fan_in))
        bound = 1.0 / math.sqrt(fan_in)
        kw, kb = jax.random.split(k)
        w = jax.random.uniform(kw, (fan_in, fan_out), jnp.float32, -bound, bound)
        b = jax.random.uniform(kb, (1, fan_out), jnp.float32, -bound, bound)
        return w, b

    # plm_head: xavier_uniform weight, zero bias (per init_weights)
    xb = math.sqrt(6.0 / (PLM_DIM + HIDDEN))
    w_plm = jax.random.uniform(ks[0], (PLM_DIM, HIDDEN), jnp.float32, -xb, xb)
    b_plm = jnp.zeros((1, HIDDEN), jnp.float32)

    ln_g = jnp.ones((1, HIDDEN), jnp.float32)
    ln_b = jnp.zeros((1, HIDDEN), jnp.float32)

    wq, bq = linear_init(ks[1], HIDDEN, HIDDEN)
    wk, bk = linear_init(ks[2], HIDDEN, HIDDEN)
    wv, bv = linear_init(ks[3], HIDDEN, HIDDEN)

    bn_g = jnp.ones((1, HIDDEN), jnp.float32)
    bn_b = jnp.zeros((1, HIDDEN), jnp.float32)
    bn_m = jnp.zeros((1, HIDDEN), jnp.float32)
    bn_v = jnp.ones((1, HIDDEN), jnp.float32)

    # output_layer: nn.Linear(41*H, 2); stored as (2, SEQ, HIDDEN) so that
    # w_out[c, s, h] multiplies fused[s, h] (row-major flatten matches torch).
    w_out_flat, b_out = linear_init(ks[4], SEQ * HIDDEN, NUM_CLASSES)
    w_out = jnp.transpose(w_out_flat).reshape(NUM_CLASSES, SEQ, HIDDEN)

    return dict(
        w_plm=w_plm, b_plm=b_plm, ln_g=ln_g, ln_b=ln_b,
        wq=wq, bq=bq, wk=wk, bk=bk, wv=wv, bv=bv,
        bn_g=bn_g, bn_b=bn_b, bn_m=bn_m, bn_v=bn_v,
        w_out=w_out, b_out=b_out,
    )


def _pack_small(params):
    """Fold BN (eval) into scale/shift and pack all small vectors into (8,64)."""
    bn_scale = params["bn_g"] * lax.rsqrt(params["bn_v"] + BN_EPS)
    bn_shift = params["bn_b"] - params["bn_m"] * bn_scale

    def pad_row(v):
        return jnp.pad(v, ((0, 0), (0, SMALL_COLS - v.shape[1])))

    rows = [
        pad_row(params["b_plm"]),
        pad_row(params["ln_g"]),
        pad_row(params["ln_b"]),
        pad_row(params["bq"]),
        jnp.concatenate([params["bk"], params["bv"]], axis=1),   # (1, 64)
        pad_row(bn_scale),
        pad_row(bn_shift),
        pad_row(params["b_out"]),
    ]
    return jnp.concatenate(rows, axis=0).astype(jnp.float32)     # (8, 64)


def cross_model_attention(plm_features, graph_node_embeddings, params):
    """plm_features: (B, 41, 1024); graph_node_embeddings: (B*41, HIDDEN)."""
    B = plm_features.shape[0]

    # Batch block: whole batch in one grid step when small; else 16 per step
    # (16*41 rows keeps bf16 sublane tiling aligned, ~2.7 MB double-buffered).
    BB = B if B <= MAX_BATCH_BLOCK else MAX_BATCH_BLOCK
    Bp = pl.cdiv(B, BB) * BB
    rows = BB * SEQ

    # torch.stack([graph_output[i:i+41] ...]) == row-major reshape; flat rows
    # let the heavy matmuls run over all BB*41 rows at once.
    plm_flat = plm_features.reshape(B * SEQ, PLM_DIM).astype(jnp.bfloat16)
    graph_flat = graph_node_embeddings.reshape(B * SEQ, HIDDEN).astype(jnp.float32)
    if Bp != B:
        pad_rows = (Bp - B) * SEQ
        plm_flat = jnp.pad(plm_flat, ((0, pad_rows), (0, 0)))
        graph_flat = jnp.pad(graph_flat, ((0, pad_rows), (0, 0)))

    w_plm = params["w_plm"].astype(jnp.bfloat16)             # bf16 MXU operand
    wq = params["wq"].astype(jnp.float32)
    w_kv = jnp.concatenate([params["wk"], params["wv"]], axis=1).astype(jnp.float32)
    small = _pack_small(params)

    # Block-diagonal additive attention mask for one batch block (resident).
    rid = jnp.arange(rows, dtype=jnp.int32) // SEQ
    mask = jnp.where(rid[:, None] == rid[None, :], 0.0, NEG_INF).astype(jnp.float32)

    # Per-row output weights (classes packed along lanes), tiled over the block.
    w_out_rows = jnp.concatenate(
        [params["w_out"][0], params["w_out"][1]], axis=1)      # (41, 64)
    w_out_tiled = jnp.tile(w_out_rows, (BB, 1)).astype(jnp.float32)  # (rows, 64)

    # 0/1 selector: sums the 41 rows belonging to each batch element.
    sel = (jnp.arange(BB, dtype=jnp.int32)[:, None] == rid[None, :]).astype(jnp.float32)

    grid = (Bp // BB,)
    out = pl.pallas_call(
        _cross_model_attention_kernel,
        out_shape=jax.ShapeDtypeStruct((Bp, NUM_CLASSES), jnp.float32),
        grid=grid,
        in_specs=[
            pl.BlockSpec((rows, PLM_DIM), lambda i: (i, 0)),
            pl.BlockSpec((rows, HIDDEN), lambda i: (i, 0)),
            pl.BlockSpec((PLM_DIM, HIDDEN), lambda i: (0, 0)),
            pl.BlockSpec((HIDDEN, HIDDEN), lambda i: (0, 0)),
            pl.BlockSpec((HIDDEN, 2 * HIDDEN), lambda i: (0, 0)),
            pl.BlockSpec((SMALL_ROWS, SMALL_COLS), lambda i: (0, 0)),
            pl.BlockSpec((rows, rows), lambda i: (0, 0)),
            pl.BlockSpec((rows, 2 * HIDDEN), lambda i: (0, 0)),
            pl.BlockSpec((BB, rows), lambda i: (0, 0)),
        ],
        out_specs=pl.BlockSpec((BB, NUM_CLASSES), lambda i: (i, 0)),
        compiler_params=pltpu.CompilerParams(
            dimension_semantics=("parallel",),
            vmem_limit_bytes=48 * 1024 * 1024),
    )(plm_flat, graph_flat, w_plm, wq, w_kv, small, mask, w_out_tiled, sel)

    return out[:B]


def reference(plm_features, graph_nodes, params):
    """Pure-JAX f32 re-implementation of the PyTorch forward (eval mode)."""
    B = plm_features.shape[0]
    x = plm_features.reshape(B * SEQ, PLM_DIM).astype(jnp.float32)
    plm = jnp.maximum(x @ params["w_plm"] + params["b_plm"], 0.0)
    mu = plm.mean(-1, keepdims=True)
    var = ((plm - mu) ** 2).mean(-1, keepdims=True)
    plm = (plm - mu) / jnp.sqrt(var + LN_EPS) * params["ln_g"] + params["ln_b"]

    q = graph_nodes @ params["wq"] + params["bq"]
    k = plm @ params["wk"] + params["bk"]
    v = plm @ params["wv"] + params["bv"]

    def split_heads(t):
        return t.reshape(B, SEQ, NUM_HEADS, HEAD_DIM).transpose(0, 2, 1, 3)

    qh, kh, vh = split_heads(q), split_heads(k), split_heads(v)
    s = jnp.einsum('bhqd,bhkd->bhqk', qh, kh) / math.sqrt(HEAD_DIM)
    p = jax.nn.softmax(s, axis=-1)
    ctx = jnp.einsum('bhqk,bhkd->bhqd', p, vh)
    ctx = ctx.transpose(0, 2, 1, 3).reshape(B, SEQ, HIDDEN)

    fused = ctx + plm.reshape(B, SEQ, HIDDEN)
    bn_scale = params["bn_g"] / jnp.sqrt(params["bn_v"] + BN_EPS)
    bn_shift = params["bn_b"] - params["bn_m"] * bn_scale
    fused = fused * bn_scale.reshape(1, 1, HIDDEN) + bn_shift.reshape(1, 1, HIDDEN)

    flat = fused.reshape(B, SEQ * HIDDEN)
    w_out_flat = params["w_out"].reshape(NUM_CLASSES, SEQ * HIDDEN)
    return flat @ w_out_flat.T + params["b_out"]


if __name__ == "__main__":
    key = jax.random.PRNGKey(0)
    kp, k1, k2 = jax.random.split(key, 3)
    params = make_params(kp)

    B = 2
    plm_features = jax.random.normal(k1, (B, SEQ, PLM_DIM), jnp.float32)
    graph_nodes = jax.random.normal(k2, (B * SEQ, HIDDEN), jnp.float32)

    logits = jax.jit(cross_model_attention)(plm_features, graph_nodes, params)
    logits = jax.block_until_ready(logits)
    assert logits.shape == (B, NUM_CLASSES)
    assert bool(jnp.all(jnp.isfinite(logits)))

    ref = reference(plm_features, graph_nodes, params)
    max_err = float(jnp.max(jnp.abs(logits - ref)))
    assert max_err < 1e-1, f"max abs err vs reference: {max_err}"

    print("KERNEL_OK")
</pallas_src>

<mosaic_0001>
module attributes {stable_mosaic.version = 11 : i64} {
  func.func @_cross_model_attention_kernel(%arg0: i32, %arg1: memref<82x1024xbf16, #tpu.memory_space<vmem>>, %arg2: memref<82x32xf32, #tpu.memory_space<vmem>>, %arg3: memref<1024x32xbf16, #tpu.memory_space<vmem>>, %arg4: memref<32x32xf32, #tpu.memory_space<vmem>>, %arg5: memref<32x64xf32, #tpu.memory_space<vmem>>, %arg6: memref<8x64xf32, #tpu.memory_space<vmem>>, %arg7: memref<82x82xf32, #tpu.memory_space<vmem>>, %arg8: memref<82x64xf32, #tpu.memory_space<vmem>>, %arg9: memref<2x82xf32, #tpu.memory_space<vmem>>, %arg10: memref<2x2xf32, #tpu.memory_space<vmem>>) attributes {dimension_semantics = [#tpu.dimension_semantics<parallel>], iteration_bounds = array<i64: 1>, scalar_prefetch = 0 : i64, scratch_operands = 0 : i64, tpu.core_type = #tpu.core_type<tc>, window_params = [{transform_indices = @transform_0, window_bounds = array<i64: 82, 1024>}, {transform_indices = @transform_1, window_bounds = array<i64: 82, 32>}, {pipeline_mode = #tpu.pipeline_mode<synchronous>, transform_indices = @transform_2, window_bounds = array<i64: 1024, 32>}, {pipeline_mode = #tpu.pipeline_mode<synchronous>, transform_indices = @transform_3, window_bounds = array<i64: 32, 32>}, {pipeline_mode = #tpu.pipeline_mode<synchronous>, transform_indices = @transform_4, window_bounds = array<i64: 32, 64>}, {pipeline_mode = #tpu.pipeline_mode<synchronous>, transform_indices = @transform_5, window_bounds = array<i64: 8, 64>}, {pipeline_mode = #tpu.pipeline_mode<synchronous>, transform_indices = @transform_6, window_bounds = array<i64: 82, 82>}, {pipeline_mode = #tpu.pipeline_mode<synchronous>, transform_indices = @transform_7, window_bounds = array<i64: 82, 64>}, {pipeline_mode = #tpu.pipeline_mode<synchronous>, transform_indices = @transform_8, window_bounds = array<i64: 2, 82>}, {transform_indices = @transform_9, window_bounds = array<i64: 2, 2>}]} {
    %c0 = arith.constant 0 : index
    %c0_0 = arith.constant 0 : index
    %0 = vector.load %arg6[%c0, %c0_0] : memref<8x64xf32, #tpu.memory_space<vmem>>, vector<8x64xf32>
    %1 = vector.extract_strided_slice %0 {offsets = [0, 0], sizes = [1, 32], strides = [1, 1]} : vector<8x64xf32> to vector<1x32xf32>
    %2 = vector.extract_strided_slice %0 {offsets = [1, 0], sizes = [1, 32], strides = [1, 1]} : vector<8x64xf32> to vector<1x32xf32>
    %3 = vector.extract_strided_slice %0 {offsets = [2, 0], sizes = [1, 32], strides = [1, 1]} : vector<8x64xf32> to vector<1x32xf32>
    %4 = vector.extract_strided_slice %0 {offsets = [3, 0], sizes = [1, 32], strides = [1, 1]} : vector<8x64xf32> to vector<1x32xf32>
    %5 = vector.extract_strided_slice %0 {offsets = [4, 0], sizes = [1, 64], strides = [1, 1]} : vector<8x64xf32> to vector<1x64xf32>
    %6 = vector.extract_strided_slice %0 {offsets = [5, 0], sizes = [1, 32], strides = [1, 1]} : vector<8x64xf32> to vector<1x32xf32>
    %7 = vector.extract_strided_slice %0 {offsets = [6, 0], sizes = [1, 32], strides = [1, 1]} : vector<8x64xf32> to vector<1x32xf32>
    %8 = vector.extract_strided_slice %0 {offsets = [7, 0], sizes = [1, 2], strides = [1, 1]} : vector<8x64xf32> to vector<1x2xf32>
    %c0_1 = arith.constant 0 : index
    %c0_2 = arith.constant 0 : index
    %9 = vector.load %arg1[%c0_1, %c0_2] : memref<82x1024xbf16, #tpu.memory_space<vmem>>, vector<82x1024xbf16>
    %c0_3 = arith.constant 0 : index
    %c0_4 = arith.constant 0 : index
    %10 = vector.load %arg3[%c0_3, %c0_4] : memref<1024x32xbf16, #tpu.memory_space<vmem>>, vector<1024x32xbf16>
    %cst = arith.constant dense<0.000000e+00> : vector<82x32xf32>
    %11 = tpu.matmul %9, %10, %cst {dimension_numbers = #tpu.dot_dimension_numbers<[1], [0], [0], [1], [0, 0, 1, 1], [], []>} : vector<82x1024xbf16>, vector<1024x32xbf16>, vector<82x32xf32> -> vector<82x32xf32>
    %12 = vector.broadcast %1 : vector<1x32xf32> to vector<82x32xf32>
    %13 = arith.addf %11, %12 : vector<82x32xf32>
    %cst_5 = arith.constant 0.000000e+00 : f32
    %14 = vector.broadcast %cst_5 : f32 to vector<82x32xf32>
    %15 = arith.maximumf %13, %14 : vector<82x32xf32>
    %cst_6 = arith.constant dense<0.000000e+00> : vector<82xf32>
    %16 = vector.multi_reduction <add>, %15, %cst_6 [1] : vector<82x32xf32> to vector<82xf32>
    %17 = vector.shape_cast %16 : vector<82xf32> to vector<82x1xf32>
    %cst_7 = arith.constant 3.200000e+01 : f32
    %18 = vector.broadcast %cst_7 : f32 to vector<82x1xf32>
    %19 = arith.divf %17, %18 : vector<82x1xf32>
    %20 = vector.broadcast %19 : vector<82x1xf32> to vector<82x32xf32>
    %21 = arith.subf %15, %20 : vector<82x32xf32>
    %22 = arith.mulf %21, %21 : vector<82x32xf32>
    %cst_8 = arith.constant dense<0.000000e+00> : vector<82xf32>
    %23 = vector.multi_reduction <add>, %22, %cst_8 [1] : vector<82x32xf32> to vector<82xf32>
    %24 = vector.shape_cast %23 : vector<82xf32> to vector<82x1xf32>
    %cst_9 = arith.constant 3.200000e+01 : f32
    %25 = vector.broadcast %cst_9 : f32 to vector<82x1xf32>
    %26 = arith.divf %24, %25 : vector<82x1xf32>
    %27 = vector.broadcast %19 : vector<82x1xf32> to vector<82x32xf32>
    %28 = arith.subf %15, %27 : vector<82x32xf32>
    %cst_10 = arith.constant 9.99999974E-6 : f32
    %29 = vector.broadcast %cst_10 : f32 to vector<82x1xf32>
    %30 = arith.addf %26, %29 : vector<82x1xf32>
    %31 = math.rsqrt %30 : vector<82x1xf32>
    %32 = vector.broadcast %31 : vector<82x1xf32> to vector<82x32xf32>
    %33 = arith.mulf %28, %32 : vector<82x32xf32>
    %34 = vector.broadcast %2 : vector<1x32xf32> to vector<82x32xf32>
    %35 = arith.mulf %33, %34 : vector<82x32xf32>
    %36 = vector.broadcast %3 : vector<1x32xf32> to vector<82x32xf32>
    %37 = arith.addf %35, %36 : vector<82x32xf32>
    %c0_11 = arith.constant 0 : index
    %c0_12 = arith.constant 0 : index
    %38 = vector.load %arg2[%c0_11, %c0_12] : memref<82x32xf32, #tpu.memory_space<vmem>>, vector<82x32xf32>
    %c0_13 = arith.constant 0 : index
    %c0_14 = arith.constant 0 : index
    %39 = vector.load %arg4[%c0_13, %c0_14] : memref<32x32xf32, #tpu.memory_space<vmem>>, vector<32x32xf32>
    %cst_15 = arith.constant dense<0.000000e+00> : vector<82x32xf32>
    %40 = tpu.matmul %38, %39, %cst_15 {dimension_numbers = #tpu.dot_dimension_numbers<[1], [0], [0], [1], [0, 0, 1, 1], [], []>} : vector<82x32xf32>, vector<32x32xf32>, vector<82x32xf32> -> vector<82x32xf32>
    %41 = vector.broadcast %4 : vector<1x32xf32> to vector<82x32xf32>
    %42 = arith.addf %40, %41 : vector<82x32xf32>
    %c0_16 = arith.constant 0 : index
    %c0_17 = arith.constant 0 : index
    %43 = vector.load %arg5[%c0_16, %c0_17] : memref<32x64xf32, #tpu.memory_space<vmem>>, vector<32x64xf32>
    %cst_18 = arith.constant dense<0.000000e+00> : vector<82x64xf32>
    %44 = tpu.matmul %37, %43, %cst_18 {dimension_numbers = #tpu.dot_dimension_numbers<[1], [0], [0], [1], [0, 0, 1, 1], [], []>} : vector<82x32xf32>, vector<32x64xf32>, vector<82x64xf32> -> vector<82x64xf32>
    %45 = vector.broadcast %5 : vector<1x64xf32> to vector<82x64xf32>
    %46 = arith.addf %44, %45 : vector<82x64xf32>
    %c0_19 = arith.constant 0 : index
    %c0_20 = arith.constant 0 : index
    %47 = vector.load %arg7[%c0_19, %c0_20] : memref<82x82xf32, #tpu.memory_space<vmem>>, vector<82x82xf32>
    %48 = vector.extract_strided_slice %42 {offsets = [0, 0], sizes = [82, 8], strides = [1, 1]} : vector<82x32xf32> to vector<82x8xf32>
    %49 = vector.extract_strided_slice %46 {offsets = [0, 0], sizes = [82, 8], strides = [1, 1]} : vector<82x64xf32> to vector<82x8xf32>
    %50 = vector.extract_strided_slice %46 {offsets = [0, 32], sizes = [82, 8], strides = [1, 1]} : vector<82x64xf32> to vector<82x8xf32>
    %cst_21 = arith.constant dense<0.000000e+00> : vector<82x82xf32>
    %51 = tpu.matmul %48, %49, %cst_21 {dimension_numbers = #tpu.dot_dimension_numbers<[1], [1], [0], [0], [0, 0, 1, 0], [], []>} : vector<82x8xf32>, vector<82x8xf32>, vector<82x82xf32> -> vector<82x82xf32>
    %cst_22 = arith.constant 0.353553385 : f32
    %52 = vector.broadcast %cst_22 : f32 to vector<82x82xf32>
    %53 = arith.mulf %51, %52 : vector<82x82xf32>
    %54 = arith.addf %53, %47 : vector<82x82xf32>
    %cst_23 = arith.constant dense<0xFF800000> : vector<82xf32>
    %55 = vector.multi_reduction <maximumf>, %54, %cst_23 [1] : vector<82x82xf32> to vector<82xf32>
    %56 = vector.shape_cast %55 : vector<82xf32> to vector<82x1xf32>
    %57 = vector.broadcast %56 : vector<82x1xf32> to vector<82x82xf32>
    %58 = arith.subf %54, %57 : vector<82x82xf32>
    %59 = math.exp %58 : vector<82x82xf32>
    %cst_24 = arith.constant dense<0.000000e+00> : vector<82xf32>
    %60 = vector.multi_reduction <add>, %59, %cst_24 [1] : vector<82x82xf32> to vector<82xf32>
    %61 = vector.shape_cast %60 : vector<82xf32> to vector<82x1xf32>
    %62 = tpu.reciprocal %61 {approx = true} : vector<82x1xf32> -> vector<82x1xf32>
    %63 = vector.broadcast %62 : vector<82x1xf32> to vector<82x82xf32>
    %64 = arith.mulf %59, %63 : vector<82x82xf32>
    %cst_25 = arith.constant dense<0.000000e+00> : vector<82x8xf32>
    %65 = tpu.matmul %64, %50, %cst_25 {dimension_numbers = #tpu.dot_dimension_numbers<[1], [0], [0], [1], [0, 0, 1, 1], [], []>} : vector<82x82xf32>, vector<82x8xf32>, vector<82x8xf32> -> vector<82x8xf32>
    %66 = vector.extract_strided_slice %42 {offsets = [0, 8], sizes = [82, 8], strides = [1, 1]} : vector<82x32xf32> to vector<82x8xf32>
    %67 = vector.extract_strided_slice %46 {offsets = [0, 8], sizes = [82, 8], strides = [1, 1]} : vector<82x64xf32> to vector<82x8xf32>
    %68 = vector.extract_strided_slice %46 {offsets = [0, 40], sizes = [82, 8], strides = [1, 1]} : vector<82x64xf32> to vector<82x8xf32>
    %cst_26 = arith.constant dense<0.000000e+00> : vector<82x82xf32>
    %69 = tpu.matmul %66, %67, %cst_26 {dimension_numbers = #tpu.dot_dimension_numbers<[1], [1], [0], [0], [0, 0, 1, 0], [], []>} : vector<82x8xf32>, vector<82x8xf32>, vector<82x82xf32> -> vector<82x82xf32>
    %cst_27 = arith.constant 0.353553385 : f32
    %70 = vector.broadcast %cst_27 : f32 to vector<82x82xf32>
    %71 = arith.mulf %69, %70 : vector<82x82xf32>
    %72 = arith.addf %71, %47 : vector<82x82xf32>
    %cst_28 = arith.constant dense<0xFF800000> : vector<82xf32>
    %73 = vector.multi_reduction <maximumf>, %72, %cst_28 [1] : vector<82x82xf32> to vector<82xf32>
    %74 = vector.shape_cast %73 : vector<82xf32> to vector<82x1xf32>
    %75 = vector.broadcast %74 : vector<82x1xf32> to vector<82x82xf32>
    %76 = arith.subf %72, %75 : vector<82x82xf32>
    %77 = math.exp %76 : vector<82x82xf32>
    %cst_29 = arith.constant dense<0.000000e+00> : vector<82xf32>
    %78 = vector.multi_reduction <add>, %77, %cst_29 [1] : vector<82x82xf32> to vector<82xf32>
    %79 = vector.shape_cast %78 : vector<82xf32> to vector<82x1xf32>
    %80 = tpu.reciprocal %79 {approx = true} : vector<82x1xf32> -> vector<82x1xf32>
    %81 = vector.broadcast %80 : vector<82x1xf32> to vector<82x82xf32>
    %82 = arith.mulf %77, %81 : vector<82x82xf32>
    %cst_30 = arith.constant dense<0.000000e+00> : vector<82x8xf32>
    %83 = tpu.matmul %82, %68, %cst_30 {dimension_numbers = #tpu.dot_dimension_numbers<[1], [0], [0], [1], [0, 0, 1, 1], [], []>} : vector<82x82xf32>, vector<82x8xf32>, vector<82x8xf32> -> vector<82x8xf32>
    %84 = vector.extract_strided_slice %42 {offsets = [0, 16], sizes = [82, 8], strides = [1, 1]} : vector<82x32xf32> to vector<82x8xf32>
    %85 = vector.extract_strided_slice %46 {offsets = [0, 16], sizes = [82, 8], strides = [1, 1]} : vector<82x64xf32> to vector<82x8xf32>
    %86 = vector.extract_strided_slice %46 {offsets = [0, 48], sizes = [82, 8], strides = [1, 1]} : vector<82x64xf32> to vector<82x8xf32>
    %cst_31 = arith.constant dense<0.000000e+00> : vector<82x82xf32>
    %87 = tpu.matmul %84, %85, %cst_31 {dimension_numbers = #tpu.dot_dimension_numbers<[1], [1], [0], [0], [0, 0, 1, 0], [], []>} : vector<82x8xf32>, vector<82x8xf32>, vector<82x82xf32> -> vector<82x82xf32>
    %cst_32 = arith.constant 0.353553385 : f32
    %88 = vector.broadcast %cst_32 : f32 to vector<82x82xf32>
    %89 = arith.mulf %87, %88 : vector<82x82xf32>
    %90 = arith.addf %89, %47 : vector<82x82xf32>
    %cst_33 = arith.constant dense<0xFF800000> : vector<82xf32>
    %91 = vector.multi_reduction <maximumf>, %90, %cst_33 [1] : vector<82x82xf32> to vector<82xf32>
    %92 = vector.shape_cast %91 : vector<82xf32> to vector<82x1xf32>
    %93 = vector.broadcast %92 : vector<82x1xf32> to vector<82x82xf32>
    %94 = arith.subf %90, %93 : vector<82x82xf32>
    %95 = math.exp %94 : vector<82x82xf32>
    %cst_34 = arith.constant dense<0.000000e+00> : vector<82xf32>
    %96 = vector.multi_reduction <add>, %95, %cst_34 [1] : vector<82x82xf32> to vector<82xf32>
    %97 = vector.shape_cast %96 : vector<82xf32> to vector<82x1xf32>
    %98 = tpu.reciprocal %97 {approx = true} : vector<82x1xf32> -> vector<82x1xf32>
    %99 = vector.broadcast %98 : vector<82x1xf32> to vector<82x82xf32>
    %100 = arith.mulf %95, %99 : vector<82x82xf32>
    %cst_35 = arith.constant dense<0.000000e+00> : vector<82x8xf32>
    %101 = tpu.matmul %100, %86, %cst_35 {dimension_numbers = #tpu.dot_dimension_numbers<[1], [0], [0], [1], [0, 0, 1, 1], [], []>} : vector<82x82xf32>, vector<82x8xf32>, vector<82x8xf32> -> vector<82x8xf32>
    %102 = vector.extract_strided_slice %42 {offsets = [0, 24], sizes = [82, 8], strides = [1, 1]} : vector<82x32xf32> to vector<82x8xf32>
    %103 = vector.extract_strided_slice %46 {offsets = [0, 24], sizes = [82, 8], strides = [1, 1]} : vector<82x64xf32> to vector<82x8xf32>
    %104 = vector.extract_strided_slice %46 {offsets = [0, 56], sizes = [82, 8], strides = [1, 1]} : vector<82x64xf32> to vector<82x8xf32>
    %cst_36 = arith.constant dense<0.000000e+00> : vector<82x82xf32>
    %105 = tpu.matmul %102, %103, %cst_36 {dimension_numbers = #tpu.dot_dimension_numbers<[1], [1], [0], [0], [0, 0, 1, 0], [], []>} : vector<82x8xf32>, vector<82x8xf32>, vector<82x82xf32> -> vector<82x82xf32>
    %cst_37 = arith.constant 0.353553385 : f32
    %106 = vector.broadcast %cst_37 : f32 to vector<82x82xf32>
    %107 = arith.mulf %105, %106 : vector<82x82xf32>
    %108 = arith.addf %107, %47 : vector<82x82xf32>
    %cst_38 = arith.constant dense<0xFF800000> : vector<82xf32>
    %109 = vector.multi_reduction <maximumf>, %108, %cst_38 [1] : vector<82x82xf32> to vector<82xf32>
    %110 = vector.shape_cast %109 : vector<82xf32> to vector<82x1xf32>
    %111 = vector.broadcast %110 : vector<82x1xf32> to vector<82x82xf32>
    %112 = arith.subf %108, %111 : vector<82x82xf32>
    %113 = math.exp %112 : vector<82x82xf32>
    %cst_39 = arith.constant dense<0.000000e+00> : vector<82xf32>
    %114 = vector.multi_reduction <add>, %113, %cst_39 [1] : vector<82x82xf32> to vector<82xf32>
    %115 = vector.shape_cast %114 : vector<82xf32> to vector<82x1xf32>
    %116 = tpu.reciprocal %115 {approx = true} : vector<82x1xf32> -> vector<82x1xf32>
    %117 = vector.broadcast %116 : vector<82x1xf32> to vector<82x82xf32>
    %118 = arith.mulf %113, %117 : vector<82x82xf32>
    %cst_40 = arith.constant dense<0.000000e+00> : vector<82x8xf32>
    %119 = tpu.matmul %118, %104, %cst_40 {dimension_numbers = #tpu.dot_dimension_numbers<[1], [0], [0], [1], [0, 0, 1, 1], [], []>} : vector<82x82xf32>, vector<82x8xf32>, vector<82x8xf32> -> vector<82x8xf32>
    %120 = tpu.concatenate %65, %83, %101, %119 in 1 : vector<82x8xf32>, vector<82x8xf32>, vector<82x8xf32>, vector<82x8xf32> -> vector<82x32xf32>
    %121 = arith.addf %120, %37 : vector<82x32xf32>
    %122 = vector.broadcast %6 : vector<1x32xf32> to vector<82x32xf32>
    %123 = arith.mulf %121, %122 : vector<82x32xf32>
    %124 = vector.broadcast %7 : vector<1x32xf32> to vector<82x32xf32>
    %125 = arith.addf %123, %124 : vector<82x32xf32>
    %c0_41 = arith.constant 0 : index
    %c0_42 = arith.constant 0 : index
    %126 = vector.load %arg8[%c0_41, %c0_42] : memref<82x64xf32, #tpu.memory_space<vmem>>, vector<82x64xf32>
    %127 = vector.extract_strided_slice %126 {offsets = [0, 0], sizes = [82, 32], strides = [1, 1]} : vector<82x64xf32> to vector<82x32xf32>
    %128 = arith.mulf %125, %127 : vector<82x32xf32>
    %cst_43 = arith.constant dense<0.000000e+00> : vector<82xf32>
    %129 = vector.multi_reduction <add>, %128, %cst_43 [1] : vector<82x32xf32> to vector<82xf32>
    %130 = vector.shape_cast %129 : vector<82xf32> to vector<82x1xf32>
    %131 = vector.extract_strided_slice %126 {offsets = [0, 32], sizes = [82, 32], strides = [1, 1]} : vector<82x64xf32> to vector<82x32xf32>
    %132 = arith.mulf %125, %131 : vector<82x32xf32>
    %cst_44 = arith.constant dense<0.000000e+00> : vector<82xf32>
    %133 = vector.multi_reduction <add>, %132, %cst_44 [1] : vector<82x32xf32> to vector<82xf32>
    %134 = vector.shape_cast %133 : vector<82xf32> to vector<82x1xf32>
    %135 = tpu.concatenate %130, %134 in 1 : vector<82x1xf32>, vector<82x1xf32> -> vector<82x2xf32>
    %c0_45 = arith.constant 0 : index
    %c0_46 = arith.constant 0 : index
    %136 = vector.load %arg9[%c0_45, %c0_46] : memref<2x82xf32, #tpu.memory_space<vmem>>, vector<2x82xf32>
    %cst_47 = arith.constant dense<0.000000e+00> : vector<2x2xf32>
    %137 = tpu.matmul %136, %135, %cst_47 {dimension_numbers = #tpu.dot_dimension_numbers<[1], [0], [0], [1], [0, 0, 1, 1], [], []>} : vector<2x82xf32>, vector<82x2xf32>, vector<2x2xf32> -> vector<2x2xf32>
    %138 = vector.broadcast %8 : vector<1x2xf32> to vector<2x2xf32>
    %139 = arith.addf %137, %138 : vector<2x2xf32>
    %c0_48 = arith.constant 0 : index
    %c0_49 = arith.constant 0 : index
    %140 = vector.load %arg10[%c0_48, %c0_49] : memref<2x2xf32, #tpu.memory_space<vmem>>, vector<2x2xf32>
    tpu.vector_store %arg10[%c0_48, %c0_49], %139 {strides = array<i32>} : memref<2x2xf32, #tpu.memory_space<vmem>>, vector<2x2xf32>,
    return
  }
  func.func @transform_0(%arg0: i32) -> (i32, i32) {
    %c0_i32 = arith.constant 0 : i32
    %c0_i32_0 = arith.constant 0 : i32
    return %arg0, %c0_i32 : i32, i32
  }
  func.func @transform_1(%arg0: i32) -> (i32, i32) {
    %c0_i32 = arith.constant 0 : i32
    %c0_i32_0 = arith.constant 0 : i32
    return %arg0, %c0_i32 : i32, i32
  }
  func.func @transform_2(%arg0: i32) -> (i32, i32) {
    %c0_i32 = arith.constant 0 : i32
    %c0_i32_0 = arith.constant 0 : i32
    %c0_i32_1 = arith.constant 0 : i32
    return %c0_i32, %c0_i32_0 : i32, i32
  }
  func.func @transform_3(%arg0: i32) -> (i32, i32) {
    %c0_i32 = arith.constant 0 : i32
    %c0_i32_0 = arith.constant 0 : i32
    %c0_i32_1 = arith.constant 0 : i32
    return %c0_i32, %c0_i32_0 : i32, i32
  }
  func.func @transform_4(%arg0: i32) -> (i32, i32) {
    %c0_i32 = arith.constant 0 : i32
    %c0_i32_0 = arith.constant 0 : i32
    %c0_i32_1 = arith.constant 0 : i32
    return %c0_i32, %c0_i32_0 : i32, i32
  }
  func.func @transform_5(%arg0: i32) -> (i32, i32) {
    %c0_i32 = arith.constant 0 : i32
    %c0_i32_0 = arith.constant 0 : i32
    %c0_i32_1 = arith.constant 0 : i32
    return %c0_i32, %c0_i32_0 : i32, i32
  }
  func.func @transform_6(%arg0: i32) -> (i32, i32) {
    %c0_i32 = arith.constant 0 : i32
    %c0_i32_0 = arith.constant 0 : i32
    %c0_i32_1 = arith.constant 0 : i32
    return %c0_i32, %c0_i32_0 : i32, i32
  }
  func.func @transform_7(%arg0: i32) -> (i32, i32) {
    %c0_i32 = arith.constant 0 : i32
    %c0_i32_0 = arith.constant 0 : i32
    %c0_i32_1 = arith.constant 0 : i32
    return %c0_i32, %c0_i32_0 : i32, i32
  }
  func.func @transform_8(%arg0: i32) -> (i32, i32) {
    %c0_i32 = arith.constant 0 : i32
    %c0_i32_0 = arith.constant 0 : i32
    %c0_i32_1 = arith.constant 0 : i32
    return %c0_i32, %c0_i32_0 : i32, i32
  }
  func.func @transform_9(%arg0: i32) -> (i32, i32) {
    %c0_i32 = arith.constant 0 : i32
    %c0_i32_0 = arith.constant 0 : i32
    return %arg0, %c0_i32 : i32, i32
  }
}

</mosaic_0001>

<bundles_post_ra>
// kernel: tile.9
= control target key start
LH: loop header
LB: loop body
LE: loop exit
PB: predicated region body
PF: predicated region fallthrough
CT: control target
= control target key end

     0   :  { %vm3_vm0 = vcmask 523264   ;;  %s26_s6 = smov 3  ;;  %s163_s0 = inlined_call_operand.vmem [shape: f32[2,41,64], index: 0, kind: input, shape index: {}]   ;;  %s164_s1 = inlined_call_operand.vmem [shape: f32[82,64], index: 1, kind: output, shape index: {}]  }
   0x1   :  { %v2_v0 = vld [vmem:[%s163_s0] sm:$0xff]   ;;  %v56_v1 = vld [vmem:[%s163_s0 + $0x8] sm:$0xff]   ;;  %v58_v2 = vld [vmem:[%s163_s0 + $0x10] sm:$0xff]  }
   0x2   :  { %4 = vst.msk [vmem:[%s164_s1] sm:$0xff] %vm3_vm0, %v2_v0   ;;  %57 = vst.msk [vmem:[%s164_s1 + $0x8] sm:$0xff] %vm3_vm0, %v56_v1   ;;  %v60_v3 = vld [vmem:[%s163_s0 + $0x18] sm:$0xff]   ;;  %v62_v4 = vld [vmem:[%s163_s0 + $0x20] sm:$0xff]  }
   0x3   :  { %59 = vst.msk [vmem:[%s164_s1 + $0x10] sm:$0xff] %vm3_vm0, %v58_v2   ;;  %v64_v5 = vld [vmem:[%s163_s0 + $0x28] ss:$8 sm:%s26_s6]   ;;  %61 = vst.msk [vmem:[%s164_s1 + $0x18] sm:$0xff] %vm3_vm0, %v60_v3  }
   0x4   :  { %63 = vst.msk [vmem:[%s164_s1 + $0x20] sm:$0xff] %vm3_vm0, %v62_v4   ;;  %65 = vst.msk [vmem:[%s164_s1 + $0x28] sm:$0x3] %vm3_vm0, %v64_v5   ;;  %v66_v6 = vld [vmem:[%s163_s0 + $0x31] sm:$0xff]   ;;  %v68_v7 = vld [vmem:[%s163_s0 + $0x39] sm:$0xff]  }
   0x5   :  { %v70_v8 = vld [vmem:[%s163_s0 + $0x41] sm:$0xff]   ;;  %67 = vst.msk [vmem:[%s164_s1 + $0x2a] sm:$0xff] %vm3_vm0, %v66_v6   ;;  %69 = vst.msk [vmem:[%s164_s1 + $0x32] sm:$0xff] %vm3_vm0, %v68_v7   ;;  %v72_v9 = vld [vmem:[%s163_s0 + $0x49] sm:$0xff]  }
   0x6   :  { %71 = vst.msk [vmem:[%s164_s1 + $0x3a] sm:$0xff] %vm3_vm0, %v70_v8   ;;  %v74_v10 = vld [vmem:[%s163_s0 + $0x51] sm:$0xff]   ;;  %73 = vst.msk [vmem:[%s164_s1 + $0x42] sm:$0xff] %vm3_vm0, %v72_v9  }
   0x7   :  { %75 = vst.msk [vmem:[%s164_s1 + $0x4a] sm:$0xff] %vm3_vm0, %v74_v10  }

// kernel: cross_model_attention.1
= control target key start
LH: loop header
LB: loop body
LE: loop exit
PB: predicated region body
PF: predicated region fallthrough
CT: control target
= control target key end

     0   :  { %s8528_s0 = inlined_call_operand.vmem [shape: bf16[82,1024], index: 0, kind: input, shape index: {}]   ;;  %s8529_s1 = inlined_call_operand.vmem [shape: f32[82,32], index: 1, kind: input, shape index: {}]   ;;  %s8530_s2 = inlined_call_operand.vmem [shape: bf16[1024,32], index: 2, kind: input, shape index: {}]   ;;  %s8531_s3 = inlined_call_operand.vmem [shape: f32[32,32], index: 3, kind: input, shape index: {}]   ;;  %s8532_s4 = inlined_call_operand.vmem [shape: f32[32,64], index: 4, kind: input, shape index: {}]   ;;  %s8533_s5 = inlined_call_operand.vmem [shape: f32[8,64], index: 5, kind: input, shape index: {}]   ;;  %s8534_s6 = inlined_call_operand.vmem [shape: f32[82,82], index: 6, kind: input, shape index: {}]   ;;  %s8535_s7 = inlined_call_operand.vmem [shape: f32[82,64], index: 7, kind: input, shape index: {}]   ;;  %s8536_s8 = inlined_call_operand.vmem [shape: f32[2,82], index: 8, kind: input, shape index: {}]   ;;  %s8537_s9 = inlined_call_operand.hbm [shape: f32[2,2], index: 9, kind: output, shape index: {}]  }
   0x1   :  { %v5869_v0 = vld [vmem:[%s8530_s2 + $0x40] sm:$0xff]   ;;  %v5873_v4 = vld [vmem:[%s8530_s2 + $0x48] sm:$0xff]   ;;  %v5877_v8 = vld [vmem:[%s8530_s2 + $0x50] sm:$0xff]  }
   0x2   :  { %v5870_v1 = vld [vmem:[%s8530_s2 + $0xc0] sm:$0xff]   ;;  %4540 = vmatprep.subr.bf16.mxu0 %v5869_v0  ;;  %v5874_v5 = vld [vmem:[%s8530_s2 + $0xc8] sm:$0xff]   ;;  %v5878_v9 = vld [vmem:[%s8530_s2 + $0xd0] sm:$0xff]  }
   0x3   :  { %v5871_v2 = vld [vmem:[%s8530_s2] sm:$0xff]   ;;  %4592 = vmatprep.subr.bf16.mxu1 %v5870_v1  ;;  %v5875_v6 = vld [vmem:[%s8530_s2 + $0x8] sm:$0xff]   ;;  %v5879_v10 = vld [vmem:[%s8530_s2 + $0x10] sm:$0xff]  }
   0x4   :  { %v5872_v3 = vld [vmem:[%s8530_s2 + $0x80] sm:$0xff]   ;;  %4541 = vmatpush3.bf16.msra.mxu0 %v5871_v2  ;;  %v5876_v7 = vld [vmem:[%s8530_s2 + $0x88] sm:$0xff]   ;;  %v5880_v11 = vld [vmem:[%s8530_s2 + $0x90] sm:$0xff]  }
   0x5   :  { %4593 = vmatpush3.bf16.msra.mxu1 %v5872_v3  ;;  %4542 = vmatprep.subr.bf16.mxu0 %v5873_v4  ;;  %v5881_v12 = vld [vmem:[%s8530_s2 + $0x58] sm:$0xff]   ;;  %v5885_v16 = vld [vmem:[%s8530_s2 + $0x60] sm:$0xff]   ;;  %v5889_v20 = vld [vmem:[%s8530_s2 + $0x68] sm:$0xff]  }
   0x6   :  { %4594 = vmatprep.subr.bf16.mxu1 %v5874_v5  ;;  %v5882_v13 = vld [vmem:[%s8530_s2 + $0xd8] sm:$0xff]   ;;  %v5886_v17 = vld [vmem:[%s8530_s2 + $0xe0] sm:$0xff]   ;;  %v5890_v21 = vld [vmem:[%s8530_s2 + $0xe8] sm:$0xff]  }
   0x7   :  { %v5883_v14 = vld [vmem:[%s8530_s2 + $0x18] sm:$0xff]   ;;  %v5887_v18 = vld [vmem:[%s8530_s2 + $0x20] sm:$0xff]   ;;  %v5891_v22 = vld [vmem:[%s8530_s2 + $0x28] sm:$0xff]  }
   0x8   :  { %4543 = vmatpush3.bf16.msra.mxu0 %v5875_v6  ;;  %v5884_v15 = vld [vmem:[%s8530_s2 + $0x98] sm:$0xff]   ;;  %v5888_v19 = vld [vmem:[%s8530_s2 + $0xa0] sm:$0xff]   ;;  %v5892_v23 = vld [vmem:[%s8530_s2 + $0xa8] sm:$0xff]  }
   0x9   :  { %4595 = vmatpush3.bf16.msra.mxu1 %v5876_v7  ;;  %4544 = vmatprep.subr.bf16.mxu0 %v5877_v8  ;;  %v5893_v24 = vld [vmem:[%s8530_s2 + $0x70] sm:$0xff]   ;;  %v5897_v28 = vld [vmem:[%s8530_s2 + $0x78] sm:$0xff]   ;;  %v35_v32 = vld [vmem:[%s8528_s0] sm:$0xff] }
   0xa   :  { %4596 = vmatprep.subr.bf16.mxu1 %v5878_v9  ;;  %v5894_v25 = vld [vmem:[%s8530_s2 + $0xf0] sm:$0xff]   ;;  %v5898_v29 = vld [vmem:[%s8530_s2 + $0xf8] sm:$0xff]   ;;  %v39_v33 = vld [vmem:[%s8528_s0 + $0x20] sm:$0xff] }
   0xb   :  { %v5895_v26 = vld [vmem:[%s8530_s2 + $0x30] sm:$0xff]   ;;  %v5899_v30 = vld [vmem:[%s8530_s2 + $0x38] sm:$0xff]   ;;  %v36_v34 = vld [vmem:[%s8528_s0 + $0x8] sm:$0xff]  ;;  %v4268_v35 = vcombine.low %v35_v32, %v39_v33  ;;  %v4269_v36 = vcombine.high %v35_v32, %v39_v33 }
   0xc   :  { %4545 = vmatpush3.bf16.msra.mxu0 %v5879_v10  ;;  %v5896_v27 = vld [vmem:[%s8530_s2 + $0xb0] sm:$0xff]   ;;  %v5900_v31 = vld [vmem:[%s8530_s2 + $0xb8] sm:$0xff]   ;;  %v40_v37 = vld [vmem:[%s8528_s0 + $0x28] sm:$0xff] }
   0xd   :  { %4597 = vmatpush3.bf16.msra.mxu1 %v5880_v11  ;;  %4546 = vmatprep.subr.bf16.mxu0 %v5881_v12  ;;  %v43_v38 = vld [vmem:[%s8528_s0 + $0x40] sm:$0xff]  ;;  %v4270_v40 = vcombine.low %v36_v34, %v40_v37  ;;  %v4271_v41 = vcombine.high %v36_v34, %v40_v37  ;;  %v44_v43 = vld [vmem:[%s8528_s0 + $0x48] sm:$0xff]  ;;  %v5909_v62 = vld [vmem:[%s8530_s2 + $0x150] sm:$0xff]  }
   0xe   :  { %4598 = vmatprep.subr.bf16.mxu1 %v5882_v13  ;;  %v47_v39 = vld [vmem:[%s8528_s0 + $0x60] sm:$0xff]  ;;  %v48_v44 = vld [vmem:[%s8528_s0 + $0x68] sm:$0xff]  ;;  %855 = vmatprep.mubr.bf16.mxu0 %v4269_v36  ;;  %v5910_v63 = vld [vmem:[%s8530_s2 + $0x110] sm:$0xff]  }
   0xf   :  { %v4277_v42 = vcombine.high %v43_v38, %v47_v39  ;;  %v4279_v45 = vcombine.high %v44_v43, %v48_v44  ;;  %v5901_v46 = vld [vmem:[%s8530_s2 + $0x140] sm:$0xff]   ;;  %935 = vmatprep.mubr.bf16.mxu1 %v4271_v41  ;;  %v5905_v50 = vld [vmem:[%s8530_s2 + $0x148] sm:$0xff]   ;;  %v4276_v52 = vcombine.low %v43_v38, %v47_v39  ;;  %v4278_v56 = vcombine.low %v44_v43, %v48_v44  ;;  %v5911_v0 = vld [vmem:[%s8530_s2 + $0x1d0] sm:$0xff]  }
  0x10   :  { %4547 = vmatpush3.bf16.msra.mxu0 %v5883_v14  ;;  %v5902_v47 = vld [vmem:[%s8530_s2 + $0x100] sm:$0xff]   ;;  %v52_v54 = vld [vmem:[%s8528_s0 + $0x88] sm:$0xff]  ;;  %v5912_v8 = vld [vmem:[%s8530_s2 + $0x190] sm:$0xff]  }
  0x11   :  { %4599 = vmatpush3.bf16.msra.mxu1 %v5884_v15  ;;  %4548 = vmatprep.subr.bf16.mxu0 %v5885_v16  ;;  %v5903_v48 = vld [vmem:[%s8530_s2 + $0x1c0] sm:$0xff]   ;;  %v56_v55 = vld [vmem:[%s8528_s0 + $0xa8] sm:$0xff]  ;;  %v5913_v10 = vld [vmem:[%s8530_s2 + $0x158] sm:$0xff]  }
  0x12   :  { %4600 = vmatprep.subr.bf16.mxu1 %v5886_v17  ;;  %v5904_v49 = vld [vmem:[%s8530_s2 + $0x180] sm:$0xff]   ;;  %v5906_v58 = vld [vmem:[%s8530_s2 + $0x108] sm:$0xff]   ;;  %v4287_v59 = vcombine.high %v52_v54, %v56_v55  ;;  %v4286_v6 = vcombine.low %v52_v54, %v56_v55  ;;  %v5914_v11 = vld [vmem:[%s8530_s2 + $0x118] sm:$0xff]  }
  0x13   :  { %v51_v51 = vld [vmem:[%s8528_s0 + $0x80] sm:$0xff]  ;;  %v5907_v60 = vld [vmem:[%s8530_s2 + $0x1c8] sm:$0xff]   ;;  %v5915_v12 = vld [vmem:[%s8530_s2 + $0x1d8] sm:$0xff]  }
  0x14   :  { %4549 = vmatpush3.bf16.msra.mxu0 %v5887_v18  ;;  %v55_v53 = vld [vmem:[%s8528_s0 + $0xa0] sm:$0xff]  ;;  %v5908_v61 = vld [vmem:[%s8530_s2 + $0x188] sm:$0xff]   ;;  %v5916_v13 = vld [vmem:[%s8530_s2 + $0x198] sm:$0xff]  }
  0x15   :  { %4601 = vmatpush3.bf16.msra.mxu1 %v5888_v19  ;;  %4550 = vmatprep.subr.bf16.mxu0 %v5889_v20  ;;  %v4285_v57 = vcombine.high %v51_v51, %v55_v53  ;;  %v59_v1 = vld [vmem:[%s8528_s0 + $0xc0] sm:$0xff]  ;;  %v60_v3 = vld [vmem:[%s8528_s0 + $0xc8] sm:$0xff]  ;;  %v4284_v4 = vcombine.low %v51_v51, %v55_v53  ;;  %v5929_v33 = vld [vmem:[%s8530_s2 + $0x170] sm:$0xff]  }
  0x16   :  { %4602 = vmatprep.subr.bf16.mxu1 %v5890_v21  ;;  %v63_v2 = vld [vmem:[%s8528_s0 + $0xe0] sm:$0xff]  ;;  %v64_v5 = vld [vmem:[%s8528_s0 + $0xe8] sm:$0xff]  ;;  %v5930_v36 = vld [vmem:[%s8530_s2 + $0x1f0] sm:$0xff]  }
  0x17   :  { %v4293_v7 = vcombine.high %v59_v1, %v63_v2  ;;  %v4295_v9 = vcombine.high %v60_v3, %v64_v5  ;;  %v67_v14 = vld [vmem:[%s8528_s0 + $0x100] sm:$0xff]  ;;  %v68_v16 = vld [vmem:[%s8528_s0 + $0x108] sm:$0xff]  ;;  %v4292_v19 = vcombine.low %v59_v1, %v63_v2  ;;  %v4294_v21 = vcombine.low %v60_v3, %v64_v5  ;;  %v5931_v38 = vld [vmem:[%s8530_s2 + $0x130] sm:$0xff]  }
  0x18   :  { %4551 = vmatpush3.bf16.msra.mxu0 %v5891_v22  ;;  %v71_v15 = vld [vmem:[%s8528_s0 + $0x120] sm:$0xff]  ;;  %v72_v17 = vld [vmem:[%s8528_s0 + $0x128] sm:$0xff]  ;;  %v5932_v39 = vld [vmem:[%s8530_s2 + $0x1b0] sm:$0xff]  }
  0x19   :  { %4603 = vmatpush3.bf16.msra.mxu1 %v5892_v23  ;;  %4552 = vmatprep.subr.bf16.mxu0 %v5893_v24  ;;  %v5917_v18 = vld [vmem:[%s8530_s2 + $0x160] sm:$0xff]   ;;  %v4301_v22 = vcombine.high %v67_v14, %v71_v15  ;;  %v4303_v24 = vcombine.high %v68_v16, %v72_v17  ;;  %v4300_v32 = vcombine.low %v67_v14, %v71_v15  ;;  %v5934_v41 = vld [vmem:[%s8530_s2 + $0x1f8] sm:$0xff]   ;;  %v37_v44 = vld [vmem:[%s8528_s0 + $0x10] sm:$0xff] }
  0x1a   :  { %4604 = vmatprep.subr.bf16.mxu1 %v5894_v25  ;;  %v5918_v20 = vld [vmem:[%s8530_s2 + $0x1e0] sm:$0xff]   ;;  %v4302_v34 = vcombine.low %v68_v16, %v72_v17  ;;  %v5936_v43 = vld [vmem:[%s8530_s2 + $0x1b8] sm:$0xff]   ;;  %v49_v53 = vld [vmem:[%s8528_s0 + $0x70] sm:$0xff] }
  0x1b   :  { %v5919_v23 = vld [vmem:[%s8530_s2 + $0x120] sm:$0xff]  }
  0x1c   :  { %4553 = vmatpush3.bf16.msra.mxu0 %v5895_v26  ;;  %v5920_v25 = vld [vmem:[%s8530_s2 + $0x1a0] sm:$0xff]   ;;  %v5921_v26 = vld [vmem:[%s8530_s2 + $0x168] sm:$0xff]  }
  0x1d   :  { %4605 = vmatpush3.bf16.msra.mxu1 %v5896_v27  ;;  %4554 = vmatprep.subr.bf16.mxu0 %v5897_v28  ;;  %v5922_v27 = vld [vmem:[%s8530_s2 + $0x1e8] sm:$0xff]  }
  0x1e   :  { %4606 = vmatprep.subr.bf16.mxu1 %v5898_v29  ;;  %v5923_v28 = vld [vmem:[%s8530_s2 + $0x128] sm:$0xff]  }
  0x1f   :  { %v5924_v29 = vld [vmem:[%s8530_s2 + $0x1a8] sm:$0xff]  }
  0x20   :  { %4555 = vmatpush3.bf16.msra.mxu0 %v5899_v30  ;;  %v75_v30 = vld [vmem:[%s8528_s0 + $0x140] sm:$0x11] }
  0x21   :  { %4607 = vmatpush3.bf16.msra.mxu1 %v5900_v31  ;;  %4644 = vmatprep.subr.bf16.mxu0 %v5901_v46  ;;  %v76_v31 = vld [vmem:[%s8528_s0 + $0x148] sm:$0x11]  ;;  %v4308_v46 = vcombine.low %v75_v30, %v75_v30 }
  0x22   :  { %4696 = vmatprep.subr.bf16.mxu1 %v5903_v48  ;;  %v4311_v37 = vcombine.high %v76_v31, %v76_v31  ;;  %v42_v48 = vld [vmem:[%s8528_s0 + $0x38] sm:$0xff] }
  0x23   :  { %856 = vmatmul.mubr.bf16.vlgmr.msra.gmra.mrb[0].mxu0 %v4268_v35  ;;  %v4309_v35 = vcombine.high %v75_v30, %v75_v30 }
  0x24   :  { %936 = vmatmul.mubr.bf16.vlgmr.msra.gmra.mrb[0].mxu1 %v4270_v40  ;;  %863 = vmatprep.mubr.bf16.mxu0 %v4277_v42  ;;  %v5933_v40 = vld [vmem:[%s8530_s2 + $0x178] sm:$0xff]  }
  0x25   :  { %943 = vmatprep.mubr.bf16.mxu1 %v4279_v45  ;;  %4645 = vmatpush3.bf16.msra.mxu0 %v5902_v47  ;;  %v5935_v42 = vld [vmem:[%s8530_s2 + $0x138] sm:$0xff]   ;;  %v41_v45 = vld [vmem:[%s8528_s0 + $0x30] sm:$0xff] }
  0x26   :  { %4697 = vmatpush3.bf16.msra.mxu1 %v5904_v49  ;;  %4646 = vmatprep.subr.bf16.mxu0 %v5905_v50  ;;  %v38_v47 = vld [vmem:[%s8528_s0 + $0x18] sm:$0xff]  ;;  %v4310_v49 = vcombine.low %v76_v31, %v76_v31  ;;  %v4273_v50 = vcombine.high %v37_v44, %v41_v45 }
  0x27   :  { %4698 = vmatprep.subr.bf16.mxu1 %v5907_v60  ;;  %v4275_v51 = vcombine.high %v38_v47, %v42_v48 }
  0x29   :  { %4647 = vmatpush3.bf16.msra.mxu0 %v5906_v58 }
  0x2a   :  { %4699 = vmatpush3.bf16.msra.mxu1 %v5908_v61  ;;  %4648 = vmatprep.subr.bf16.mxu0 %v5909_v62 }
  0x2b   :  { %864 = vmatmul.mubr.bf16.gmra.mrb[4].mxu0 %v4276_v52  ;;  %4700 = vmatprep.subr.bf16.mxu1 %v5911_v0  ;;  %v45_v52 = vld [vmem:[%s8528_s0 + $0x50] sm:$0xff] }
  0x2c   :  { %944 = vmatmul.mubr.bf16.gmra.mrb[4].mxu1 %v4278_v56  ;;  %871 = vmatprep.mubr.bf16.mxu0 %v4285_v57 }
  0x2d   :  { %951 = vmatprep.mubr.bf16.mxu1 %v4287_v59  ;;  %4649 = vmatpush3.bf16.msra.mxu0 %v5910_v63 }
  0x2e   :  { %4701 = vmatpush3.bf16.msra.mxu1 %v5912_v8  ;;  %4650 = vmatprep.subr.bf16.mxu0 %v5913_v10 }
  0x2f   :  { %4702 = vmatprep.subr.bf16.mxu1 %v5915_v12 }
  0x31   :  { %4651 = vmatpush3.bf16.msra.mxu0 %v5914_v11 }
  0x32   :  { %4703 = vmatpush3.bf16.msra.mxu1 %v5916_v13  ;;  %4652 = vmatprep.subr.bf16.mxu0 %v5917_v18 }
  0x33   :  { %872 = vmatmul.mubr.bf16.gmra.mrb[8].mxu0 %v4284_v4  ;;  %4704 = vmatprep.subr.bf16.mxu1 %v5918_v20 }
  0x34   :  { %952 = vmatmul.mubr.bf16.gmra.mrb[8].mxu1 %v4286_v6  ;;  %879 = vmatprep.mubr.bf16.mxu0 %v4293_v7 }
  0x35   :  { %959 = vmatprep.mubr.bf16.mxu1 %v4295_v9  ;;  %4653 = vmatpush3.bf16.msra.mxu0 %v5919_v23 }
  0x36   :  { %4705 = vmatpush3.bf16.msra.mxu1 %v5920_v25  ;;  %4654 = vmatprep.subr.bf16.mxu0 %v5921_v26 }
  0x37   :  { %4706 = vmatprep.subr.bf16.mxu1 %v5922_v27 }
  0x39   :  { %4655 = vmatpush3.bf16.msra.mxu0 %v5923_v28 }
  0x3a   :  { %4707 = vmatpush3.bf16.msra.mxu1 %v5924_v29  ;;  %4656 = vmatprep.subr.bf16.mxu0 %v5929_v33 }
  0x3b   :  { %880 = vmatmul.mubr.bf16.gmra.mrb[12].mxu0 %v4292_v19  ;;  %4708 = vmatprep.subr.bf16.mxu1 %v5930_v36 }
  0x3c   :  { %960 = vmatmul.mubr.bf16.gmra.mrb[12].mxu1 %v4294_v21  ;;  %887 = vmatprep.mubr.bf16.mxu0 %v4301_v22 }
  0x3d   :  { %967 = vmatprep.mubr.bf16.mxu1 %v4303_v24  ;;  %4657 = vmatpush3.bf16.msra.mxu0 %v5931_v38 }
  0x3e   :  { %4709 = vmatpush3.bf16.msra.mxu1 %v5932_v39  ;;  %4658 = vmatprep.subr.bf16.mxu0 %v5933_v40 }
  0x3f   :  { %4710 = vmatprep.subr.bf16.mxu1 %v5934_v41 }
  0x41   :  { %4659 = vmatpush3.bf16.msra.mxu0 %v5935_v42 }
  0x42   :  { %4711 = vmatpush3.bf16.msra.mxu1 %v5936_v43 }
  0x43   :  { %888 = vmatmul.mubr.bf16.gmra.mrb[16].mxu0 %v4300_v32 }
  0x44   :  { %968 = vmatmul.mubr.bf16.gmra.mrb[16].mxu1 %v4302_v34  ;;  %895 = vmatprep.mubr.bf16.mxu0 %v4309_v35 }
  0x45   :  { %975 = vmatprep.mubr.bf16.mxu1 %v4311_v37 }
  0x4b   :  { %896 = vmatmul.mubr.bf16.gmra.mrb[20].mxu0 %v4308_v46 }
  0x4c   :  { %976 = vmatmul.mubr.bf16.gmra.mrb[20].mxu1 %v4310_v49  ;;  %1015 = vmatprep.mubr.bf16.mxu0 %v4273_v50 }
  0x4d   :  { %1095 = vmatprep.mubr.bf16.mxu1 %v4275_v51 }
  0x4e   :  { %14 = vsyncpa [#allocation3], 0  ;;  %v46_v54 = vld [vmem:[%s8528_s0 + $0x58] sm:$0xff]  ;;  %v4272_v56 = vcombine.low %v37_v44, %v41_v45  ;;  %v4274_v57 = vcombine.low %v38_v47, %v42_v48  ;;  %v4281_v58 = vcombine.high %v45_v52, %v49_v53  ;;  %v53_v60 = vld [vmem:[%s8528_s0 + $0x90] sm:$0xff]  ;;  %v4280_v0 = vcombine.low %v45_v52, %v49_v53  ;;  %s6169_s27 = smov 112   ;;  %s6170_s28 = smov 104  }
  0x4f   :  { %v50_v55 = vld [vmem:[%s8528_s0 + $0x78] sm:$0xff]  ;;  %v57_v61 = vld [vmem:[%s8528_s0 + $0xb0] sm:$0xff]  ;;  %v207_v28 = vlaneseq  ;;  %v6559_v31 = vld [vmem:[%s8533_s5] sm:$0xff]  ;;  %vm1154_vm0 = vcmask 261120   ;;  %vm1185_vm1 = vcmask 254976   ;;  %vm6166_vm2 = vmmov 0  }
  0x50   :  { %v4283_v59 = vcombine.high %v46_v54, %v50_v55  ;;  %v54_v62 = vld [vmem:[%s8528_s0 + $0x98] sm:$0xff]  ;;  %v4282_v1 = vcombine.low %v46_v54, %v50_v55  ;;  %v4289_v2 = vcombine.high %v53_v60, %v57_v61  ;;  %v61_v4 = vld [vmem:[%s8528_s0 + $0xd0] sm:$0xff]  ;;  %v4288_v8 = vcombine.low %v53_v60, %v57_v61  ;;  %s6171_s29 = smov 96   ;;  %s6172_s30 = smov 88  }
  0x51   :  { %v58_v63 = vld [vmem:[%s8528_s0 + $0xb8] sm:$0xff]  ;;  %v65_v5 = vld [vmem:[%s8528_s0 + $0xf0] sm:$0xff]  ;;  %v6553_v29 = vshrl.u32 %v207_v28, 7  ;;  %vm1674_vm3 = vcmask 64512   ;;  %s6173_s10 = smov 80   ;;  %vm1883_vm5 = vcmask 670720  }
  0x52   :  { %v4291_v3 = vcombine.high %v54_v62, %v58_v63  ;;  %v62_v6 = vld [vmem:[%s8528_s0 + $0xd8] sm:$0xff]  ;;  %v4290_v9 = vcombine.low %v54_v62, %v58_v63  ;;  %v4297_v10 = vcombine.high %v61_v4, %v65_v5  ;;  %v69_v12 = vld [vmem:[%s8528_s0 + $0x110] sm:$0xff]  ;;  %v4296_v16 = vcombine.low %v61_v4, %v65_v5  ;;  %vm6984_vm4 = vmpackc.low %vm1674_vm3, %vm1674_vm3  ;;  %s6176_s21 = smov 16   ;;  %s6177_s22 = smov 24  }
  0x53   :  { %1016 = vmatmul.mubr.bf16.vlgmr.msra.gmra.mrb[24].mxu0 %v4272_v56  ;;  %v66_v7 = vld [vmem:[%s8528_s0 + $0xf8] sm:$0xff]  ;;  %v73_v13 = vld [vmem:[%s8528_s0 + $0x130] sm:$0xff]  ;;  %8567 = vst [vmem:[#allocation5_spill] sm:$0xff] %v6553_v29  ;;  %v209_v30 = vsub.s32 0, %v6553_v29  ;;  %vm2071_vm6 = vcmask 1041408   ;;  %vm1914_vm7 = vcmask 664576  }
  0x54   :  { %1096 = vmatmul.mubr.bf16.vlgmr.msra.gmra.mrb[24].mxu1 %v4274_v57  ;;  %1023 = vmatprep.mubr.bf16.mxu0 %v4281_v58  ;;  %v4299_v11 = vcombine.high %v62_v6, %v66_v7  ;;  %v70_v14 = vld [vmem:[%s8528_s0 + $0x118] sm:$0xff]  ;;  %v4298_v17 = vcombine.low %v62_v6, %v66_v7  ;;  %v4305_v18 = vcombine.high %v69_v12, %v73_v13  ;;  %v77_v20 = vld [vmem:[%s8528_s0 + $0x150] sm:$0x11]  ;;  %vm3951_vm8 = vcmask 130048  }
  0x55   :  { %1103 = vmatprep.mubr.bf16.mxu1 %v4283_v59  ;;  %v74_v15 = vld [vmem:[%s8528_s0 + $0x138] sm:$0xff]  ;;  %v4304_v22 = vcombine.low %v69_v12, %v73_v13  ;;  %v4313_v24 = vcombine.high %v77_v20, %v77_v20  ;;  %v4312_v26 = vcombine.low %v77_v20, %v77_v20  ;;  %v6562_v33 = vrot.slane %v6559_v31, %v209_v30 }
  0x56   :  { %v4307_v19 = vcombine.high %v70_v14, %v74_v15  ;;  %v78_v21 = vld [vmem:[%s8528_s0 + $0x158] sm:$0x11]  ;;  %v4306_v23 = vcombine.low %v70_v14, %v74_v15  ;;  %vm3963_vm9 = vcmask 195584   ;;  %vm4159_vm10 = vcmask 7168  }
  0x57   :  { %v4315_v25 = vcombine.high %v78_v21, %v78_v21  ;;  %v4314_v27 = vcombine.low %v78_v21, %v78_v21  ;;  %vm4252_vm11 = vcmask 9216  }
  0x5b   :  { %1024 = vmatmul.mubr.bf16.gmra.mrb[28].mxu0 %v4280_v0 }
  0x5c   :  { %1104 = vmatmul.mubr.bf16.gmra.mrb[28].mxu1 %v4282_v1  ;;  %1031 = vmatprep.mubr.bf16.mxu0 %v4289_v2 }
  0x5d   :  { %1111 = vmatprep.mubr.bf16.mxu1 %v4291_v3 }
  0x63   :  { %1032 = vmatmul.mubr.bf16.gmra.mrb[32].mxu0 %v4288_v8 }
  0x64   :  { %1112 = vmatmul.mubr.bf16.gmra.mrb[32].mxu1 %v4290_v9  ;;  %1039 = vmatprep.mubr.bf16.mxu0 %v4297_v10 }
  0x65   :  { %1119 = vmatprep.mubr.bf16.mxu1 %v4299_v11 }
  0x6b   :  { %1040 = vmatmul.mubr.bf16.gmra.mrb[36].mxu0 %v4296_v16 }
  0x6c   :  { %1120 = vmatmul.mubr.bf16.gmra.mrb[36].mxu1 %v4298_v17  ;;  %1047 = vmatprep.mubr.bf16.mxu0 %v4305_v18 }
  0x6d   :  { %1127 = vmatprep.mubr.bf16.mxu1 %v4307_v19 }
  0x73   :  { %1048 = vmatmul.mubr.bf16.gmra.mrb[40].mxu0 %v4304_v22 }
  0x74   :  { %1128 = vmatmul.mubr.bf16.gmra.mrb[40].mxu1 %v4306_v23  ;;  %1055 = vmatprep.mubr.bf16.mxu0 %v4313_v24 }
  0x75   :  { %1135 = vmatprep.mubr.bf16.mxu1 %v4315_v25 }
  0x7b   :  { %1056 = vmatmul.mubr.bf16.gmra.mrb[44].mxu0 %v4312_v26 }
  0x7c   :  { %1136 = vmatmul.mubr.bf16.gmra.mrb[44].mxu1 %v4314_v27 }
  0xf6   :  { %v4556_v32 = vpop.f32.mrb[0].mxu0 }
  0xf7   :  { %v4608_v34 = vpop.f32.mrb[0].mxu1  ;;  %v4557_v35 = vpop.f32.mrb[1].mxu0 }
  0xf8   :  { %v4558_v36 = vadd.f32 %v4557_v35, %v4556_v32  ;;  %v4609_v37 = vpop.f32.mrb[1].mxu1  ;;  %v4559_v38 = vpop.f32.mrb[2].mxu0 }
  0xf9   :  { %v4610_v39 = vadd.f32 %v4609_v37, %v4608_v34  ;;  %v4611_v40 = vpop.f32.mrb[2].mxu1  ;;  %v4560_v41 = vpop.f32.mrb[3].mxu0 }
  0xfa   :  { %v858_v42 = vadd.f32 %v4558_v36, %v6562_v33  ;;  %v4561_v43 = vadd.f32 %v4560_v41, %v4559_v38  ;;  %v4612_v44 = vpop.f32.mrb[3].mxu1 }
  0xfb   :  { %v4613_v45 = vadd.f32 %v4612_v44, %v4611_v40 }
  0xfc   :  { %v6565_v46 = vadd.f32 %v4610_v39, %v858_v42  ;;  %v861_v47 = vadd.f32 %v4561_v43, %v6562_v33 }
  0xfe   :  { %v6568_v48 = vadd.f32 %v4613_v45, %v861_v47  ;;  %v4562_v49 = vpop.f32.mrb[4].mxu0 }
  0xff   :  { %v4614_v50 = vpop.f32.mrb[4].mxu1  ;;  %v4563_v51 = vpop.f32.mrb[5].mxu0 }
 0x100   :  { %v4564_v52 = vadd.f32 %v4563_v51, %v4562_v49  ;;  %v4615_v53 = vpop.f32.mrb[5].mxu1  ;;  %v4565_v54 = vpop.f32.mrb[6].mxu0 }
 0x101   :  { %v4616_v55 = vadd.f32 %v4615_v53, %v4614_v50  ;;  %v4617_v56 = vpop.f32.mrb[6].mxu1  ;;  %v4566_v57 = vpop.f32.mrb[7].mxu0 }
 0x102   :  { %v866_v58 = vadd.f32 %v4564_v52, %v6562_v33  ;;  %v4567_v59 = vadd.f32 %v4566_v57, %v4565_v54  ;;  %v4618_v60 = vpop.f32.mrb[7].mxu1 }
 0x103   :  { %v4619_v61 = vadd.f32 %v4618_v60, %v4617_v56 }
 0x104   :  { %v6571_v62 = vadd.f32 %v4616_v55, %v866_v58  ;;  %v869_v63 = vadd.f32 %v4567_v59, %v6562_v33 }
 0x106   :  { %v6574_v0 = vadd.f32 %v4619_v61, %v869_v63  ;;  %v4568_v1 = vpop.f32.mrb[8].mxu0 }
 0x107   :  { %v4620_v2 = vpop.f32.mrb[8].mxu1  ;;  %v4569_v3 = vpop.f32.mrb[9].mxu0 }
 0x108   :  { %v4570_v4 = vadd.f32 %v4569_v3, %v4568_v1  ;;  %v4621_v5 = vpop.f32.mrb[9].mxu1  ;;  %v4571_v6 = vpop.f32.mrb[10].mxu0 }
 0x109   :  { %v4622_v7 = vadd.f32 %v4621_v5, %v4620_v2  ;;  %v4623_v8 = vpop.f32.mrb[10].mxu1  ;;  %v4572_v9 = vpop.f32.mrb[11].mxu0 }
 0x10a   :  { %v874_v10 = vadd.f32 %v4570_v4, %v6562_v33  ;;  %v4573_v11 = vadd.f32 %v4572_v9, %v4571_v6  ;;  %v4624_v12 = vpop.f32.mrb[11].mxu1 }
 0x10b   :  { %v4625_v13 = vadd.f32 %v4624_v12, %v4623_v8 }
 0x10c   :  { %v6577_v14 = vadd.f32 %v4622_v7, %v874_v10  ;;  %v877_v15 = vadd.f32 %v4573_v11, %v6562_v33 }
 0x10e   :  { %v6580_v16 = vadd.f32 %v4625_v13, %v877_v15  ;;  %v4574_v17 = vpop.f32.mrb[12].mxu0 }
 0x10f   :  { %v4626_v18 = vpop.f32.mrb[12].mxu1  ;;  %v4575_v19 = vpop.f32.mrb[13].mxu0 }
 0x110   :  { %v4576_v20 = vadd.f32 %v4575_v19, %v4574_v17  ;;  %v4627_v21 = vpop.f32.mrb[13].mxu1  ;;  %v4577_v22 = vpop.f32.mrb[14].mxu0 }
 0x111   :  { %v4628_v23 = vadd.f32 %v4627_v21, %v4626_v18  ;;  %v4629_v24 = vpop.f32.mrb[14].mxu1  ;;  %v4578_v25 = vpop.f32.mrb[15].mxu0 }
 0x112   :  { %v882_v26 = vadd.f32 %v4576_v20, %v6562_v33  ;;  %v4579_v27 = vadd.f32 %v4578_v25, %v4577_v22  ;;  %v4630_v28 = vpop.f32.mrb[15].mxu1 }
 0x113   :  { %v4631_v30 = vadd.f32 %v4630_v28, %v4629_v24 }
 0x114   :  { %v6583_v32 = vadd.f32 %v4628_v23, %v882_v26  ;;  %v885_v34 = vadd.f32 %v4579_v27, %v6562_v33 }
 0x116   :  { %v6586_v35 = vadd.f32 %v4631_v30, %v885_v34  ;;  %v4580_v36 = vpop.f32.mrb[16].mxu0 }
 0x117   :  { %v4632_v37 = vpop.f32.mrb[16].mxu1  ;;  %v4581_v38 = vpop.f32.mrb[17].mxu0 }
 0x118   :  { %v4582_v39 = vadd.f32 %v4581_v38, %v4580_v36  ;;  %v4633_v40 = vpop.f32.mrb[17].mxu1  ;;  %v4583_v41 = vpop.f32.mrb[18].mxu0 }
 0x119   :  { %v4634_v42 = vadd.f32 %v4633_v40, %v4632_v37  ;;  %v4635_v43 = vpop.f32.mrb[18].mxu1  ;;  %v4584_v44 = vpop.f32.mrb[19].mxu0 }
 0x11a   :  { %v890_v45 = vadd.f32 %v4582_v39, %v6562_v33  ;;  %v4585_v47 = vadd.f32 %v4584_v44, %v4583_v41  ;;  %v4636_v49 = vpop.f32.mrb[19].mxu1 }
 0x11b   :  { %v4637_v50 = vadd.f32 %v4636_v49, %v4635_v43 }
 0x11c   :  { %v6589_v51 = vadd.f32 %v4634_v42, %v890_v45  ;;  %v893_v52 = vadd.f32 %v4585_v47, %v6562_v33 }
 0x11e   :  { %v6592_v53 = vadd.f32 %v4637_v50, %v893_v52  ;;  %v4586_v54 = vpop.f32.mrb[20].mxu0 }
 0x11f   :  { %v4638_v55 = vpop.f32.mrb[20].mxu1  ;;  %v4587_v56 = vpop.f32.mrb[21].mxu0 }
 0x120   :  { %v4588_v57 = vadd.f32 %v4587_v56, %v4586_v54  ;;  %v4639_v58 = vpop.f32.mrb[21].mxu1  ;;  %v4589_v59 = vpop.f32.mrb[22].mxu0 }
 0x121   :  { %v4640_v60 = vadd.f32 %v4639_v58, %v4638_v55  ;;  %v4641_v61 = vpop.f32.mrb[22].mxu1  ;;  %v4590_v63 = vpop.f32.mrb[23].mxu0 }
 0x122   :  { %v898_v1 = vadd.f32 %v4588_v57, %v6562_v33  ;;  %v4642_v2 = vpop.f32.mrb[23].mxu1 }
 0x124   :  { %v6595_v3 = vadd.f32 %v4640_v60, %v898_v1 }
 0x126   :  { %v4660_v4 = vpop.f32.mrb[24].mxu0 }
 0x127   :  { %v4712_v5 = vpop.f32.mrb[24].mxu1  ;;  %v4661_v6 = vpop.f32.mrb[25].mxu0 }
 0x128   :  { %v4662_v7 = vadd.f32 %v4661_v6, %v4660_v4  ;;  %v4713_v8 = vpop.f32.mrb[25].mxu1  ;;  %v4663_v9 = vpop.f32.mrb[26].mxu0 }
 0x129   :  { %v4714_v10 = vadd.f32 %v4713_v8, %v4712_v5  ;;  %v4715_v11 = vpop.f32.mrb[26].mxu1  ;;  %v4664_v12 = vpop.f32.mrb[27].mxu0 }
 0x12a   :  { %v1018_v13 = vadd.f32 %v4662_v7, %v6565_v46  ;;  %v4665_v15 = vadd.f32 %v4664_v12, %v4663_v9  ;;  %v4716_v17 = vpop.f32.mrb[27].mxu1 }
 0x12b   :  { %v4717_v18 = vadd.f32 %v4716_v17, %v4715_v11 }
 0x12c   :  { %v1021_v19 = vadd.f32 %v4665_v15, %v6568_v48  ;;  %v6599_v33 = vadd.f32 %v4714_v10, %v1018_v13 }
 0x12e   :  { %v6601_v20 = vadd.f32 %v4717_v18, %v1021_v19  ;;  %v4666_v21 = vpop.f32.mrb[28].mxu0  ;;  %v1143_v22 = vmax.f32 %v6599_v33, 0.0 }
 0x12f   :  { %v4718_v23 = vpop.f32.mrb[28].mxu1  ;;  %v4667_v24 = vpop.f32.mrb[29].mxu0 }
 0x130   :  { %v4668_v25 = vadd.f32 %v4667_v24, %v4666_v21  ;;  %v4719_v26 = vpop.f32.mrb[29].mxu1  ;;  %v4669_v27 = vpop.f32.mrb[30].mxu0  ;;  %v1155_v46 = vsel %vm1154_vm0, %v1143_v22, 0.0  ;;  %v1144_v28 = vmax.f32 %v6601_v20, 0.0 }
 0x131   :  { %v4720_v48 = vadd.f32 %v4719_v26, %v4718_v23  ;;  %v4721_v30 = vpop.f32.mrb[30].mxu1  ;;  %v4670_v34 = vpop.f32.mrb[31].mxu0  ;;  %1156 = vadd.xlane.f32.xlu0 %v1155_v46 }
 0x132   :  { %v1026_v36 = vadd.f32 %v4668_v25, %v6571_v62  ;;  %v4671_v37 = vadd.f32 %v4670_v34, %v4669_v27  ;;  %v4722_v38 = vpop.f32.mrb[31].mxu1  ;;  %v1158_v41 = vsel %vm1154_vm0, %v1144_v28, 0.0 }
 0x133   :  { %v4723_v39 = vadd.f32 %v4722_v38, %v4721_v30 }
 0x134   :  { %v1029_v40 = vadd.f32 %v4671_v37, %v6574_v0  ;;  %v6613_v42 = vadd.f32 %v4720_v48, %v1026_v36 }
 0x135   :  { %1159 = vadd.xlane.f32.xlu0 %v1158_v41 }
 0x136   :  { %v6615_v43 = vadd.f32 %v4723_v39, %v1029_v40  ;;  %v4672_v44 = vpop.f32.mrb[32].mxu0  ;;  %v1145_v45 = vmax.f32 %v6613_v42, 0.0 }
 0x137   :  { %v4724_v47 = vpop.f32.mrb[32].mxu1  ;;  %v4673_v49 = vpop.f32.mrb[33].mxu0 }
 0x138   :  { %v4674_v62 = vadd.f32 %v4673_v49, %v4672_v44  ;;  %v4725_v50 = vpop.f32.mrb[33].mxu1  ;;  %v4675_v52 = vpop.f32.mrb[34].mxu0  ;;  %v1161_v0 = vsel %vm1154_vm0, %v1145_v45, 0.0  ;;  %v1146_v54 = vmax.f32 %v6615_v43, 0.0 }
 0x139   :  { %v4726_v55 = vadd.f32 %v4725_v50, %v4724_v47  ;;  %v4727_v56 = vpop.f32.mrb[34].mxu1  ;;  %v4676_v57 = vpop.f32.mrb[35].mxu0  ;;  %1162 = vadd.xlane.f32.xlu1 %v1161_v0 }
 0x13a   :  { %v1034_v58 = vadd.f32 %v4674_v62, %v6577_v14  ;;  %v4677_v59 = vadd.f32 %v4676_v57, %v4675_v52  ;;  %v4728_v60 = vpop.f32.mrb[35].mxu1  ;;  %v1164_v2 = vsel %vm1154_vm0, %v1146_v54, 0.0 }
 0x13b   :  { %v4729_v61 = vadd.f32 %v4728_v60, %v4727_v56 }
 0x13c   :  { %v6623_v63 = vadd.f32 %v4726_v55, %v1034_v58  ;;  %v1037_v1 = vadd.f32 %v4677_v59, %v6580_v16 }
 0x13d   :  { %1165 = vadd.xlane.f32.xlu1 %v1164_v2 }
 0x13e   :  { %v6629_v4 = vadd.f32 %v4729_v61, %v1037_v1  ;;  %v4678_v5 = vpop.f32.mrb[36].mxu0  ;;  %v1147_v6 = vmax.f32 %v6623_v63, 0.0 }
 0x13f   :  { %v4730_v7 = vpop.f32.mrb[36].mxu1  ;;  %v4679_v8 = vpop.f32.mrb[37].mxu0 }
 0x140   :  { %v4680_v14 = vadd.f32 %v4679_v8, %v4678_v5  ;;  %v4731_v9 = vpop.f32.mrb[37].mxu1  ;;  %v4681_v10 = vpop.f32.mrb[38].mxu0  ;;  %v1167_v11 = vsel %vm1154_vm0, %v1147_v6, 0.0  ;;  %v1148_v16 = vmax.f32 %v6629_v4, 0.0 }
 0x141   :  { %v4732_v12 = vadd.f32 %v4731_v9, %v4730_v7  ;;  %v4733_v13 = vpop.f32.mrb[38].mxu1  ;;  %v4682_v15 = vpop.f32.mrb[39].mxu0  ;;  %1168 = vadd.xlane.f32.xlu0 %v1167_v11 }
 0x142   :  { %v1042_v17 = vadd.f32 %v4680_v14, %v6583_v32  ;;  %v4683_v18 = vadd.f32 %v4682_v15, %v4681_v10  ;;  %v4734_v19 = vpop.f32.mrb[39].mxu1  ;;  %v1170_v21 = vsel %vm1154_vm0, %v1148_v16, 0.0 }
 0x143   :  { %v4735_v23 = vadd.f32 %v4734_v19, %v4733_v13  ;;  %1171 = vadd.xlane.f32.xlu1 %v1170_v21  ;;  %v8538_v13 = vmov 0.0|0.0  }
 0x144   :  { %v6640_v24 = vadd.f32 %v4732_v12, %v1042_v17  ;;  %v1045_v25 = vadd.f32 %v4683_v18, %v6586_v35  ;;  %v1503_v12 = vld [vmem:[%s8532_s4 + $0x8] sm:$0xff]  ;;  %5519 = vmatprep.subr.bf16.mxu1 %v8538_v13  ;;  %5513 = vmatprep.subr.bf16.mxu0 %v8538_v13 }
 0x146   :  { %v6643_v26 = vadd.f32 %v4735_v23, %v1045_v25  ;;  %v4684_v27 = vpop.f32.mrb[40].mxu0  ;;  %v1149_v46 = vmax.f32 %v6640_v24, 0.0 }
 0x147   :  { %v4736_v48 = vpop.f32.mrb[40].mxu1  ;;  %v4685_v30 = vpop.f32.mrb[41].mxu0 }
 0x148   :  { %v4686_v32 = vadd.f32 %v4685_v30, %v4684_v27  ;;  %v4737_v34 = vpop.f32.mrb[41].mxu1  ;;  %v4687_v36 = vpop.f32.mrb[42].mxu0  ;;  %v1173_v37 = vsel %vm1154_vm0, %v1149_v46, 0.0  ;;  %v1150_v38 = vmax.f32 %v6643_v26, 0.0 }
 0x149   :  { %v4738_v39 = vadd.f32 %v4737_v34, %v4736_v48  ;;  %v4739_v40 = vpop.f32.mrb[42].mxu1  ;;  %v4688_v41 = vpop.f32.mrb[43].mxu0  ;;  %1174 = vadd.xlane.f32.xlu0 %v1173_v37 }
 0x14a   :  { %v1050_v35 = vadd.f32 %v4686_v32, %v6589_v51  ;;  %v4689_v44 = vadd.f32 %v4688_v41, %v4687_v36  ;;  %v4740_v47 = vpop.f32.mrb[43].mxu1  ;;  %v1176_v49 = vsel %vm1154_vm0, %v1150_v38, 0.0 }
 0x14b   :  { %v4741_v62 = vadd.f32 %v4740_v47, %v4739_v40  ;;  %1177 = vadd.xlane.f32.xlu1 %v1176_v49 }
 0x14c   :  { %v6654_v50 = vadd.f32 %v4738_v39, %v1050_v35  ;;  %v1053_v52 = vadd.f32 %v4689_v44, %v6592_v53 }
 0x14e   :  { %v6657_v0 = vadd.f32 %v4741_v62, %v1053_v52  ;;  %v4690_v55 = vpop.f32.mrb[44].mxu0  ;;  %v1151_v56 = vmax.f32 %v6654_v50, 0.0 }
 0x14f   :  { %v4691_v57 = vpop.f32.mrb[45].mxu0  ;;  %v4742_v58 = vpop.f32.mrb[44].mxu1 }
 0x150   :  { %v4692_v51 = vadd.f32 %v4691_v57, %v4690_v55  ;;  %v4743_v59 = vpop.f32.mrb[45].mxu1  ;;  %v1179_v60 = vsel %vm1154_vm0, %v1151_v56, 0.0  ;;  %v4693_v61 = vpop.f32.mrb[46].mxu0  ;;  %v1152_v1 = vmax.f32 %v6657_v0, 0.0 }
 0x151   :  { %v4744_v2 = vadd.f32 %v4743_v59, %v4742_v58  ;;  %1180 = vadd.xlane.f32.xlu0 %v1179_v60  ;;  %v4694_v5 = vpop.f32.mrb[47].mxu0  ;;  %v4745_v53 = vpop.f32.mrb[46].mxu1 }
 0x152   :  { %v1058_v7 = vadd.f32 %v4692_v51, %v6595_v3  ;;  %v1182_v8 = vsel %vm1154_vm0, %v1152_v1, 0.0  ;;  %v4746_v14 = vpop.f32.mrb[47].mxu1  ;;  %v1502_v3 = vld [vmem:[%s8532_s4] sm:$0xff]  ;;  %v1504_v53 = vld [vmem:[%s8532_s4 + $0x10] sm:$0xff] }
 0x153   :  { %1183 = vadd.xlane.f32.xlu1 %v1182_v8  ;;  %v5520_v15 = vpack.c.bf16 %v1503_v12, %v1502_v3  ;;  %v8540_v3 = vmov 0.0  }
 0x154   :  { %v6668_v9 = vadd.f32 %v4744_v2, %v1058_v7  ;;  %v1505_v7 = vld [vmem:[%s8532_s4 + $0x18] sm:$0xff]  ;;  %5015 = vmatprep.mubr.msk.f32.mxu1 %vm6166_vm2, %v8540_v3  ;;  %4974 = vmatprep.mubr.msk.f32.mxu0 %vm6166_vm2, %v8540_v3  ;;  %s6175_s4 = smov 8  }
 0x155   :  { %5521 = vmatpush3.bf16.msra.mxu1 %v5520_v15  ;;  %v5523_v8 = vpack.c.bf16 %v1505_v7, %v1504_v53 }
 0x156   :  { %v1153_v10 = vmax.f32 %v6668_v9, 0.0  ;;  %5522 = vmatprep.subr.bf16.mxu1 %v8538_v13  ;;  %v1341_v9 = vld [vmem:[%s8531_s3] sm:$0xff] }
 0x158   :  { %v1186_v11 = vsel %vm1185_vm1, %v1153_v10, 0.0 }
 0x159   :  { %1187 = vadd.xlane.f32.xlu0 %v1186_v11  ;;  %5524 = vmatpush3.bf16.msra.mxu1 %v5523_v8 }
 0x15a   :  { %5545 = vmatprep.subr.bf16.mxu1 %v8538_v13 }
 0x1be   :  { %v1157_v17 = vpop.xlane.xlu0 %1156 }
 0x1bf   :  { %v1190_v18 = vmul.f32 0.03125, %v1157_v17 }
 0x1c1   :  { %v6685_v19 = vsub.f32 %v1143_v22, %v1190_v18  ;;  %v1343_v18 = vld [vmem:[%s8531_s3 + $0x10] sm:$0xff] }
 0x1c2   :  { %v1160_v21 = vpop.xlane.xlu0 %1159 }
 0x1c3   :  { %v1191_v23 = vmul.f32 0.03125, %v1160_v21  ;;  %v1212_v25 = vmul.f32 %v6685_v19, %v6685_v19  ;;  %v1344_v21 = vld [vmem:[%s8531_s3 + $0x18] sm:$0xff] }
 0x1c5   :  { %v6691_v27 = vsub.f32 %v1144_v28, %v1191_v23  ;;  %v1223_v48 = vsel %vm1154_vm0, %v1212_v25, 0.0  ;;  %v5517_v23 = vpack.c.bf16 %v1344_v21, %v1343_v18  ;;  %v1330_v25 = vld [vmem:[%s8529_s1] sm:$0xff] }
 0x1c6   :  { %v1163_v30 = vpop.xlane.xlu1 %1162  ;;  %1224 = vadd.xlane.f32.xlu1 %v1223_v48  ;;  %v1331_v48 = vld [vmem:[%s8529_s1 + $0x8] sm:$0xff] }
 0x1c7   :  { %v1192_v32 = vmul.f32 0.03125, %v1163_v30  ;;  %v1213_v34 = vmul.f32 %v6691_v27, %v6691_v27  ;;  %v1332_v30 = vld [vmem:[%s8529_s1 + $0x10] sm:$0xff] }
 0x1c9   :  { %v6698_v33 = vsub.f32 %v1145_v45, %v1192_v32  ;;  %v1226_v22 = vsel %vm1154_vm0, %v1213_v34, 0.0  ;;  %v1333_v32 = vld [vmem:[%s8529_s1 + $0x18] sm:$0xff]  ;;  %v1334_v34 = vld [vmem:[%s8529_s1 + $0x20] sm:$0xff] }
 0x1ca   :  { %v1166_v36 = vpop.xlane.xlu1 %1165  ;;  %1227 = vadd.xlane.f32.xlu0 %v1226_v22  ;;  %v1335_v22 = vld [vmem:[%s8529_s1 + $0x28] sm:$0xff] }
 0x1cb   :  { %v1193_v37 = vmul.f32 0.03125, %v1166_v36  ;;  %v1214_v20 = vmul.f32 %v6698_v33, %v6698_v33  ;;  %v1336_v36 = vld [vmem:[%s8529_s1 + $0x30] sm:$0xff] }
 0x1cd   :  { %v6705_v28 = vsub.f32 %v1146_v54, %v1193_v37  ;;  %v1229_v39 = vsel %vm1154_vm0, %v1214_v20, 0.0  ;;  %v1337_v37 = vld [vmem:[%s8529_s1 + $0x38] sm:$0xff]  ;;  %v1338_v20 = vld [vmem:[%s8529_s1 + $0x40] sm:$0xff] }
 0x1ce   :  { %1230 = vadd.xlane.f32.xlu1 %v1229_v39  ;;  %v1169_v40 = vpop.xlane.xlu0 %1168  ;;  %v1339_v39 = vld [vmem:[%s8529_s1 + $0x48] sm:$0xff] }
 0x1cf   :  { %v1194_v41 = vmul.f32 0.03125, %v1169_v40  ;;  %v1215_v42 = vmul.f32 %v6705_v28, %v6705_v28  ;;  %v1340_v40 = vld [vmem:[%s8529_s1 + $0x50] sm:$0x3]  ;;  %s6168_s1 = smov 120  }
 0x1d0   :  { %v1172_v45 = vpop.xlane.xlu1 %1171 }
 0x1d1   :  { %v6712_v35 = vsub.f32 %v1147_v6, %v1194_v41  ;;  %v1195_v44 = vmul.f32 0.03125, %v1172_v45  ;;  %v1232_v47 = vsel %vm1154_vm0, %v1215_v42, 0.0 }
 0x1d2   :  { %1233 = vadd.xlane.f32.xlu0 %v1232_v47 }
 0x1d3   :  { %v6717_v43 = vsub.f32 %v1148_v16, %v1195_v44  ;;  %v1216_v54 = vmul.f32 %v6712_v35, %v6712_v35 }
 0x1d5   :  { %v1235_v49 = vsel %vm1154_vm0, %v1216_v54, 0.0  ;;  %v1217_v62 = vmul.f32 %v6717_v43, %v6717_v43 }
 0x1d6   :  { %1236 = vadd.xlane.f32.xlu1 %v1235_v49  ;;  %v1175_v63 = vpop.xlane.xlu0 %1174 }
 0x1d7   :  { %v1196_v6 = vmul.f32 0.03125, %v1175_v63  ;;  %v1238_v52 = vsel %vm1154_vm0, %v1217_v62, 0.0  ;;  %v1302_v63 = vsub.s32 1, %v6553_v29 }
 0x1d8   :  { %v1178_v55 = vpop.xlane.xlu1 %1177  ;;  %1239 = vadd.xlane.f32.xlu0 %v1238_v52 }
 0x1d9   :  { %v6727_v4 = vsub.f32 %v1149_v46, %v1196_v6  ;;  %v1197_v16 = vmul.f32 0.03125, %v1178_v55  ;;  %v1317_v55 = vsub.s32 2, %v6553_v29 }
 0x1db   :  { %v6731_v57 = vsub.f32 %v1150_v38, %v1197_v16  ;;  %v1218_v58 = vmul.f32 %v6727_v4, %v6727_v4 }
 0x1dd   :  { %v1241_v51 = vsel %vm1154_vm0, %v1218_v58, 0.0  ;;  %v1219_v59 = vmul.f32 %v6731_v57, %v6731_v57  ;;  %v6854_v58 = vrot.slane %v6559_v31, %v1302_v63 }
 0x1de   :  { %1242 = vadd.xlane.f32.xlu1 %v1241_v51  ;;  %v1181_v60 = vpop.xlane.xlu0 %1180 }
 0x1df   :  { %v1198_v61 = vmul.f32 0.03125, %v1181_v60  ;;  %v1244_v24 = vsel %vm1154_vm0, %v1219_v59, 0.0 }
 0x1e0   :  { %v1184_v46 = vpop.xlane.xlu1 %1183  ;;  %1245 = vadd.xlane.f32.xlu0 %v1244_v24  ;;  %v6858_v24 = vrot.slane %v6559_v31, %v1317_v55 }
 0x1e1   :  { %v6741_v26 = vsub.f32 %v1151_v56, %v1198_v61  ;;  %v1199_v38 = vmul.f32 0.03125, %v1184_v46 }
 0x1e3   :  { %v6745_v2 = vsub.f32 %v1152_v1, %v1199_v38  ;;  %v1220_v5 = vmul.f32 %v6741_v26, %v6741_v26 }
 0x1e5   :  { %v1247_v50 = vsel %vm1154_vm0, %v1220_v5, 0.0  ;;  %v1221_v56 = vmul.f32 %v6745_v2, %v6745_v2 }
 0x1e6   :  { %1248 = vadd.xlane.f32.xlu1 %v1247_v50  ;;  %v1188_v0 = vpop.xlane.xlu0 %1187 }
 0x1e7   :  { %v1200_v1 = vmul.f32 0.03125, %v1188_v0  ;;  %v1250_v14 = vsel %vm1154_vm0, %v1221_v56, 0.0 }
 0x1e8   :  { %1251 = vadd.xlane.f32.xlu0 %v1250_v14 }
 0x1e9   :  { %v6762_v11 = vsub.f32 %v1153_v10, %v1200_v1  ;;  %v1342_v10 = vld [vmem:[%s8531_s3 + $0x8] sm:$0xff]  ;;  %s6174_s3 = smov 72  }
 0x1ea   :  { %v5514_v17 = vpack.c.bf16 %v1342_v10, %v1341_v9 }
 0x1eb   :  { %v1222_v12 = vmul.f32 %v6762_v11, %v6762_v11 }
 0x1ec   :  { %5515 = vmatpush3.bf16.msra.mxu0 %v5514_v17 }
 0x1ed   :  { %v1253_v15 = vsel %vm1185_vm1, %v1222_v12, 0.0  ;;  %5516 = vmatprep.subr.bf16.mxu0 %v8538_v13 }
 0x1ee   :  { %1254 = vadd.xlane.f32.xlu1 %v1253_v15 }
 0x1f0   :  { %5518 = vmatpush3.bf16.msra.mxu0 %v5517_v23 }
 0x1f1   :  { %5525 = vmatprep.subr.bf16.mxu0 %v8538_v13 }
 0x1f3   :  { %4975 = vmatmul.mubr.msk.f32.vlgmr.msra.gmra.mrb[48].mxu0 %vm1154_vm0, %v1330_v25 }
 0x1f4   :  { %4977 = vmatprep.mubr.msk.f32.mxu0 %vm6166_vm2, %v8540_v3 }
 0x1f7   :  { %4978 = vmatmul.mubr.msk.f32.gmra.mrb[50].mxu0 %vm1154_vm0, %v1331_v48 }
 0x1f8   :  { %4980 = vmatprep.mubr.msk.f32.mxu0 %vm6166_vm2, %v8540_v3 }
 0x1fb   :  { %4981 = vmatmul.mubr.msk.f32.gmra.mrb[52].mxu0 %vm1154_vm0, %v1332_v30 }
 0x1fc   :  { %4983 = vmatprep.mubr.msk.f32.mxu0 %vm6166_vm2, %v8540_v3 }
 0x1ff   :  { %4984 = vmatmul.mubr.msk.f32.gmra.mrb[54].mxu0 %vm1154_vm0, %v1333_v32 }
 0x200   :  { %4986 = vmatprep.mubr.msk.f32.mxu0 %vm6166_vm2, %v8540_v3 }
 0x203   :  { %4987 = vmatmul.mubr.msk.f32.gmra.mrb[56].mxu0 %vm1154_vm0, %v1334_v34 }
 0x204   :  { %4989 = vmatprep.mubr.msk.f32.mxu0 %vm6166_vm2, %v8540_v3 }
 0x207   :  { %4990 = vmatmul.mubr.msk.f32.gmra.mrb[58].mxu0 %vm1154_vm0, %v1335_v22 }
 0x208   :  { %4992 = vmatprep.mubr.msk.f32.mxu0 %vm6166_vm2, %v8540_v3 }
 0x20b   :  { %4993 = vmatmul.mubr.msk.f32.gmra.mrb[60].mxu0 %vm1154_vm0, %v1336_v36 }
 0x20c   :  { %4995 = vmatprep.mubr.msk.f32.mxu0 %vm6166_vm2, %v8540_v3 }
 0x20f   :  { %4996 = vmatmul.mubr.msk.f32.gmra.mrb[62].mxu0 %vm1154_vm0, %v1337_v37 }
 0x210   :  { %4998 = vmatprep.mubr.msk.f32.mxu0 %vm6166_vm2, %v8540_v3 }
 0x213   :  { %4999 = vmatmul.mubr.msk.f32.gmra.mrb[64].mxu0 %vm1154_vm0, %v1338_v20 }
 0x214   :  { %5001 = vmatprep.mubr.msk.f32.mxu0 %vm6166_vm2, %v8540_v3 }
 0x217   :  { %5002 = vmatmul.mubr.msk.f32.gmra.mrb[66].mxu0 %vm1154_vm0, %v1339_v39 }
 0x218   :  { %5004 = vmatprep.mubr.msk.f32.mxu0 %vm6166_vm2, %v8540_v3 }
 0x21b   :  { %5005 = vmatmul.mubr.msk.f32.gmra.mrb[68].mxu0 %vm1154_vm0, %v1340_v40 }
 0x21c   :  { %5070 = vmatprep.mubr.msk.f32.mxu0 %vm6166_vm2, %v8540_v3 }
 0x253   :  { %v1225_v41 = vpop.xlane.xlu1 %1224 }
 0x254   :  { %v1256_v42 = vmul.f32 0.03125, %v1225_v41 }
 0x256   :  { %v1267_v45 = vadd.f32 1e-05, %v1256_v42 }
 0x257   :  { %v1228_v44 = vpop.xlane.xlu0 %1227 }
 0x258   :  { %5941 = vrsqrt.f32 %v1267_v45  ;;  %v1257_v47 = vmul.f32 0.03125, %v1228_v44 }
 0x25a   :  { %v1268_v54 = vadd.f32 1e-05, %v1257_v47 }
 0x25b   :  { %v1231_v49 = vpop.xlane.xlu1 %1230 }
 0x25c   :  { %5943 = vrsqrt.f32 %v1268_v54  ;;  %v1258_v62 = vmul.f32 0.03125, %v1231_v49 }
 0x25e   :  { %v1269_v6 = vadd.f32 1e-05, %v1258_v62 }
 0x25f   :  { %v1234_v52 = vpop.xlane.xlu0 %1233 }
 0x260   :  { %5945 = vrsqrt.f32 %v1269_v6  ;;  %v1259_v16 = vmul.f32 0.03125, %v1234_v52 }
 0x262   :  { %v5942_v51 = vpop.eup %5941  ;;  %v1270_v59 = vadd.f32 1e-05, %v1259_v16 }
 0x263   :  { %v1289_v60 = vmul.f32 %v5942_v51, %v6685_v19  ;;  %v1237_v61 = vpop.xlane.xlu1 %1236 }
 0x264   :  { %5947 = vrsqrt.f32 %v1270_v59  ;;  %v1260_v46 = vmul.f32 0.03125, %v1237_v61 }
 0x265   :  { %v1304_v38 = vmul.f32 %v6854_v58, %v1289_v60  ;;  %v1240_v5 = vpop.xlane.xlu0 %1239 }
 0x266   :  { %v5944_v53 = vpop.eup %5943  ;;  %v1271_v7 = vadd.f32 1e-05, %v1260_v46  ;;  %v1261_v50 = vmul.f32 0.03125, %v1240_v5 }
 0x267   :  { %v6862_v56 = vadd.f32 %v6858_v24, %v1304_v38  ;;  %v1290_v8 = vmul.f32 %v5944_v53, %v6691_v27 }
 0x268   :  { %5949 = vrsqrt.f32 %v1271_v7  ;;  %v1272_v0 = vadd.f32 1e-05, %v1261_v50 }
 0x269   :  { %8568 = vst [vmem:[#allocation6_spill] sm:$0xff] %v6862_v56  ;;  %5016 = vmatmul.mubr.msk.f32.vlgmr.msra.gmra.mrb[48].mxu1 %vm1154_vm0, %v6862_v56  ;;  %v1305_v19 = vmul.f32 %v6854_v58, %v1290_v8 }
 0x26a   :  { %v5946_v1 = vpop.eup %5945  ;;  %5951 = vrsqrt.f32 %v1272_v0  ;;  %5018 = vmatprep.mubr.msk.f32.mxu1 %vm6166_vm2, %v8540_v3 }
 0x26b   :  { %v1243_v14 = vpop.xlane.xlu1 %1242  ;;  %v6871_v12 = vadd.f32 %v6858_v24, %v1305_v19  ;;  %v1291_v15 = vmul.f32 %v5946_v1, %v6698_v33 }
 0x26c   :  { %v1262_v9 = vmul.f32 0.03125, %v1243_v14 }
 0x26d   :  { %8569 = vst [vmem:[#allocation7_spill] sm:$0xff] %v6871_v12  ;;  %5019 = vmatmul.mubr.msk.f32.gmra.mrb[50].mxu1 %vm1154_vm0, %v6871_v12  ;;  %v1246_v27 = vpop.xlane.xlu0 %1245  ;;  %v1306_v10 = vmul.f32 %v6854_v58, %v1291_v15 }
 0x26e   :  { %v5948_v17 = vpop.eup %5947  ;;  %v1273_v18 = vadd.f32 1e-05, %v1262_v9  ;;  %v1263_v21 = vmul.f32 0.03125, %v1246_v27  ;;  %5021 = vmatprep.mubr.msk.f32.mxu1 %vm6166_vm2, %v8540_v3 }
 0x26f   :  { %v6880_v23 = vadd.f32 %v6858_v24, %v1306_v10  ;;  %v1292_v25 = vmul.f32 %v5948_v17, %v6705_v28 }
 0x270   :  { %5953 = vrsqrt.f32 %v1273_v18  ;;  %v1274_v33 = vadd.f32 1e-05, %v1263_v21 }
 0x271   :  { %8570 = vst [vmem:[#allocation8_spill] sm:$0xff] %v6880_v23  ;;  %5022 = vmatmul.mubr.msk.f32.gmra.mrb[52].mxu1 %vm1154_vm0, %v6880_v23  ;;  %v1307_v48 = vmul.f32 %v6854_v58, %v1292_v25 }
 0x272   :  { %v5950_v30 = vpop.eup %5949  ;;  %5955 = vrsqrt.f32 %v1274_v33  ;;  %5024 = vmatprep.mubr.msk.f32.mxu1 %vm6166_vm2, %v8540_v3 }
 0x273   :  { %v1249_v32 = vpop.xlane.xlu1 %1248  ;;  %v6889_v34 = vadd.f32 %v6858_v24, %v1307_v48  ;;  %v1293_v22 = vmul.f32 %v5950_v30, %v6712_v35 }
 0x274   :  { %v5952_v36 = vpop.eup %5951  ;;  %v1264_v28 = vmul.f32 0.03125, %v1249_v32 }
 0x275   :  { %8571 = vst [vmem:[#allocation9_spill] sm:$0xff] %v6889_v34  ;;  %5025 = vmatmul.mubr.msk.f32.gmra.mrb[54].mxu1 %vm1154_vm0, %v6889_v34  ;;  %v1252_v37 = vpop.xlane.xlu0 %1251  ;;  %v1308_v20 = vmul.f32 %v6854_v58, %v1293_v22  ;;  %v1294_v39 = vmul.f32 %v5952_v36, %v6717_v43  ;;  %v1508_v36 = vsub.s32 4, %v6553_v29 }
 0x276   :  { %v1275_v40 = vadd.f32 1e-05, %v1264_v28  ;;  %v1265_v41 = vmul.f32 0.03125, %v1252_v37  ;;  %5027 = vmatprep.mubr.msk.f32.mxu1 %vm6166_vm2, %v8540_v3 }
 0x277   :  { %v6899_v42 = vadd.f32 %v6858_v24, %v1308_v20  ;;  %v1309_v35 = vmul.f32 %v6854_v58, %v1294_v39  ;;  %v1509_v37 = vrot.slane %v6559_v31, %v1508_v36 }
 0x278   :  { %5957 = vrsqrt.f32 %v1275_v40  ;;  %v1276_v45 = vadd.f32 1e-05, %v1265_v41 }
 0x279   :  { %8572 = vst [vmem:[#allocation10_spill] sm:$0xff] %v6899_v42  ;;  %5028 = vmatmul.mubr.msk.f32.gmra.mrb[56].mxu1 %vm1154_vm0, %v6899_v42  ;;  %v6907_v47 = vadd.f32 %v6858_v24, %v1309_v35 }
 0x27a   :  { %v5954_v44 = vpop.eup %5953  ;;  %5959 = vrsqrt.f32 %v1276_v45  ;;  %5030 = vmatprep.mubr.msk.f32.mxu1 %vm6166_vm2, %v8540_v3 }
 0x27b   :  { %v1255_v43 = vpop.xlane.xlu1 %1254  ;;  %8573 = vst [vmem:[#allocation11_spill] sm:$0xff] %v6907_v47  ;;  %v1295_v54 = vmul.f32 %v5954_v44, %v6727_v4 }
 0x27c   :  { %v5956_v49 = vpop.eup %5955  ;;  %v1266_v62 = vmul.f32 0.03125, %v1255_v43 }
 0x27d   :  { %5031 = vmatmul.mubr.msk.f32.gmra.mrb[58].mxu1 %vm1154_vm0, %v6907_v47  ;;  %v1310_v63 = vmul.f32 %v6854_v58, %v1295_v54  ;;  %v1296_v6 = vmul.f32 %v5956_v49, %v6731_v57 }
 0x27e   :  { %v1277_v52 = vadd.f32 1e-05, %v1266_v62  ;;  %5033 = vmatprep.mubr.msk.f32.mxu1 %vm6166_vm2, %v8540_v3 }
 0x27f   :  { %v6917_v55 = vadd.f32 %v6858_v24, %v1310_v63  ;;  %v1311_v16 = vmul.f32 %v6854_v58, %v1296_v6 }
 0x280   :  { %5961 = vrsqrt.f32 %v1277_v52 }
 0x281   :  { %8574 = vst [vmem:[#allocation12_spill] sm:$0xff] %v6917_v55  ;;  %5034 = vmatmul.mubr.msk.f32.gmra.mrb[60].mxu1 %vm1154_vm0, %v6917_v55  ;;  %v6925_v51 = vadd.f32 %v6858_v24, %v1311_v16 }
 0x282   :  { %v5958_v4 = vpop.eup %5957  ;;  %5036 = vmatprep.mubr.msk.f32.mxu1 %vm6166_vm2, %v8540_v3 }
 0x283   :  { %8575 = vst [vmem:[#allocation13_spill] sm:$0xff] %v6925_v51  ;;  %v1297_v57 = vmul.f32 %v5958_v4, %v6741_v26 }
 0x284   :  { %v5960_v59 = vpop.eup %5959 }
 0x285   :  { %5037 = vmatmul.mubr.msk.f32.gmra.mrb[62].mxu1 %vm1154_vm0, %v6925_v51  ;;  %v1312_v60 = vmul.f32 %v6854_v58, %v1297_v57  ;;  %v1298_v61 = vmul.f32 %v5960_v59, %v6745_v2 }
 0x286   :  { %5039 = vmatprep.mubr.msk.f32.mxu1 %vm6166_vm2, %v8540_v3 }
 0x287   :  { %v6935_v46 = vadd.f32 %v6858_v24, %v1312_v60  ;;  %v1313_v38 = vmul.f32 %v6854_v58, %v1298_v61 }
 0x289   :  { %8576 = vst [vmem:[#allocation14_spill] sm:$0xff] %v6935_v46  ;;  %5040 = vmatmul.mubr.msk.f32.gmra.mrb[64].mxu1 %vm1154_vm0, %v6935_v46  ;;  %v6943_v5 = vadd.f32 %v6858_v24, %v1313_v38 }
 0x28a   :  { %v5962_v26 = vpop.eup %5961  ;;  %5042 = vmatprep.mubr.msk.f32.mxu1 %vm6166_vm2, %v8540_v3 }
 0x28b   :  { %8577 = vst [vmem:[#allocation15_spill] sm:$0xff] %v6943_v5  ;;  %v1299_v2 = vmul.f32 %v5962_v26, %v6762_v11 }
 0x28d   :  { %5043 = vmatmul.mubr.msk.f32.gmra.mrb[66].mxu1 %vm1154_vm0, %v6943_v5  ;;  %v1314_v53 = vmul.f32 %v6854_v58, %v1299_v2 }
 0x28e   :  { %5045 = vmatprep.mubr.msk.f32.mxu1 %vm6166_vm2, %v8540_v3 }
 0x28f   :  { %v6952_v7 = vadd.f32 %v6858_v24, %v1314_v53 }
 0x291   :  { %8578 = vst [vmem:[#allocation16_spill] sm:$0xff] %v6952_v7  ;;  %5046 = vmatmul.mubr.msk.f32.gmra.mrb[68].mxu1 %vm1154_vm0, %v6952_v7 }
 0x292   :  { %5125 = vmatprep.mubr.msk.f32.mxu1 %vm6166_vm2, %v8540_v3 }
 0x2c6   :  { %v6958_v50 = vpop.f32.mrb[48].mxu0 }
 0x2c7   :  { %v4976_v11 = vpop.f32.mrb[49].mxu0 }
 0x2ca   :  { %v6960_v8 = vpop.f32.mrb[50].mxu0 }
 0x2cb   :  { %v4979_v0 = vpop.f32.mrb[51].mxu0 }
 0x2ce   :  { %v6962_v19 = vpop.f32.mrb[52].mxu0 }
 0x2cf   :  { %v4982_v58 = vpop.f32.mrb[53].mxu0 }
 0x2d2   :  { %v6964_v1 = vpop.f32.mrb[54].mxu0 }
 0x2d3   :  { %v4985_v14 = vpop.f32.mrb[55].mxu0 }
 0x2d6   :  { %v6966_v24 = vpop.f32.mrb[56].mxu0 }
 0x2d7   :  { %v4988_v15 = vpop.f32.mrb[57].mxu0 }
 0x2da   :  { %v6968_v9 = vpop.f32.mrb[58].mxu0 }
 0x2db   :  { %v4991_v27 = vpop.f32.mrb[59].mxu0 }
 0x2de   :  { %v6970_v10 = vpop.f32.mrb[60].mxu0 }
 0x2df   :  { %v4994_v17 = vpop.f32.mrb[61].mxu0 }
 0x2e2   :  { %v6972_v18 = vpop.f32.mrb[62].mxu0 }
 0x2e3   :  { %v4997_v21 = vpop.f32.mrb[63].mxu0 }
 0x2e6   :  { %v6974_v25 = vpop.f32.mrb[64].mxu0 }
 0x2e7   :  { %v5000_v33 = vpop.f32.mrb[65].mxu0 }
 0x2ea   :  { %v6976_v48 = vpop.f32.mrb[66].mxu0 }
 0x2eb   :  { %v5003_v30 = vpop.f32.mrb[67].mxu0 }
 0x2ec   :  { %v1347_v30 = vsub.s32 3, %v6553_v29 }
 0x2ee   :  { %v6978_v32 = vpop.f32.mrb[68].mxu0 }
 0x2ef   :  { %v5006_v22 = vpop.f32.mrb[69].mxu0 }
 0x33c   :  { %v1609_v28 = vpop.f32.mrb[48].mxu1 }
 0x33d   :  { %v5017_v20 = vpop.f32.mrb[49].mxu1  ;;  %v1610_v40 = vadd.f32 %v1609_v28, %v1509_v37 }
 0x340   :  { %v1614_v39 = vpop.f32.mrb[50].mxu1 }
 0x341   :  { %v1615_v41 = vadd.f32 %v1614_v39, %v1509_v37  ;;  %v5020_v35 = vpop.f32.mrb[51].mxu1  ;;  %v6139_v39 = vld [vmem:[%s8533_s5] sm:$0xff] }
 0x343   :  { %v6988_v44 = vpack.i.bf16 %v1615_v41, %v1610_v40  ;;  %v5526_v43 = vpack.c.bf16 %v1615_v41, %v1610_v40  ;;  %v1348_v40 = vrot.slane %v6139_v39, %v1347_v30 }
 0x344   :  { %v1619_v54 = vpop.f32.mrb[52].mxu1 }
 0x345   :  { %5695 = vrot.lane.b32.xlu0 %v6988_v44, %s6168_s1  ;;  %v5023_v31 = vpop.f32.mrb[53].mxu1  ;;  %5528 = vmatpush3.bf16.xpose.msk.msra.mxu0 %vm6984_vm4, %v5526_v43  ;;  %v1620_v62 = vadd.f32 %v1619_v54, %v1509_v37 }
 0x346   :  { %5529 = vmatprep.subr.bf16.mxu0 %v8538_v13 }
 0x348   :  { %v1624_v49 = vpop.f32.mrb[54].mxu1 }
 0x349   :  { %v1625_v63 = vadd.f32 %v1624_v49, %v1509_v37  ;;  %v5026_v6 = vpop.f32.mrb[55].mxu1  ;;  %v7032_v49 = vadd.f32 %v6958_v50, %v1348_v40  ;;  %v7052_v50 = vadd.f32 %v6964_v1, %v1348_v40  ;;  %v1479_v1 = vadd.f32 %v6970_v10, %v1348_v40 }
 0x34a   :  { %v1494_v10 = vadd.f32 %v6976_v48, %v1348_v40 }
 0x34b   :  { %v6995_v52 = vpack.i.bf16 %v1625_v63, %v1620_v62  ;;  %v5530_v16 = vpack.c.bf16 %v1625_v63, %v1620_v62  ;;  %v7046_v62 = vadd.f32 %v6962_v19, %v1348_v40  ;;  %v1474_v19 = vadd.f32 %v6968_v9, %v1348_v40 }
 0x34c   :  { %v1629_v4 = vpop.f32.mrb[56].mxu1  ;;  %v1489_v9 = vadd.f32 %v6974_v25, %v1348_v40 }
 0x34d   :  { %5700 = vrot.lane.b32.xlu1 %v6995_v52, %s6168_s1  ;;  %v5029_v57 = vpop.f32.mrb[57].mxu1  ;;  %5532 = vmatpush3.bf16.xpose.msk.msra.mxu0 %vm6984_vm4, %v5530_v16  ;;  %v1630_v60 = vadd.f32 %v1629_v4, %v1509_v37 }
 0x34e   :  { %5533 = vmatprep.subr.bf16.mxu0 %v8538_v13 }
 0x350   :  { %v1634_v59 = vpop.f32.mrb[58].mxu1 }
 0x351   :  { %v1635_v61 = vadd.f32 %v1634_v59, %v1509_v37  ;;  %v5032_v38 = vpop.f32.mrb[59].mxu1 }
 0x353   :  { %v7002_v26 = vpack.i.bf16 %v1635_v61, %v1630_v60  ;;  %v5534_v2 = vpack.c.bf16 %v1635_v61, %v1630_v60 }
 0x354   :  { %v1639_v53 = vpop.f32.mrb[60].mxu1 }
 0x355   :  { %5705 = vrot.lane.b32.xlu1 %v7002_v26, %s6168_s1  ;;  %v5035_v11 = vpop.f32.mrb[61].mxu1  ;;  %5536 = vmatpush3.bf16.xpose.msk.msra.mxu0 %vm6984_vm4, %v5534_v2  ;;  %v1640_v58 = vadd.f32 %v1639_v53, %v1509_v37 }
 0x356   :  { %5537 = vmatprep.subr.bf16.mxu0 %v8538_v13 }
 0x358   :  { %v1644_v0 = vpop.f32.mrb[62].mxu1 }
 0x359   :  { %v1645_v14 = vadd.f32 %v1644_v0, %v1509_v37  ;;  %v5038_v15 = vpop.f32.mrb[63].mxu1 }
 0x35b   :  { %v7009_v27 = vpack.i.bf16 %v1645_v14, %v1640_v58  ;;  %v5538_v17 = vpack.c.bf16 %v1645_v14, %v1640_v58 }
 0x35c   :  { %v1649_v21 = vpop.f32.mrb[64].mxu1 }
 0x35d   :  { %5710 = vrot.lane.b32.xlu1 %v7009_v27, %s6168_s1  ;;  %v5041_v33 = vpop.f32.mrb[65].mxu1  ;;  %5540 = vmatpush3.bf16.xpose.msk.msra.mxu0 %vm6984_vm4, %v5538_v17  ;;  %v1650_v36 = vadd.f32 %v1649_v21, %v1509_v37 }
 0x35e   :  { %5541 = vmatprep.subr.bf16.mxu0 %v8538_v13 }
 0x360   :  { %v1654_v22 = vpop.f32.mrb[66].mxu1 }
 0x361   :  { %v1655_v28 = vadd.f32 %v1654_v22, %v1509_v37  ;;  %v5044_v20 = vpop.f32.mrb[67].mxu1 }
 0x363   :  { %v7020_v41 = vpack.i.bf16 %v1655_v28, %v1650_v36  ;;  %v5542_v35 = vpack.c.bf16 %v1655_v28, %v1650_v36 }
 0x364   :  { %v1659_v43 = vpop.f32.mrb[68].mxu1 }
 0x365   :  { %8581 = vst [vmem:[#allocation17_spill] sm:$0xff] %v7020_v41  ;;  %v7022_v54 = vadd.f32 %v1659_v43, %v1509_v37  ;;  %5715 = vrot.lane.b32.xlu0 %v7020_v41, %s6168_s1  ;;  %v5047_v31 = vpop.f32.mrb[69].mxu1  ;;  %5544 = vmatpush3.bf16.xpose.msk.msra.mxu0 %vm6984_vm4, %v5542_v35  ;;  %v7037_v37 = vadd.f32 %v6960_v8, %v1348_v40 }
 0x366   :  { %5068 = vmatprep.subr.mxu0 %v8540_v3  ;;  %v1469_v8 = vadd.f32 %v6966_v24, %v1348_v40  ;;  %v1484_v24 = vadd.f32 %v6972_v18, %v1348_v40  ;;  %v1499_v18 = vadd.f32 %v6978_v32, %v1348_v40 }
 0x367   :  { %8582 = vst [vmem:[#allocation18_spill] sm:$0xff] %v7022_v54  ;;  %2236 = vrot.lane.b32.xlu1 %v7022_v54, %s6168_s1 }
 0x369   :  { %5720 = vrot.lane.b32.xlu0 %v6988_v44, %s6169_s27 }
 0x36b   :  { %2194 = vrot.lane.b32.xlu1 %v7032_v49, %s6168_s1 }
 0x36d   :  { %2196 = vrot.lane.b32.xlu0 %v7037_v37, %s6168_s1  ;;  %5069 = vmatpush3.xpose.msk.msra.mxu0 %vm1674_vm3, %v7022_v54 }
 0x36e   :  { %5560 = vmatprep.subr.bf16.mxu0 %v8538_v13 }
 0x36f   :  { %5725 = vrot.lane.b32.xlu1 %v6995_v52, %s6169_s27 }
 0x370   :  { %5071 = vmatmul.mubr.msk.f32.vlgmr.msra.gmra.mrb[70].mxu0 %vm1674_vm3, %v7032_v49 }
 0x371   :  { %2198 = vrot.lane.b32.xlu0 %v7046_v62, %s6168_s1  ;;  %5073 = vmatprep.mubr.msk.f32.mxu0 %vm6166_vm2, %v8540_v3 }
 0x373   :  { %2200 = vrot.lane.b32.xlu1 %v7052_v50, %s6168_s1 }
 0x374   :  { %5074 = vmatmul.mubr.msk.f32.gmra.mrb[72].mxu0 %vm1674_vm3, %v7037_v37 }
 0x375   :  { %5730 = vrot.lane.b32.xlu0 %v7002_v26, %s6169_s27  ;;  %5076 = vmatprep.mubr.msk.f32.mxu0 %vm6166_vm2, %v8540_v3 }
 0x377   :  { %2202 = vrot.lane.b32.xlu1 %v1469_v8, %s6168_s1 }
 0x378   :  { %5077 = vmatmul.mubr.msk.f32.gmra.mrb[74].mxu0 %vm1674_vm3, %v7046_v62 }
 0x379   :  { %2204 = vrot.lane.b32.xlu0 %v1474_v19, %s6168_s1  ;;  %5079 = vmatprep.mubr.msk.f32.mxu0 %vm6166_vm2, %v8540_v3 }
 0x37b   :  { %5735 = vrot.lane.b32.xlu1 %v7009_v27, %s6169_s27 }
 0x37c   :  { %5080 = vmatmul.mubr.msk.f32.gmra.mrb[76].mxu0 %vm1674_vm3, %v7052_v50 }
 0x37d   :  { %2206 = vrot.lane.b32.xlu0 %v1479_v1, %s6168_s1  ;;  %5082 = vmatprep.mubr.msk.f32.mxu0 %vm6166_vm2, %v8540_v3 }
 0x37f   :  { %2208 = vrot.lane.b32.xlu1 %v1484_v24, %s6168_s1 }
 0x380   :  { %5083 = vmatmul.mubr.msk.f32.gmra.mrb[78].mxu0 %vm1674_vm3, %v1469_v8 }
 0x381   :  { %5740 = vrot.lane.b32.xlu0 %v7020_v41, %s6169_s27  ;;  %5085 = vmatprep.mubr.msk.f32.mxu0 %vm6166_vm2, %v8540_v3 }
 0x383   :  { %2210 = vrot.lane.b32.xlu1 %v1489_v9, %s6168_s1 }
 0x384   :  { %5086 = vmatmul.mubr.msk.f32.gmra.mrb[80].mxu0 %vm1674_vm3, %v1474_v19 }
 0x385   :  { %2212 = vrot.lane.b32.xlu0 %v1494_v10, %s6168_s1  ;;  %5088 = vmatprep.mubr.msk.f32.mxu0 %vm6166_vm2, %v8540_v3 }
 0x387   :  { %2214 = vrot.lane.b32.xlu1 %v1499_v18, %s6168_s1 }
 0x388   :  { %5089 = vmatmul.mubr.msk.f32.gmra.mrb[82].mxu0 %vm1674_vm3, %v1479_v1 }
 0x389   :  { %2774 = vrot.lane.b32.xlu0 %v7022_v54, %s6169_s27  ;;  %5091 = vmatprep.mubr.msk.f32.mxu0 %vm6166_vm2, %v8540_v3 }
 0x38b   :  { %5745 = vrot.lane.b32.xlu1 %v6988_v44, %s6170_s28 }
 0x38c   :  { %5092 = vmatmul.mubr.msk.f32.gmra.mrb[84].mxu0 %vm1674_vm3, %v1484_v24 }
 0x38d   :  { %2732 = vrot.lane.b32.xlu0 %v7032_v49, %s6169_s27  ;;  %5094 = vmatprep.mubr.msk.f32.mxu0 %vm6166_vm2, %v8540_v3 }
 0x38f   :  { %2734 = vrot.lane.b32.xlu1 %v7037_v37, %s6169_s27 }
 0x390   :  { %5095 = vmatmul.mubr.msk.f32.gmra.mrb[86].mxu0 %vm1674_vm3, %v1489_v9 }
 0x391   :  { %5750 = vrot.lane.b32.xlu0 %v6995_v52, %s6170_s28  ;;  %5097 = vmatprep.mubr.msk.f32.mxu0 %vm6166_vm2, %v8540_v3 }
 0x393   :  { %2736 = vrot.lane.b32.xlu1 %v7046_v62, %s6169_s27 }
 0x394   :  { %5098 = vmatmul.mubr.msk.f32.gmra.mrb[88].mxu0 %vm1674_vm3, %v1494_v10 }
 0x395   :  { %2738 = vrot.lane.b32.xlu0 %v7052_v50, %s6169_s27  ;;  %5100 = vmatprep.mubr.msk.f32.mxu0 %vm6166_vm2, %v8540_v3 }
 0x397   :  { %5755 = vrot.lane.b32.xlu1 %v7002_v26, %s6170_s28 }
 0x398   :  { %5101 = vmatmul.mubr.msk.f32.gmra.mrb[90].mxu0 %vm1674_vm3, %v1499_v18 }
 0x399   :  { %2740 = vrot.lane.b32.xlu0 %v1469_v8, %s6169_s27  ;;  %5180 = vmatprep.mubr.msk.f32.mxu0 %vm6166_vm2, %v8540_v3 }
 0x39b   :  { %2742 = vrot.lane.b32.xlu1 %v1474_v19, %s6169_s27 }
 0x39d   :  { %5760 = vrot.lane.b32.xlu0 %v7009_v27, %s6170_s28 }
 0x39f   :  { %2744 = vrot.lane.b32.xlu1 %v1479_v1, %s6169_s27 }
 0x3a1   :  { %2746 = vrot.lane.b32.xlu0 %v1484_v24, %s6169_s27 }
 0x3a3   :  { %5765 = vrot.lane.b32.xlu1 %v7020_v41, %s6170_s28 }
 0x3a5   :  { %2748 = vrot.lane.b32.xlu0 %v1489_v9, %s6169_s27 }
 0x3a7   :  { %2750 = vrot.lane.b32.xlu1 %v1494_v10, %s6169_s27 }
 0x3a9   :  { %2752 = vrot.lane.b32.xlu0 %v1499_v18, %s6169_s27 }
 0x3ab   :  { %3312 = vrot.lane.b32.xlu1 %v7022_v54, %s6170_s28 }
 0x3ad   :  { %3270 = vrot.lane.b32.xlu0 %v7032_v49, %s6170_s28 }
 0x3af   :  { %3272 = vrot.lane.b32.xlu1 %v7037_v37, %s6170_s28 }
 0x3b1   :  { %3274 = vrot.lane.b32.xlu0 %v7046_v62, %s6170_s28 }
 0x3b3   :  { %3276 = vrot.lane.b32.xlu1 %v7052_v50, %s6170_s28 }
 0x3b5   :  { %3278 = vrot.lane.b32.xlu0 %v1469_v8, %s6170_s28 }
 0x3b7   :  { %3280 = vrot.lane.b32.xlu1 %v1474_v19, %s6170_s28  ;;  %v5696_v25 = vpop.permute.xlu0 %5695 }
 0x3b8   :  { %v5698_v48 = vunpack.i.h.bf16 %v5696_v25  ;;  %v5697_v32 = vunpack.i.l.bf16 %v5696_v25 }
 0x3b9   :  { %3282 = vrot.lane.b32.xlu0 %v1479_v1, %s6170_s28 }
 0x3ba   :  { %v5561_v63 = vpack.c.bf16 %v5698_v48, %v5697_v32 }
 0x3bb   :  { %3284 = vrot.lane.b32.xlu1 %v1484_v24, %s6170_s28 }
 0x3bc   :  { %5563 = vmatpush3.bf16.xpose.msk.msra.mxu0 %vm6984_vm4, %v5561_v63 }
 0x3bd   :  { %3286 = vrot.lane.b32.xlu0 %v1489_v9, %s6170_s28  ;;  %5564 = vmatprep.subr.bf16.mxu0 %v8538_v13 }
 0x3bf   :  { %v5701_v6 = vpop.permute.xlu1 %5700  ;;  %3288 = vrot.lane.b32.xlu1 %v1494_v10, %s6170_s28 }
 0x3c0   :  { %v5703_v16 = vunpack.i.h.bf16 %v5701_v6  ;;  %v5702_v4 = vunpack.i.l.bf16 %v5701_v6 }
 0x3c1   :  { %3290 = vrot.lane.b32.xlu0 %v1499_v18, %s6170_s28 }
 0x3c2   :  { %v5565_v57 = vpack.c.bf16 %v5703_v16, %v5702_v4 }
 0x3c3   :  { %5775 = vrot.lane.b32.xlu1 %v6995_v52, %s6171_s29 }
 0x3c4   :  { %5567 = vmatpush3.bf16.xpose.msk.msra.mxu0 %vm6984_vm4, %v5565_v57 }
 0x3c5   :  { %5770 = vrot.lane.b32.xlu0 %v6988_v44, %s6171_s29  ;;  %5568 = vmatprep.subr.bf16.mxu0 %v8538_v13 }
 0x3c7   :  { %v5706_v59 = vpop.permute.xlu1 %5705  ;;  %5785 = vrot.lane.b32.xlu1 %v7009_v27, %s6171_s29 }
 0x3c8   :  { %v5708_v60 = vunpack.i.h.bf16 %v5706_v59  ;;  %v5707_v61 = vunpack.i.l.bf16 %v5706_v59 }
 0x3c9   :  { %5780 = vrot.lane.b32.xlu0 %v7002_v26, %s6171_s29 }
 0x3ca   :  { %v5569_v38 = vpack.c.bf16 %v5708_v60, %v5707_v61 }
 0x3cb   :  { %5800 = vrot.lane.b32.xlu1 %v6995_v52, %s6172_s30 }
 0x3cc   :  { %5571 = vmatpush3.bf16.xpose.msk.msra.mxu0 %vm6984_vm4, %v5569_v38 }
 0x3cd   :  { %5790 = vrot.lane.b32.xlu0 %v7020_v41, %s6171_s29  ;;  %5572 = vmatprep.subr.bf16.mxu0 %v8538_v13 }
 0x3cf   :  { %v5711_v2 = vpop.permute.xlu1 %5710  ;;  %5810 = vrot.lane.b32.xlu1 %v7009_v27, %s6172_s30 }
 0x3d0   :  { %v5713_v53 = vunpack.i.h.bf16 %v5711_v2  ;;  %v5712_v11 = vunpack.i.l.bf16 %v5711_v2 }
 0x3d1   :  { %5795 = vrot.lane.b32.xlu0 %v6988_v44, %s6172_s30 }
 0x3d2   :  { %v5573_v0 = vpack.c.bf16 %v5713_v53, %v5712_v11 }
 0x3d3   :  { %5820 = vrot.lane.b32.xlu1 %v6988_v44, %s6173_s10 }
 0x3d4   :  { %5575 = vmatpush3.bf16.xpose.msk.msra.mxu0 %vm6984_vm4, %v5573_v0 }
 0x3d5   :  { %5805 = vrot.lane.b32.xlu0 %v7002_v26, %s6172_s30  ;;  %5576 = vmatprep.subr.bf16.mxu0 %v8538_v13 }
 0x3d7   :  { %5835 = vrot.lane.b32.xlu1 %v7009_v27, %s6173_s10  ;;  %v5716_v58 = vpop.permute.xlu0 %5715 }
 0x3d8   :  { %v5718_v14 = vunpack.i.h.bf16 %v5716_v58  ;;  %v5717_v15 = vunpack.i.l.bf16 %v5716_v58 }
 0x3d9   :  { %5815 = vrot.lane.b32.xlu0 %v7020_v41, %s6172_s30  ;;  %v2237_v17 = vpop.permute.xlu1 %2236 }
 0x3da   :  { %v5577_v21 = vpack.c.bf16 %v5718_v14, %v5717_v15 }
 0x3db   :  { %2026 = vrot.lane.b32.xlu1 %v7022_v54, %s6171_s29  ;;  %v5721_v33 = vpop.permute.xlu0 %5720 }
 0x3dc   :  { %5579 = vmatpush3.bf16.xpose.msk.msra.mxu0 %vm6984_vm4, %v5577_v21  ;;  %v5723_v28 = vunpack.i.h.bf16 %v5721_v33  ;;  %v5722_v20 = vunpack.i.l.bf16 %v5721_v33 }
 0x3dd   :  { %5825 = vrot.lane.b32.xlu0 %v6995_v52, %s6173_s10  ;;  %v2195_v30 = vpop.permute.xlu1 %2194  ;;  %5178 = vmatprep.subr.mxu0 %v8540_v3 }
 0x3de   :  { %v5596_v35 = vpack.c.bf16 %v5723_v28, %v5722_v20 }
 0x3df   :  { %2565 = vrot.lane.b32.xlu1 %v7022_v54, %s6172_s30  ;;  %v2197_v22 = vpop.permute.xlu0 %2196 }
 0x3e1   :  { %5830 = vrot.lane.b32.xlu0 %v7002_v26, %s6173_s10  ;;  %v5726_v36 = vpop.permute.xlu1 %5725 }
 0x3e2   :  { %v5728_v49 = vunpack.i.h.bf16 %v5726_v36  ;;  %v5727_v37 = vunpack.i.l.bf16 %v5726_v36 }
 0x3e3   :  { %v2199_v39 = vpop.permute.xlu0 %2198 }
 0x3e4   :  { %5179 = vmatpush3.xpose.msk.msra.mxu0 %vm1674_vm3, %v2237_v17  ;;  %v5600_v8 = vpack.c.bf16 %v5728_v49, %v5727_v37 }
 0x3e5   :  { %5840 = vrot.lane.b32.xlu0 %v7020_v41, %s6173_s10  ;;  %v2201_v40 = vpop.permute.xlu1 %2200  ;;  %5595 = vmatprep.subr.bf16.mxu0 %v8538_v13 }
 0x3e7   :  { %v5731_v43 = vpop.permute.xlu0 %5730  ;;  %5181 = vmatmul.mubr.msk.f32.vlgmr.msra.gmra.mrb[92].mxu0 %vm1674_vm3, %v2195_v30 }
 0x3e8   :  { %5598 = vmatpush3.bf16.xpose.msk.msra.mxu0 %vm6984_vm4, %v5596_v35  ;;  %5183 = vmatprep.mubr.msk.f32.mxu0 %vm6166_vm2, %v8540_v3  ;;  %v5733_v1 = vunpack.i.h.bf16 %v5731_v43  ;;  %v5732_v24 = vunpack.i.l.bf16 %v5731_v43 }
 0x3e9   :  { %5845 = vrot.lane.b32.xlu0 %v6988_v44, %s6174_s3  ;;  %v2203_v31 = vpop.permute.xlu1 %2202  ;;  %5599 = vmatprep.subr.bf16.mxu0 %v8538_v13 }
 0x3ea   :  { %v5604_v18 = vpack.c.bf16 %v5733_v1, %v5732_v24 }
 0x3eb   :  { %v2205_v62 = vpop.permute.xlu0 %2204  ;;  %5184 = vmatmul.mubr.msk.f32.gmra.mrb[94].mxu0 %vm1674_vm3, %v2197_v22 }
 0x3ec   :  { %5186 = vmatprep.mubr.msk.f32.mxu0 %vm6166_vm2, %v8540_v3 }
 0x3ed   :  { %3103 = vrot.lane.b32.xlu0 %v7022_v54, %s6173_s10  ;;  %v5736_v50 = vpop.permute.xlu1 %5735 }
 0x3ee   :  { %v5738_v32 = vunpack.i.h.bf16 %v5736_v50  ;;  %v5737_v63 = vunpack.i.l.bf16 %v5736_v50 }
 0x3ef   :  { %v2207_v19 = vpop.permute.xlu0 %2206  ;;  %5187 = vmatmul.mubr.msk.f32.gmra.mrb[96].mxu0 %vm1674_vm3, %v2199_v39 }
 0x3f0   :  { %5602 = vmatpush3.bf16.xpose.msk.msra.mxu0 %vm6984_vm4, %v5600_v8  ;;  %5189 = vmatprep.mubr.msk.f32.mxu0 %vm6166_vm2, %v8540_v3  ;;  %v5608_v4 = vpack.c.bf16 %v5738_v32, %v5737_v63 }
 0x3f1   :  { %v2209_v44 = vpop.permute.xlu1 %2208  ;;  %5603 = vmatprep.subr.bf16.mxu0 %v8538_v13 }
 0x3f3   :  { %v5741_v9 = vpop.permute.xlu0 %5740  ;;  %5190 = vmatmul.mubr.msk.f32.gmra.mrb[98].mxu0 %vm1674_vm3, %v2201_v40 }
 0x3f4   :  { %5192 = vmatprep.mubr.msk.f32.mxu0 %vm6166_vm2, %v8540_v3  ;;  %v5743_v60 = vunpack.i.h.bf16 %v5741_v9  ;;  %v5742_v61 = vunpack.i.l.bf16 %v5741_v9 }
 0x3f5   :  { %v2211_v10 = vpop.permute.xlu1 %2210 }
 0x3f6   :  { %v5612_v53 = vpack.c.bf16 %v5743_v60, %v5742_v61 }
 0x3f7   :  { %v2213_v25 = vpop.permute.xlu0 %2212  ;;  %5193 = vmatmul.mubr.msk.f32.gmra.mrb[100].mxu0 %vm1674_vm3, %v2203_v31 }
 0x3f8   :  { %5606 = vmatpush3.bf16.xpose.msk.msra.mxu0 %vm6984_vm4, %v5604_v18  ;;  %5195 = vmatprep.mubr.msk.f32.mxu0 %vm6166_vm2, %v8540_v3 }
 0x3f9   :  { %v2215_v48 = vpop.permute.xlu1 %2214  ;;  %5607 = vmatprep.subr.bf16.mxu0 %v8538_v13 }
 0x3fb   :  { %v2775_v6 = vpop.permute.xlu0 %2774  ;;  %5196 = vmatmul.mubr.msk.f32.gmra.mrb[102].mxu0 %vm1674_vm3, %v2205_v62 }
 0x3fc   :  { %5198 = vmatprep.mubr.msk.f32.mxu0 %vm6166_vm2, %v8540_v3 }
 0x3fd   :  { %v5746_v16 = vpop.permute.xlu1 %5745 }
 0x3fe   :  { %v5748_v15 = vunpack.i.h.bf16 %v5746_v16  ;;  %v5747_v17 = vunpack.i.l.bf16 %v5746_v16 }
 0x3ff   :  { %v2733_v57 = vpop.permute.xlu0 %2732  ;;  %5199 = vmatmul.mubr.msk.f32.gmra.mrb[104].mxu0 %vm1674_vm3, %v2207_v19 }
 0x400   :  { %5610 = vmatpush3.bf16.xpose.msk.msra.mxu0 %vm6984_vm4, %v5608_v4  ;;  %5201 = vmatprep.mubr.msk.f32.mxu0 %vm6166_vm2, %v8540_v3  ;;  %v5631_v30 = vpack.c.bf16 %v5748_v15, %v5747_v17 }
 0x401   :  { %v2735_v59 = vpop.permute.xlu1 %2734  ;;  %5611 = vmatprep.subr.bf16.mxu0 %v8538_v13 }
 0x403   :  { %v5751_v38 = vpop.permute.xlu0 %5750  ;;  %5202 = vmatmul.mubr.msk.f32.gmra.mrb[106].mxu0 %vm1674_vm3, %v2209_v44 }
 0x404   :  { %5204 = vmatprep.mubr.msk.f32.mxu0 %vm6166_vm2, %v8540_v3  ;;  %v5753_v28 = vunpack.i.h.bf16 %v5751_v38  ;;  %v5752_v20 = vunpack.i.l.bf16 %v5751_v38 }
 0x405   :  { %v2737_v2 = vpop.permute.xlu1 %2736 }
 0x406   :  { %v5635_v35 = vpack.c.bf16 %v5753_v28, %v5752_v20  ;;  %v7342_v20 = vld [vmem:[%s8534_s6] sm:$0xff] }
 0x407   :  { %v2739_v11 = vpop.permute.xlu0 %2738  ;;  %5205 = vmatmul.mubr.msk.f32.gmra.mrb[108].mxu0 %vm1674_vm3, %v2211_v10 }
 0x408   :  { %5614 = vmatpush3.bf16.xpose.msk.msra.mxu0 %vm6984_vm4, %v5612_v53  ;;  %5207 = vmatprep.mubr.msk.f32.mxu0 %vm6166_vm2, %v8540_v3 }
 0x409   :  { %v5756_v0 = vpop.permute.xlu1 %5755  ;;  %5288 = vmatprep.subr.mxu0 %v8540_v3 }
 0x40a   :  { %v5758_v49 = vunpack.i.h.bf16 %v5756_v0  ;;  %v5757_v37 = vunpack.i.l.bf16 %v5756_v0 }
 0x40b   :  { %v2741_v58 = vpop.permute.xlu0 %2740  ;;  %5208 = vmatmul.mubr.msk.f32.gmra.mrb[110].mxu0 %vm1674_vm3, %v2213_v25 }
 0x40c   :  { %5210 = vmatprep.mubr.msk.f32.mxu0 %vm6166_vm2, %v8540_v3  ;;  %v5639_v8 = vpack.c.bf16 %v5758_v49, %v5757_v37 }
 0x40d   :  { %v2743_v14 = vpop.permute.xlu1 %2742 }
 0x40f   :  { %v5761_v21 = vpop.permute.xlu0 %5760  ;;  %5211 = vmatmul.mubr.msk.f32.gmra.mrb[112].mxu0 %vm1674_vm3, %v2215_v48 }
 0x410   :  { %5289 = vmatpush3.xpose.msk.msra.mxu0 %vm1674_vm3, %v2775_v6  ;;  %5290 = vmatprep.mubr.msk.f32.mxu0 %vm6166_vm2, %v8540_v3  ;;  %v5763_v1 = vunpack.i.h.bf16 %v5761_v21  ;;  %v5762_v24 = vunpack.i.l.bf16 %v5761_v21 }
 0x411   :  { %v2745_v33 = vpop.permute.xlu1 %2744  ;;  %5630 = vmatprep.subr.bf16.mxu0 %v8538_v13 }
 0x412   :  { %v5643_v18 = vpack.c.bf16 %v5763_v1, %v5762_v24 }
 0x413   :  { %v2747_v22 = vpop.permute.xlu0 %2746  ;;  %5291 = vmatmul.mubr.msk.f32.vlgmr.msra.gmra.mrb[114].mxu0 %vm1674_vm3, %v2733_v57 }
 0x414   :  { %5633 = vmatpush3.bf16.xpose.msk.msra.mxu0 %vm6984_vm4, %v5631_v30  ;;  %5293 = vmatprep.mubr.msk.f32.mxu0 %vm6166_vm2, %v8540_v3 }
 0x415   :  { %v5766_v36 = vpop.permute.xlu1 %5765  ;;  %5634 = vmatprep.subr.bf16.mxu0 %v8538_v13 }
 0x416   :  { %v5768_v32 = vunpack.i.h.bf16 %v5766_v36  ;;  %v5767_v63 = vunpack.i.l.bf16 %v5766_v36 }
 0x417   :  { %v2749_v39 = vpop.permute.xlu0 %2748  ;;  %5294 = vmatmul.mubr.msk.f32.gmra.mrb[116].mxu0 %vm1674_vm3, %v2735_v59 }
 0x418   :  { %5296 = vmatprep.mubr.msk.f32.mxu0 %vm6166_vm2, %v8540_v3  ;;  %v5647_v4 = vpack.c.bf16 %v5768_v32, %v5767_v63 }
 0x419   :  { %v2751_v40 = vpop.permute.xlu1 %2750 }
 0x41b   :  { %v2753_v43 = vpop.permute.xlu0 %2752  ;;  %5297 = vmatmul.mubr.msk.f32.gmra.mrb[118].mxu0 %vm1674_vm3, %v2737_v2 }
 0x41c   :  { %5637 = vmatpush3.bf16.xpose.msk.msra.mxu0 %vm6984_vm4, %v5635_v35  ;;  %5299 = vmatprep.mubr.msk.f32.mxu0 %vm6166_vm2, %v8540_v3 }
 0x41d   :  { %v3313_v31 = vpop.permute.xlu1 %3312  ;;  %5638 = vmatprep.subr.bf16.mxu0 %v8538_v13 }
 0x41f   :  { %v3271_v62 = vpop.permute.xlu0 %3270  ;;  %5300 = vmatmul.mubr.msk.f32.gmra.mrb[120].mxu0 %vm1674_vm3, %v2739_v11 }
 0x420   :  { %5302 = vmatprep.mubr.msk.f32.mxu0 %vm6166_vm2, %v8540_v3 }
 0x421   :  { %v7276_v50 = vpop.permute.xlu1 %3272 }
 0x423   :  { %v7278_v19 = vpop.permute.xlu0 %3274  ;;  %5303 = vmatmul.mubr.msk.f32.gmra.mrb[122].mxu0 %vm1674_vm3, %v2741_v58 }
 0x424   :  { %5641 = vmatpush3.bf16.xpose.msk.msra.mxu0 %vm6984_vm4, %v5639_v8  ;;  %5305 = vmatprep.mubr.msk.f32.mxu0 %vm6166_vm2, %v8540_v3 }
 0x425   :  { %v7285_v44 = vpop.permute.xlu1 %3276  ;;  %5642 = vmatprep.subr.bf16.mxu0 %v8538_v13 }
 0x427   :  { %v7288_v9 = vpop.permute.xlu0 %3278  ;;  %5306 = vmatmul.mubr.msk.f32.gmra.mrb[124].mxu0 %vm1674_vm3, %v2743_v14 }
 0x428   :  { %5308 = vmatprep.mubr.msk.f32.mxu0 %vm6166_vm2, %v8540_v3 }
 0x429   :  { %v7293_v10 = vpop.permute.xlu1 %3280 }
 0x42b   :  { %v7295_v25 = vpop.permute.xlu0 %3282  ;;  %5309 = vmatmul.mubr.msk.f32.gmra.mrb[126].mxu0 %vm1674_vm3, %v2745_v33 }
 0x42c   :  { %5645 = vmatpush3.bf16.xpose.msk.msra.mxu0 %vm6984_vm4, %v5643_v18  ;;  %5311 = vmatprep.mubr.msk.f32.mxu0 %vm6166_vm2, %v8540_v3 }
 0x42d   :  { %v7302_v48 = vpop.permute.xlu1 %3284  ;;  %5646 = vmatprep.subr.bf16.mxu0 %v8538_v13 }
 0x42f   :  { %v7305_v6 = vpop.permute.xlu0 %3286  ;;  %5312 = vmatmul.mubr.msk.f32.gmra.mrb[128].mxu0 %vm1674_vm3, %v2747_v22 }
 0x430   :  { %5314 = vmatprep.mubr.msk.f32.mxu0 %vm6166_vm2, %v8540_v3 }
 0x431   :  { %v7310_v16 = vpop.permute.xlu1 %3288 }
 0x433   :  { %v7312_v57 = vpop.permute.xlu0 %3290  ;;  %5315 = vmatmul.mubr.msk.f32.gmra.mrb[130].mxu0 %vm1674_vm3, %v2749_v39 }
 0x434   :  { %5649 = vmatpush3.bf16.xpose.msk.msra.mxu0 %vm6984_vm4, %v5647_v4  ;;  %5317 = vmatprep.mubr.msk.f32.mxu0 %vm6166_vm2, %v8540_v3  ;;  %v7374_v4 = vld [vmem:[%s8534_s6 + $0x10] sm:$0xff] }
 0x435   :  { %v5776_v59 = vpop.permute.xlu1 %5775  ;;  %5398 = vmatprep.subr.mxu0 %v8540_v3 }
 0x436   :  { %v5778_v53 = vunpack.i.h.bf16 %v5776_v59  ;;  %v5777_v11 = vunpack.i.l.bf16 %v5776_v59 }
 0x437   :  { %v5771_v60 = vpop.permute.xlu0 %5770  ;;  %5318 = vmatmul.mubr.msk.f32.gmra.mrb[132].mxu0 %vm1674_vm3, %v2751_v40 }
 0x438   :  { %v5773_v61 = vunpack.i.h.bf16 %v5771_v60  ;;  %v5772_v38 = vunpack.i.l.bf16 %v5771_v60  ;;  %5320 = vmatprep.mubr.msk.f32.mxu0 %vm6166_vm2, %v8540_v3  ;;  %v5549_v14 = vpack.c.bf16 %v5778_v53, %v5777_v11 }
 0x439   :  { %v5786_v2 = vpop.permute.xlu1 %5785 }
 0x43a   :  { %v5546_v0 = vpack.c.bf16 %v5773_v61, %v5772_v38  ;;  %v5788_v33 = vunpack.i.h.bf16 %v5786_v2  ;;  %v5787_v30 = vunpack.i.l.bf16 %v5786_v2  ;;  %v7387_v2 = vld [vmem:[%s8534_s6 + $0x18] sm:$0xff] }
 0x43b   :  { %v5781_v45 = vpop.permute.xlu0 %5780  ;;  %5321 = vmatmul.mubr.msk.f32.gmra.mrb[134].mxu0 %vm1674_vm3, %v2753_v43 }
 0x43c   :  { %5547 = vmatpush3.bf16.msra.mxu1 %v5546_v0  ;;  %5399 = vmatpush3.xpose.msk.msra.mxu0 %vm1674_vm3, %v3313_v31  ;;  %v5783_v15 = vunpack.i.h.bf16 %v5781_v45  ;;  %v5782_v17 = vunpack.i.l.bf16 %v5781_v45  ;;  %v5555_v43 = vpack.c.bf16 %v5788_v33, %v5787_v30 }
 0x43d   :  { %v7325_v58 = vpop.permute.xlu1 %5800  ;;  %5400 = vmatprep.mubr.msk.f32.mxu0 %vm6166_vm2, %v8540_v3  ;;  %5548 = vmatprep.subr.bf16.mxu1 %v8538_v13 }
 0x43e   :  { %5665 = vmatprep.subr.bf16.mxu0 %v8538_v13  ;;  %v5552_v22 = vpack.c.bf16 %v5783_v15, %v5782_v17 }
 0x43f   :  { %5401 = vmatmul.mubr.msk.f32.vlgmr.msra.gmra.mrb[136].mxu0 %vm1674_vm3, %v3271_v62  ;;  %v5791_v36 = vpop.permute.xlu0 %5790 }
 0x440   :  { %5550 = vmatpush3.bf16.msra.mxu1 %v5549_v14  ;;  %5403 = vmatprep.mubr.msk.f32.mxu0 %vm6166_vm2, %v8540_v3  ;;  %v5793_v31 = vunpack.i.h.bf16 %v5791_v36  ;;  %v5792_v49 = vunpack.i.l.bf16 %v5791_v36 }
 0x441   :  { %v7334_v21 = vpop.permute.xlu1 %5810  ;;  %5551 = vmatprep.subr.bf16.mxu1 %v8538_v13 }
 0x442   :  { %v5558_v32 = vpack.c.bf16 %v5793_v31, %v5792_v49 }
 0x443   :  { %v1807_v28 = vpop.f32.mrb[70].mxu0  ;;  %5404 = vmatmul.mubr.msk.f32.gmra.mrb[138].mxu0 %vm1674_vm3, %v7276_v50  ;;  %v7357_v50 = vld [vmem:[%s8534_s6 + $0x8] sm:$0xff] }
 0x444   :  { %v1861_v39 = vmul.f32 0.35355338, %v1807_v28  ;;  %v5072_v40 = vpop.f32.mrb[71].mxu0  ;;  %5553 = vmatpush3.bf16.msra.mxu1 %v5552_v22  ;;  %5406 = vmatprep.mubr.msk.f32.mxu0 %vm6166_vm2, %v8540_v3 }
 0x445   :  { %v7346_v35 = vpop.permute.xlu1 %5820  ;;  %5554 = vmatprep.subr.bf16.mxu1 %v8538_v13 }
 0x446   :  { %8583 = vst [vmem:[#allocation19_spill] sm:$0xff] %v7346_v35  ;;  %v7350_v37 = vadd.f32 %v1861_v39, %v7342_v20 }
 0x447   :  { %v1812_v62 = vpop.f32.mrb[72].mxu0  ;;  %5407 = vmatmul.mubr.msk.f32.gmra.mrb[140].mxu0 %vm1674_vm3, %v7278_v19 }
 0x448   :  { %v1862_v8 = vmul.f32 0.35355338, %v1812_v62  ;;  %v5075_v1 = vpop.f32.mrb[73].mxu0  ;;  %5556 = vmatpush3.bf16.msra.mxu1 %v5555_v43  ;;  %5409 = vmatprep.mubr.msk.f32.mxu0 %vm6166_vm2, %v8540_v3  ;;  %v1884_v18 = vsel %vm1883_vm5, %v7350_v37, -inf }
 0x449   :  { %v7361_v24 = vpop.permute.xlu1 %5835  ;;  %5557 = vmatprep.subr.bf16.mxu1 %v8538_v13  ;;  %1885 = vmax.xlane.f32.xlu1 %v1884_v18 }
 0x44a   :  { %8584 = vst [vmem:[#allocation20_spill] sm:$0xff] %v7361_v24  ;;  %v7367_v19 = vadd.f32 %v1862_v8, %v7357_v50 }
 0x44b   :  { %v1817_v63 = vpop.f32.mrb[74].mxu0  ;;  %5410 = vmatmul.mubr.msk.f32.gmra.mrb[142].mxu0 %vm1674_vm3, %v7285_v44 }
 0x44c   :  { %v1863_v59 = vmul.f32 0.35355338, %v1817_v63  ;;  %v5078_v60 = vpop.f32.mrb[75].mxu0  ;;  %5559 = vmatpush3.bf16.msra.mxu1 %v5558_v32  ;;  %5412 = vmatprep.mubr.msk.f32.mxu0 %vm6166_vm2, %v8540_v3  ;;  %v1887_v61 = vsel %vm1883_vm5, %v7367_v19, -inf }
 0x44d   :  { %5123 = vmatprep.subr.mxu1 %v8540_v3  ;;  %1888 = vmax.xlane.f32.xlu0 %v1887_v61  ;;  %v2027_v38 = vpop.permute.xlu1 %2026 }
 0x44e   :  { %v7382_v44 = vadd.f32 %v1863_v59, %v7374_v4 }
 0x44f   :  { %v1822_v53 = vpop.f32.mrb[76].mxu0  ;;  %5413 = vmatmul.mubr.msk.f32.gmra.mrb[144].mxu0 %vm1674_vm3, %v7288_v9  ;;  %v7405_v9 = vld [vmem:[%s8534_s6 + $0x20] sm:$0xff] }
 0x450   :  { %v1864_v11 = vmul.f32 0.35355338, %v1822_v53  ;;  %v5081_v0 = vpop.f32.mrb[77].mxu0  ;;  %5124 = vmatpush3.msk.msra.mxu1 %vm2071_vm6, %v2027_v38  ;;  %v1890_v45 = vsel %vm1883_vm5, %v7382_v44, -inf  ;;  %5415 = vmatprep.mubr.msk.f32.mxu0 %vm6166_vm2, %v8540_v3 }
 0x451   :  { %5580 = vmatprep.subr.bf16.mxu1 %v8538_v13  ;;  %1891 = vmax.xlane.f32.xlu0 %v1890_v45 }
 0x452   :  { %v7398_v14 = vadd.f32 %v1864_v11, %v7387_v2 }
 0x453   :  { %v1827_v15 = vpop.f32.mrb[78].mxu0  ;;  %5416 = vmatmul.mubr.msk.f32.gmra.mrb[146].mxu0 %vm1674_vm3, %v7293_v10  ;;  %v7417_v10 = vld [vmem:[%s8534_s6 + $0x28] sm:$0xff] }
 0x454   :  { %v1865_v17 = vmul.f32 0.35355338, %v1827_v15  ;;  %v5084_v33 = vpop.f32.mrb[79].mxu0  ;;  %v1893_v30 = vsel %vm1883_vm5, %v7398_v14, -inf  ;;  %5418 = vmatprep.mubr.msk.f32.mxu0 %vm6166_vm2, %v8540_v3 }
 0x455   :  { %1894 = vmax.xlane.f32.xlu0 %v1893_v30 }
 0x456   :  { %v7412_v22 = vadd.f32 %v1865_v17, %v7405_v9 }
 0x457   :  { %v1832_v36 = vpop.f32.mrb[80].mxu0  ;;  %5419 = vmatmul.mubr.msk.f32.gmra.mrb[148].mxu0 %vm1674_vm3, %v7295_v25  ;;  %v7433_v25 = vld [vmem:[%s8534_s6 + $0x30] sm:$0xff] }
 0x458   :  { %v1866_v28 = vmul.f32 0.35355338, %v1832_v36  ;;  %v5087_v39 = vpop.f32.mrb[81].mxu0  ;;  %v1896_v40 = vsel %vm1883_vm5, %v7412_v22, -inf  ;;  %5421 = vmatprep.mubr.msk.f32.mxu0 %vm6166_vm2, %v8540_v3 }
 0x459   :  { %1897 = vmax.xlane.f32.xlu1 %v1896_v40  ;;  %v7491_v39 = vld [vmem:[%s8534_s6 + $0x50] sm:$0x3] }
 0x45a   :  { %v7426_v43 = vadd.f32 %v1866_v28, %v7417_v10 }
 0x45b   :  { %v1837_v31 = vpop.f32.mrb[82].mxu0  ;;  %5422 = vmatmul.mubr.msk.f32.gmra.mrb[150].mxu0 %vm1674_vm3, %v7302_v48  ;;  %v7445_v48 = vld [vmem:[%s8534_s6 + $0x38] sm:$0xff] }
 0x45c   :  { %v1867_v49 = vmul.f32 0.35355338, %v1837_v31  ;;  %v5090_v62 = vpop.f32.mrb[83].mxu0  ;;  %v1899_v8 = vsel %vm1883_vm5, %v7426_v43, -inf  ;;  %5424 = vmatprep.mubr.msk.f32.mxu0 %vm6166_vm2, %v8540_v3  ;;  %v7500_v31 = vpop.permute.xlu0 %5795 }
 0x45d   :  { %1900 = vmax.xlane.f32.xlu0 %v1899_v8 }
 0x45e   :  { %v7440_v1 = vadd.f32 %v1867_v49, %v7433_v25 }
 0x45f   :  { %v1842_v18 = vpop.f32.mrb[84].mxu0  ;;  %5425 = vmatmul.mubr.msk.f32.gmra.mrb[152].mxu0 %vm1674_vm3, %v7305_v6  ;;  %v7461_v6 = vld [vmem:[%s8534_s6 + $0x40] sm:$0xff] }
 0x460   :  { %v1868_v32 = vmul.f32 0.35355338, %v1842_v18  ;;  %v5093_v63 = vpop.f32.mrb[85].mxu0  ;;  %v1902_v59 = vsel %vm1883_vm5, %v7440_v1, -inf  ;;  %5427 = vmatprep.mubr.msk.f32.mxu0 %vm6166_vm2, %v8540_v3  ;;  %v7502_v49 = vpop.permute.xlu0 %5805 }
 0x461   :  { %1903 = vmax.xlane.f32.xlu1 %v1902_v59 }
 0x462   :  { %v7454_v60 = vadd.f32 %v1868_v32, %v7445_v48 }
 0x463   :  { %v1847_v61 = vpop.f32.mrb[86].mxu0  ;;  %5428 = vmatmul.mubr.msk.f32.gmra.mrb[154].mxu0 %vm1674_vm3, %v7310_v16 }
 0x464   :  { %v1869_v38 = vmul.f32 0.35355338, %v1847_v61  ;;  %v1905_v53 = vsel %vm1883_vm5, %v7454_v60, -inf  ;;  %5430 = vmatprep.mubr.msk.f32.mxu0 %vm6166_vm2, %v8540_v3  ;;  %v5096_v11 = vpop.f32.mrb[87].mxu0  ;;  %v7504_v62 = vpop.permute.xlu0 %5815 }
 0x465   :  { %1906 = vmax.xlane.f32.xlu0 %v1905_v53 }
 0x466   :  { %v7468_v0 = vadd.f32 %v1869_v38, %v7461_v6 }
 0x467   :  { %5431 = vmatmul.mubr.msk.f32.gmra.mrb[156].mxu0 %vm1674_vm3, %v7312_v57  ;;  %v1852_v16 = vpop.f32.mrb[88].mxu0  ;;  %v7483_v57 = vld [vmem:[%s8534_s6 + $0x48] sm:$0xff]  ;;  %s6178_s6 = smov [#allocation2]  }
 0x468   :  { %v1908_v45 = vsel %vm1883_vm5, %v7468_v0, -inf  ;;  %v5099_v15 = vpop.f32.mrb[89].mxu0  ;;  %5510 = vmatprep.mubr.msk.f32.mxu0 %vm6166_vm2, %v8540_v3  ;;  %v1870_v30 = vmul.f32 0.35355338, %v1852_v16  ;;  %v7509_v59 = vpop.permute.xlu0 %5825  ;;  %s4260_s30 = sshll.u32 %s6178_s6, 4  ;;  %s4261_s30 = int_to_ptr.vmem [resolvable:$true] %s4260_s30 }
 0x469   :  { %1909 = vmax.xlane.f32.xlu1 %v1908_v45  ;;  %8585 = vst [vmem:[#allocation21_spill] sm:$0xff] %v7509_v59  ;;  %s6141_s10 = scalar_lea.vmem %s4261_s30, 32  ;;  %p6146_p1 = scmp.lt.s32.totalorder %s4261_s30, %s4261_s30 }
 0x46a   :  { %v7486_v36 = vadd.f32 %v1870_v30, %v7483_v57  ;;  %p6142_p0 = scmp.ne.s32.totalorder %s4261_s30, %s6141_s10  ;;  %p6147_p2 = scmp.lt.s32.totalorder %s6141_s10, %s6141_s10 }
 0x46b   :  { %v1857_v17 = vpop.f32.mrb[90].mxu0 }
 0x46c   :  { %v5102_v33 = vpop.f32.mrb[91].mxu0  ;;  %v1871_v28 = vmul.f32 0.35355338, %v1857_v17  ;;  %v7518_v30 = vpop.permute.xlu0 %5830  ;;  %p6148_p3 = por %p6147_p2, %p6146_p1 }
 0x46d   :  { %8586 = vst [vmem:[#allocation22_spill] sm:$0xff] %v7518_v30 }
 0x46e   :  { %p6149_p4 = pnand %p6148_p3, %p6142_p0 }
 0x47a   :  { %5850 = vrot.lane.b32.xlu1 %v6995_v52, %s6174_s3  ;;  %v7494_v52 = vadd.f32 %v1871_v28, %v7491_v39 }
 0x47b   :  { %5855 = vrot.lane.b32.xlu0 %v7002_v26, %s6174_s3  ;;  %v1911_v26 = vsel %vm1883_vm5, %v7486_v36, -inf }
 0x47c   :  { %v1915_v40 = vsel %vm1914_vm7, %v7494_v52, -inf }
 0x49a   :  { %1912 = vmax.xlane.f32.xlu0 %v1911_v26 }
 0x49e   :  { %1916 = vmax.xlane.f32.xlu1 %v1915_v40 }
 0x4ba   :  { %v2348_v8 = vpop.f32.mrb[92].mxu0 }
 0x4bb   :  { %v2402_v18 = vmul.f32 0.35355338, %v2348_v8  ;;  %v5182_v32 = vpop.f32.mrb[93].mxu0 }
 0x4bd   :  { %v7507_v63 = vadd.f32 %v2402_v18, %v7342_v20 }
 0x4be   :  { %v2353_v61 = vpop.f32.mrb[94].mxu0 }
 0x4bf   :  { %v2403_v38 = vmul.f32 0.35355338, %v2353_v61  ;;  %v5185_v53 = vpop.f32.mrb[95].mxu0  ;;  %v2424_v11 = vsel %vm1883_vm5, %v7507_v63, -inf  ;;  %v7528_v61 = vpop.permute.xlu0 %5840 }
 0x4c0   :  { %2425 = vmax.xlane.f32.xlu0 %v2424_v11  ;;  %8587 = vst [vmem:[#allocation23_spill] sm:$0xff] %v7528_v61 }
 0x4c1   :  { %v7514_v16 = vadd.f32 %v2403_v38, %v7357_v50 }
 0x4c2   :  { %v2358_v45 = vpop.f32.mrb[96].mxu0 }
 0x4c3   :  { %v2404_v15 = vmul.f32 0.35355338, %v2358_v45  ;;  %v5188_v17 = vpop.f32.mrb[97].mxu0  ;;  %v2427_v33 = vsel %vm1883_vm5, %v7514_v16, -inf }
 0x4c4   :  { %2428 = vmax.xlane.f32.xlu1 %v2427_v33 }
 0x4c5   :  { %v7521_v28 = vadd.f32 %v2404_v15, %v7374_v4 }
 0x4c6   :  { %v2363_v26 = vpop.f32.mrb[98].mxu0 }
 0x4c7   :  { %v2405_v40 = vmul.f32 0.35355338, %v2363_v26  ;;  %v5191_v8 = vpop.f32.mrb[99].mxu0  ;;  %v2430_v18 = vsel %vm1883_vm5, %v7521_v28, -inf }
 0x4c8   :  { %2431 = vmax.xlane.f32.xlu0 %v2430_v18 }
 0x4c9   :  { %v7526_v32 = vadd.f32 %v2405_v40, %v7387_v2  ;;  %v7537_v40 = vpop.permute.xlu0 %5845 }
 0x4ca   :  { %v2368_v38 = vpop.f32.mrb[100].mxu0  ;;  %8588 = vst [vmem:[#allocation24_spill] sm:$0xff] %v7537_v40 }
 0x4cb   :  { %v2406_v53 = vmul.f32 0.35355338, %v2368_v38  ;;  %v5194_v11 = vpop.f32.mrb[101].mxu0  ;;  %v2433_v45 = vsel %vm1883_vm5, %v7526_v32, -inf }
 0x4cc   :  { %2434 = vmax.xlane.f32.xlu1 %v2433_v45  ;;  %v7542_v11 = vpop.permute.xlu1 %2565 }
 0x4cd   :  { %v7533_v15 = vadd.f32 %v2406_v53, %v7405_v9 }
 0x4ce   :  { %v2373_v17 = vpop.f32.mrb[102].mxu0 }
 0x4cf   :  { %v2407_v33 = vmul.f32 0.35355338, %v2373_v17  ;;  %v5197_v26 = vpop.f32.mrb[103].mxu0  ;;  %v2436_v8 = vsel %vm1883_vm5, %v7533_v15, -inf }
 0x4d0   :  { %2437 = vmax.xlane.f32.xlu0 %v2436_v8  ;;  %v7549_v26 = vpop.permute.xlu0 %3103 }
 0x4d1   :  { %v7540_v18 = vadd.f32 %v2407_v33, %v7417_v10  ;;  %8589 = vst [vmem:[#allocation25_spill] sm:$0xff] %v7549_v26 }
 0x4d2   :  { %v2378_v38 = vpop.f32.mrb[104].mxu0 }
 0x4d3   :  { %v2408_v13 = vmul.f32 0.35355338, %v2378_v38  ;;  %v5200_v45 = vpop.f32.mrb[105].mxu0  ;;  %v2439_v53 = vsel %vm1883_vm5, %v7540_v18, -inf }
 0x4d4   :  { %2440 = vmax.xlane.f32.xlu1 %v2439_v53 }
 0x4d5   :  { %v7547_v17 = vadd.f32 %v2408_v13, %v7433_v25 }
 0x4d6   :  { %v2383_v3 = vpop.f32.mrb[106].mxu0  ;;  %v1886_v7 = vpop.xlane.xlu1 %1885 }
 0x4d7   :  { %v2409_v8 = vmul.f32 0.35355338, %v2383_v3  ;;  %v5203_v5 = vpop.f32.mrb[107].mxu0  ;;  %v2442_v33 = vsel %vm1883_vm5, %v7547_v17, -inf  ;;  %v1918_v46 = vsub.f32 %v7350_v37, %v1886_v7 }
 0x4d8   :  { %2443 = vmax.xlane.f32.xlu0 %v2442_v33 }
 0x4d9   :  { %v7555_v38 = vadd.f32 %v2409_v8, %v7445_v48  ;;  %v1929_v45 = vmul.f32 1.442695, %v1918_v46 }
 0x4da   :  { %v2388_v53 = vpop.f32.mrb[108].mxu0  ;;  %v1889_v51 = vpop.xlane.xlu0 %1888 }
 0x4db   :  { %v2410_v13 = vmul.f32 0.35355338, %v2388_v53  ;;  %v5206_v55 = vpop.f32.mrb[109].mxu0  ;;  %v2445_v47 = vsel %vm1883_vm5, %v7555_v38, -inf  ;;  %5963 = vpow2.f32 %v1929_v45  ;;  %v1919_v3 = vsub.f32 %v7367_v19, %v1889_v51 }
 0x4dc   :  { %2446 = vmax.xlane.f32.xlu1 %v2445_v47 }
 0x4dd   :  { %v7561_v5 = vadd.f32 %v2410_v13, %v7461_v6  ;;  %v1931_v7 = vmul.f32 1.442695, %v1919_v3 }
 0x4de   :  { %v2393_v37 = vpop.f32.mrb[110].mxu0  ;;  %v1892_v33 = vpop.xlane.xlu0 %1891 }
 0x4df   :  { %v2411_v8 = vmul.f32 0.35355338, %v2393_v37  ;;  %v2448_v46 = vsel %vm1883_vm5, %v7561_v5, -inf  ;;  %v5209_v42 = vpop.f32.mrb[111].mxu0  ;;  %5965 = vpow2.f32 %v1931_v7  ;;  %v1920_v55 = vsub.f32 %v7382_v44, %v1892_v33 }
 0x4e0   :  { %2449 = vmax.xlane.f32.xlu0 %v2448_v46 }
 0x4e1   :  { %v7567_v45 = vadd.f32 %v2411_v8, %v7483_v57  ;;  %v1933_v51 = vmul.f32 1.442695, %v1920_v55 }
 0x4e2   :  { %v7569_v47 = vpop.f32.mrb[112].mxu0  ;;  %v1895_v19 = vpop.xlane.xlu0 %1894 }
 0x4e3   :  { %v2451_v53 = vsel %vm1883_vm5, %v7567_v45, -inf  ;;  %v5212_v13 = vpop.f32.mrb[113].mxu0  ;;  %v1921_v3 = vsub.f32 %v7398_v14, %v1895_v19  ;;  %5967 = vpow2.f32 %v1933_v51 }
 0x4e4   :  { %2452 = vmax.xlane.f32.xlu1 %v2451_v53 }
 0x4e5   :  { %v7574_v37 = vpop.eup %5963  ;;  %v1935_v42 = vmul.f32 1.442695, %v1921_v3 }
 0x4e6   :  { %v7576_v44 = vpop.f32.mrb[114].mxu0  ;;  %v1898_v7 = vpop.xlane.xlu1 %1897  ;;  %v1951_v8 = vsel %vm1883_vm5, %v7574_v37, 0.0 }
 0x4e7   :  { %v5292_v33 = vpop.f32.mrb[115].mxu0  ;;  %5969 = vpow2.f32 %v1935_v42  ;;  %v1922_v55 = vsub.f32 %v7412_v22, %v1898_v7 }
 0x4e8   :  { %1952 = vadd.xlane.f32.xlu1 %v1951_v8 }
 0x4e9   :  { %v7580_v46 = vpop.eup %5965  ;;  %v1937_v33 = vmul.f32 1.442695, %v1922_v55 }
 0x4ea   :  { %v2891_v13 = vpop.f32.mrb[116].mxu0  ;;  %v1901_v14 = vpop.xlane.xlu0 %1900  ;;  %v1954_v51 = vsel %vm1883_vm5, %v7580_v46, 0.0 }
 0x4eb   :  { %v2941_v19 = vmul.f32 0.35355338, %v2891_v13  ;;  %v5295_v53 = vpop.f32.mrb[117].mxu0  ;;  %v1923_v34 = vsub.f32 %v7426_v43, %v1901_v14  ;;  %5971 = vpow2.f32 %v1937_v33 }
 0x4ec   :  { %1955 = vadd.xlane.f32.xlu1 %v1954_v51 }
 0x4ed   :  { %v7586_v3 = vadd.f32 %v2941_v19, %v7357_v50  ;;  %v7593_v42 = vpop.eup %5967  ;;  %v1939_v7 = vmul.f32 1.442695, %v1923_v34 }
 0x4ee   :  { %v7589_v8 = vpop.f32.mrb[118].mxu0  ;;  %v1904_v53 = vpop.xlane.xlu1 %1903  ;;  %v1957_v55 = vsel %vm1883_vm5, %v7593_v42, 0.0 }
 0x4ef   :  { %v5298_v23 = vpop.f32.mrb[119].mxu0  ;;  %v2965_v22 = vsel %vm1883_vm5, %v7586_v3, -inf  ;;  %5973 = vpow2.f32 %v1939_v7 }
 0x4f0   :  { %2966 = vmax.xlane.f32.xlu1 %v2965_v22  ;;  %v1924_v23 = vsub.f32 %v7440_v1, %v1904_v53 }
 0x4f1   :  { %v7597_v19 = vpop.eup %5969 }
 0x4f2   :  { %v2901_v13 = vpop.f32.mrb[120].mxu0  ;;  %v1907_v43 = vpop.xlane.xlu0 %1906  ;;  %v1941_v22 = vmul.f32 1.442695, %v1924_v23 }
 0x4f3   :  { %v2943_v51 = vmul.f32 0.35355338, %v2901_v13  ;;  %v5301_v12 = vpop.f32.mrb[121].mxu0  ;;  %v1925_v13 = vsub.f32 %v7454_v60, %v1907_v43 }
 0x4f4   :  { %1958 = vadd.xlane.f32.xlu1 %v1957_v55  ;;  %v1960_v12 = vsel %vm1883_vm5, %v7597_v19, 0.0  ;;  %5975 = vpow2.f32 %v1941_v22 }
 0x4f5   :  { %v7603_v14 = vadd.f32 %v2943_v51, %v7387_v2  ;;  %v7610_v53 = vpop.eup %5971 }
 0x4f6   :  { %5860 = vrot.lane.b32.xlu0 %v7009_v27, %s6174_s3  ;;  %v2906_v34 = vpop.f32.mrb[122].mxu0  ;;  %v1943_v27 = vmul.f32 1.442695, %v1925_v13 }
 0x4f7   :  { %v5304_v33 = vpop.f32.mrb[123].mxu0  ;;  %v2971_v1 = vsel %vm1883_vm5, %v7603_v14, -inf }
 0x4f8   :  { %1961 = vadd.xlane.f32.xlu1 %v1960_v12  ;;  %v1963_v33 = vsel %vm1883_vm5, %v7610_v53, 0.0  ;;  %5977 = vpow2.f32 %v1943_v27 }
 0x4f9   :  { %v7614_v12 = vpop.eup %5973 }
 0x4fa   :  { %v2911_v55 = vpop.f32.mrb[124].mxu0 }
 0x4fb   :  { %v5307_v7 = vpop.f32.mrb[125].mxu0  ;;  %v2945_v56 = vmul.f32 0.35355338, %v2911_v55 }
 0x4fc   :  { %2972 = vmax.xlane.f32.xlu1 %v2971_v1  ;;  %v1966_v7 = vsel %vm1883_vm5, %v7614_v12, 0.0 }
 0x4fd   :  { %v7617_v23 = vadd.f32 %v2945_v56, %v7417_v10 }
 0x4fe   :  { %v2916_v51 = vpop.f32.mrb[126].mxu0  ;;  %v7625_v55 = vpop.eup %5975 }
 0x4ff   :  { %v5310_v29 = vpop.f32.mrb[127].mxu0  ;;  %v1969_v56 = vsel %vm1883_vm5, %v7625_v55, 0.0 }
 0x500   :  { %1964 = vadd.xlane.f32.xlu1 %v1963_v33  ;;  %v2977_v29 = vsel %vm1883_vm5, %v7617_v23, -inf }
 0x502   :  { %v2921_v60 = vpop.f32.mrb[128].mxu0  ;;  %v7631_v33 = vpop.eup %5977 }
 0x503   :  { %v5313_v43 = vpop.f32.mrb[129].mxu0  ;;  %v1972_v40 = vsel %vm1883_vm5, %v7631_v33, 0.0 }
 0x504   :  { %1967 = vadd.xlane.f32.xlu1 %v1966_v7  ;;  %v2412_v43 = vmul.f32 0.35355338, %v7569_v47  ;;  %v2942_v47 = vmul.f32 0.35355338, %v7589_v8 }
 0x506   :  { %v7621_v22 = vpop.f32.mrb[130].mxu0  ;;  %v7639_v26 = vadd.f32 %v2412_v43, %v7491_v39 }
 0x507   :  { %v5316_v13 = vpop.f32.mrb[131].mxu0 }
 0x508   :  { %2978 = vmax.xlane.f32.xlu1 %v2977_v29  ;;  %v2940_v29 = vmul.f32 0.35355338, %v7576_v44  ;;  %v2944_v44 = vmul.f32 0.35355338, %v2906_v34 }
 0x50a   :  { %v7627_v1 = vpop.f32.mrb[132].mxu0  ;;  %v7645_v61 = vadd.f32 %v2940_v29, %v7342_v20 }
 0x50b   :  { %v5319_v27 = vpop.f32.mrb[133].mxu0 }
 0x50c   :  { %1970 = vadd.xlane.f32.xlu1 %v1969_v56  ;;  %v1910_v56 = vpop.xlane.xlu1 %1909 }
 0x50d   :  { %v1926_v43 = vsub.f32 %v7468_v0, %v1910_v56 }
 0x50e   :  { %v7634_v7 = vpop.f32.mrb[134].mxu0 }
 0x50f   :  { %v5322_v13 = vpop.f32.mrb[135].mxu0  ;;  %v1945_v59 = vmul.f32 1.442695, %v1926_v43  ;;  %v2947_v43 = vmul.f32 0.35355338, %v2921_v60 }
 0x510   :  { %1973 = vadd.xlane.f32.xlu1 %v1972_v40  ;;  %v2454_v13 = vsel %vm1914_vm7, %v7639_v26, -inf  ;;  %v7652_v40 = vadd.f32 %v2942_v47, %v7374_v4 }
 0x511   :  { %5979 = vpow2.f32 %v1945_v59 }
 0x512   :  { %v7642_v27 = vpop.f32.mrb[136].mxu0  ;;  %v2968_v34 = vsel %vm1883_vm5, %v7652_v40, -inf }
 0x513   :  { %v5402_v54 = vpop.f32.mrb[137].mxu0 }
 0x514   :  { %v2962_v54 = vsel %vm1883_vm5, %v7645_v61, -inf }
 0x515   :  { %2455 = vmax.xlane.f32.xlu0 %v2454_v13 }
 0x516   :  { %v3429_v41 = vpop.f32.mrb[138].mxu0 }
 0x517   :  { %v3479_v24 = vmul.f32 0.35355338, %v3429_v41  ;;  %v5405_v30 = vpop.f32.mrb[139].mxu0  ;;  %v7664_v41 = vadd.f32 %v2944_v44, %v7405_v9 }
 0x518   :  { %v2946_v30 = vmul.f32 0.35355338, %v2916_v51 }
 0x519   :  { %v7657_v29 = vadd.f32 %v3479_v24, %v7357_v50  ;;  %2963 = vmax.xlane.f32.xlu0 %v2962_v54  ;;  %v2974_v54 = vsel %vm1883_vm5, %v7664_v41, -inf }
 0x51a   :  { %v7659_v8 = vpop.f32.mrb[140].mxu0  ;;  %v7669_v56 = vadd.f32 %v2946_v30, %v7433_v25  ;;  %v7685_v30 = vpop.permute.xlu1 %5850 }
 0x51b   :  { %v5408_v13 = vpop.f32.mrb[141].mxu0  ;;  %v3503_v0 = vsel %vm1883_vm5, %v7657_v29, -inf  ;;  %8592 = vst [vmem:[#allocation28_spill] sm:$0xff] %v7685_v30 }
 0x51c   :  { %3504 = vmax.xlane.f32.xlu1 %v3503_v0  ;;  %v7676_v13 = vpop.permute.xlu0 %5855  ;;  %v2980_v60 = vsel %vm1883_vm5, %v7669_v56, -inf }
 0x51d   :  { %2969 = vmax.xlane.f32.xlu0 %v2968_v34  ;;  %8591 = vst [vmem:[#allocation27_spill] sm:$0xff] %v7676_v13  ;;  %v7681_v34 = vadd.f32 %v2947_v43, %v7445_v48  ;;  %v7691_v43 = vpop.eup %5979 }
 0x51e   :  { %v3439_v47 = vpop.f32.mrb[142].mxu0 }
 0x51f   :  { %v3481_v50 = vmul.f32 0.35355338, %v3439_v47  ;;  %v5411_v24 = vpop.f32.mrb[143].mxu0  ;;  %v2983_v13 = vsel %vm1883_vm5, %v7681_v34, -inf }
 0x521   :  { %v7674_v44 = vadd.f32 %v3481_v50, %v7387_v2  ;;  %2975 = vmax.xlane.f32.xlu0 %v2974_v54  ;;  %v2948_v54 = vmul.f32 0.35355338, %v7621_v22 }
 0x522   :  { %v3444_v51 = vpop.f32.mrb[144].mxu0 }
 0x523   :  { %8590 = vst [vmem:[#allocation26_spill] sm:$0xff] %v7674_v44  ;;  %v5414_v0 = vpop.f32.mrb[145].mxu0  ;;  %v3509_v59 = vsel %vm1883_vm5, %v7674_v44, -inf  ;;  %v7699_v22 = vadd.f32 %v2948_v54, %v7461_v6  ;;  %v2949_v54 = vmul.f32 0.35355338, %v7627_v1 }
 0x524   :  { %3510 = vmax.xlane.f32.xlu1 %v3509_v59 }
 0x525   :  { %2981 = vmax.xlane.f32.xlu0 %v2980_v60 }
 0x526   :  { %v3449_v2 = vpop.f32.mrb[146].mxu0 }
 0x527   :  { %v3483_v47 = vmul.f32 0.35355338, %v3449_v2  ;;  %v1913_v50 = vpop.xlane.xlu0 %1912  ;;  %v5417_v24 = vpop.f32.mrb[147].mxu0 }
 0x528   :  { %v1927_v0 = vsub.f32 %v7486_v36, %v1913_v50  ;;  %v1975_v50 = vsel %vm1883_vm5, %v7691_v43, 0.0 }
 0x529   :  { %v7694_v59 = vadd.f32 %v3483_v47, %v7417_v10  ;;  %2984 = vmax.xlane.f32.xlu0 %v2983_v13 }
 0x52a   :  { %v1947_v60 = vmul.f32 1.442695, %v1927_v0  ;;  %v3454_v35 = vpop.f32.mrb[148].mxu0 }
 0x52b   :  { %8593 = vst [vmem:[#allocation29_spill] sm:$0xff] %v7694_v59  ;;  %v1917_v30 = vpop.xlane.xlu1 %1916  ;;  %v5420_v44 = vpop.f32.mrb[149].mxu0  ;;  %v3515_v2 = vsel %vm1883_vm5, %v7694_v59, -inf }
 0x52c   :  { %5981 = vpow2.f32 %v1947_v60  ;;  %v1928_v36 = vsub.f32 %v7494_v52, %v1917_v30  ;;  %3516 = vmax.xlane.f32.xlu1 %v3515_v2  ;;  %v2986_v44 = vsel %vm1883_vm5, %v7699_v22, -inf  ;;  %v7710_v30 = vadd.f32 %v2949_v54, %v7483_v57 }
 0x52d   :  { %1976 = vadd.xlane.f32.xlu0 %v1975_v50  ;;  %v3478_v54 = vmul.f32 0.35355338, %v7642_v27 }
 0x52e   :  { %v1949_v10 = vmul.f32 1.442695, %v1928_v36  ;;  %v3459_v13 = vpop.f32.mrb[150].mxu0 }
 0x52f   :  { %v5423_v47 = vpop.f32.mrb[151].mxu0 }
 0x530   :  { %5983 = vpow2.f32 %v1949_v10  ;;  %v2950_v47 = vmul.f32 0.35355338, %v7634_v7  ;;  %v2989_v10 = vsel %vm1883_vm5, %v7710_v30, -inf  ;;  %v3480_v7 = vmul.f32 0.35355338, %v7659_v8 }
 0x531   :  { %2987 = vmax.xlane.f32.xlu0 %v2986_v44 }
 0x532   :  { %v3464_v24 = vpop.f32.mrb[152].mxu0 }
 0x533   :  { %v5426_v0 = vpop.f32.mrb[153].mxu0 }
 0x534   :  { %v7720_v0 = vadd.f32 %v2950_v47, %v7491_v39  ;;  %v3482_v47 = vmul.f32 0.35355338, %v3444_v51 }
 0x536   :  { %v7707_v60 = vpop.eup %5981  ;;  %v3469_v52 = vpop.f32.mrb[154].mxu0  ;;  %v7737_v59 = vadd.f32 %v3482_v47, %v7405_v9  ;;  %v3486_v47 = vmul.f32 0.35355338, %v3464_v24 }
 0x537   :  { %v5429_v2 = vpop.f32.mrb[155].mxu0  ;;  %v1978_v36 = vsel %vm1883_vm5, %v7707_v60, 0.0 }
 0x538   :  { %1979 = vadd.xlane.f32.xlu0 %v1978_v36  ;;  %v7726_v36 = vadd.f32 %v3478_v54, %v7342_v20  ;;  %v3512_v51 = vsel %vm1883_vm5, %v7737_v59, -inf }
 0x53a   :  { %v3474_v50 = vpop.f32.mrb[156].mxu0  ;;  %v7717_v1 = vpop.eup %5983  ;;  %v3500_v27 = vsel %vm1883_vm5, %v7726_v36, -inf }
 0x53b   :  { %v5432_v44 = vpop.f32.mrb[157].mxu0  ;;  %v1981_v2 = vsel %vm1914_vm7, %v7717_v1, 0.0 }
 0x53c   :  { %2990 = vmax.xlane.f32.xlu0 %v2989_v10  ;;  %v2992_v44 = vsel %vm1914_vm7, %v7720_v0, -inf  ;;  %v7732_v10 = vadd.f32 %v3480_v7, %v7374_v4  ;;  %v3485_v4 = vmul.f32 0.35355338, %v3459_v13 }
 0x53e   :  { %v3506_v20 = vsel %vm1883_vm5, %v7732_v10, -inf  ;;  %v7749_v9 = vadd.f32 %v3485_v4, %v7445_v48 }
 0x540   :  { %1982 = vadd.xlane.f32.xlu0 %v1981_v2  ;;  %v3484_v2 = vmul.f32 0.35355338, %v3454_v35 }
 0x544   :  { %2993 = vmax.xlane.f32.xlu0 %v2992_v44  ;;  %v7743_v44 = vadd.f32 %v3484_v2, %v7433_v25  ;;  %v7755_v2 = vadd.f32 %v3486_v47, %v7461_v6 }
 0x548   :  { %3501 = vmax.xlane.f32.xlu0 %v3500_v27 }
 0x54c   :  { %3507 = vmax.xlane.f32.xlu0 %v3506_v20 }
 0x54d   :  { %v2426_v8 = vpop.xlane.xlu0 %2425 }
 0x54e   :  { %v2457_v54 = vsub.f32 %v7507_v63, %v2426_v8  ;;  %v3518_v63 = vsel %vm1883_vm5, %v7743_v44, -inf  ;;  %v3487_v8 = vmul.f32 0.35355338, %v3469_v52 }
 0x550   :  { %v2468_v7 = vmul.f32 1.442695, %v2457_v54  ;;  %3513 = vmax.xlane.f32.xlu0 %v3512_v51  ;;  %v7761_v4 = vadd.f32 %v3487_v8, %v7483_v57  ;;  %v3488_v51 = vmul.f32 0.35355338, %v3474_v50 }
 0x551   :  { %v2429_v27 = vpop.xlane.xlu1 %2428 }
 0x552   :  { %5985 = vpow2.f32 %v2468_v7  ;;  %v2458_v35 = vsub.f32 %v7514_v16, %v2429_v27  ;;  %v3521_v16 = vsel %vm1883_vm5, %v7749_v9, -inf  ;;  %v3527_v57 = vsel %vm1883_vm5, %v7761_v4, -inf }
 0x554   :  { %v2470_v20 = vmul.f32 1.442695, %v2458_v35  ;;  %3519 = vmax.xlane.f32.xlu0 %v3518_v63 }
 0x555   :  { %v2432_v25 = vpop.xlane.xlu0 %2431 }
 0x556   :  { %5987 = vpow2.f32 %v2470_v20  ;;  %v2459_v13 = vsub.f32 %v7521_v28, %v2432_v25  ;;  %v3524_v28 = vsel %vm1883_vm5, %v7755_v2, -inf }
 0x558   :  { %v2472_v54 = vmul.f32 1.442695, %v2459_v13  ;;  %3522 = vmax.xlane.f32.xlu0 %v3521_v16 }
 0x559   :  { %v2435_v48 = vpop.xlane.xlu1 %2434 }
 0x55a   :  { %5989 = vpow2.f32 %v2472_v54  ;;  %v2460_v24 = vsub.f32 %v7526_v32, %v2435_v48  ;;  %v7771_v32 = vadd.f32 %v3488_v51, %v7491_v39 }
 0x55c   :  { %v7765_v7 = vpop.eup %5985  ;;  %v2474_v6 = vmul.f32 1.442695, %v2460_v24  ;;  %3525 = vmax.xlane.f32.xlu0 %v3524_v28 }
 0x55d   :  { %v2438_v52 = vpop.xlane.xlu0 %2437  ;;  %v2490_v27 = vsel %vm1883_vm5, %v7765_v7, 0.0 }
 0x55e   :  { %5991 = vpow2.f32 %v2474_v6  ;;  %v2461_v35 = vsub.f32 %v7533_v15, %v2438_v52  ;;  %2491 = vadd.xlane.f32.xlu1 %v2490_v27  ;;  %v3530_v15 = vsel %vm1914_vm7, %v7771_v32, -inf }
 0x560   :  { %v7775_v50 = vpop.eup %5987  ;;  %v2476_v47 = vmul.f32 1.442695, %v2461_v35  ;;  %3528 = vmax.xlane.f32.xlu0 %v3527_v57 }
 0x561   :  { %v2441_v63 = vpop.xlane.xlu1 %2440  ;;  %v2493_v20 = vsel %vm1883_vm5, %v7775_v50, 0.0 }
 0x562   :  { %5993 = vpow2.f32 %v2476_v47  ;;  %v2462_v25 = vsub.f32 %v7540_v18, %v2441_v63  ;;  %2494 = vadd.xlane.f32.xlu1 %v2493_v20 }
 0x564   :  { %v7782_v39 = vpop.eup %5989  ;;  %v2478_v13 = vmul.f32 1.442695, %v2462_v25  ;;  %3531 = vmax.xlane.f32.xlu0 %v3530_v15 }
 0x565   :  { %v2444_v8 = vpop.xlane.xlu0 %2443  ;;  %v2496_v16 = vsel %vm1883_vm5, %v7782_v39, 0.0 }
 0x566   :  { %5995 = vpow2.f32 %v2478_v13  ;;  %v2463_v54 = vsub.f32 %v7547_v17, %v2444_v8  ;;  %2497 = vadd.xlane.f32.xlu1 %v2496_v16 }
 0x568   :  { %v7787_v48 = vpop.eup %5991  ;;  %v2480_v24 = vmul.f32 1.442695, %v2463_v54 }
 0x569   :  { %v2447_v18 = vpop.xlane.xlu1 %2446  ;;  %v2499_v51 = vsel %vm1883_vm5, %v7787_v48, 0.0 }
 0x56a   :  { %5997 = vpow2.f32 %v2480_v24  ;;  %v2464_v28 = vsub.f32 %v7555_v38, %v2447_v18  ;;  %2500 = vadd.xlane.f32.xlu1 %v2499_v51  ;;  %v5798_v51 = vunpack.i.h.bf16 %v7500_v31 }
 0x56c   :  { %v7792_v6 = vpop.eup %5993  ;;  %v2482_v52 = vmul.f32 1.442695, %v2464_v28  ;;  %v5797_v28 = vunpack.i.l.bf16 %v7500_v31 }
 0x56d   :  { %v2450_v27 = vpop.xlane.xlu0 %2449  ;;  %v2502_v35 = vsel %vm1883_vm5, %v7792_v6, 0.0 }
 0x56e   :  { %5999 = vpow2.f32 %v2482_v52  ;;  %v2465_v17 = vsub.f32 %v7561_v5, %v2450_v27  ;;  %2503 = vadd.xlane.f32.xlu1 %v2502_v35 }
 0x570   :  { %v7797_v57 = vpop.eup %5995  ;;  %v2484_v47 = vmul.f32 1.442695, %v2465_v17 }
 0x571   :  { %v2453_v63 = vpop.xlane.xlu1 %2452  ;;  %v2505_v20 = vsel %vm1883_vm5, %v7797_v57, 0.0 }
 0x572   :  { %6001 = vpow2.f32 %v2484_v47  ;;  %v2466_v38 = vsub.f32 %v7567_v45, %v2453_v63  ;;  %2506 = vadd.xlane.f32.xlu1 %v2505_v20  ;;  %v5803_v63 = vunpack.i.h.bf16 %v7325_v58  ;;  %v5802_v20 = vunpack.i.l.bf16 %v7325_v58 }
 0x573   :  { %v5807_v58 = vunpack.i.l.bf16 %v7502_v49 }
 0x574   :  { %v7802_v25 = vpop.eup %5997  ;;  %v2486_v15 = vmul.f32 1.442695, %v2466_v38  ;;  %v5581_v38 = vpack.c.bf16 %v5798_v51, %v5797_v28  ;;  %v5813_v51 = vunpack.i.h.bf16 %v7334_v21 }
 0x575   :  { %v1953_v13 = vpop.xlane.xlu1 %1952  ;;  %v2508_v8 = vsel %vm1883_vm5, %v7802_v25, 0.0 }
 0x576   :  { %6003 = vpow2.f32 %v2486_v15  ;;  %2509 = vadd.xlane.f32.xlu1 %v2508_v8 }
 0x577   :  { %6005 = vrcp.f32 %v1953_v13  ;;  %v8594_v13 = vmov 0.0  }
 0x578   :  { %v7806_v5 = vpop.eup %5999 }
 0x579   :  { %v1956_v16 = vpop.xlane.xlu1 %1955  ;;  %v2511_v54 = vsel %vm1883_vm5, %v7806_v5, 0.0 }
 0x57a   :  { %6007 = vrcp.f32 %v1956_v16  ;;  %2512 = vadd.xlane.f32.xlu1 %v2511_v54  ;;  %v8595_v16 = vmov 0.0|0.0   ;;  %v5808_v54 = vunpack.i.h.bf16 %v7502_v49 }
 0x57c   :  { %v7810_v45 = vpop.eup %6001  ;;  %v5587_v28 = vpack.c.bf16 %v5808_v54, %v5807_v58  ;;  %v7859_v58 = vpop.permute.xlu0 %5860 }
 0x57d   :  { %v7812_v24 = vpop.xlane.xlu1 %2966  ;;  %v2514_v18 = vsel %vm1883_vm5, %v7810_v45, 0.0 }
 0x57e   :  { %2515 = vadd.xlane.f32.xlu0 %v2514_v18 }
 0x580   :  { %v7818_v52 = vpop.eup %6003 }
 0x581   :  { %v6006_v27 = vpop.eup %6005  ;;  %v1959_v35 = vpop.xlane.xlu1 %1958  ;;  %v2517_v17 = vsel %vm1883_vm5, %v7818_v52, 0.0 }
 0x582   :  { %v1995_v47 = vmul.f32 %v6006_v27, %v7574_v37  ;;  %2518 = vadd.xlane.f32.xlu0 %v2517_v17  ;;  %6009 = vrcp.f32 %v1959_v35  ;;  %v5584_v37 = vpack.c.bf16 %v5803_v63, %v5802_v20  ;;  %v5817_v63 = vunpack.i.l.bf16 %v7504_v62 }
 0x584   :  { %v6008_v15 = vpop.eup %6007  ;;  %5126 = vmatmul.mubr.msk.f32.vlgmr.msra.gmra.mrb[70].mxu1 %vm1883_vm5, %v1995_v47  ;;  %v5818_v47 = vunpack.i.h.bf16 %v7504_v62 }
 0x585   :  { %5582 = vmatpush3.bf16.msra.mxu1 %v5581_v38  ;;  %v1962_v31 = vpop.xlane.xlu1 %1961  ;;  %5128 = vmatprep.mubr.msk.f32.mxu1 %vm6166_vm2, %v8594_v13  ;;  %v1996_v8 = vmul.f32 %v6008_v15, %v7580_v46  ;;  %v5812_v46 = vunpack.i.l.bf16 %v7334_v21 }
 0x586   :  { %6011 = vrcp.f32 %v1962_v31  ;;  %5583 = vmatprep.subr.bf16.mxu1 %v8595_v16 }
 0x587   :  { %v5590_v17 = vpack.c.bf16 %v5813_v51, %v5812_v46 }
 0x588   :  { %5129 = vmatmul.mubr.msk.f32.gmra.mrb[72].mxu1 %vm1883_vm5, %v1996_v8 }
 0x589   :  { %5585 = vmatpush3.bf16.msra.mxu1 %v5584_v37  ;;  %v2973_v18 = vpop.xlane.xlu1 %2972  ;;  %5131 = vmatprep.mubr.msk.f32.mxu1 %vm6166_vm2, %v8594_v13 }
 0x58a   :  { %5586 = vmatprep.subr.bf16.mxu1 %v8595_v16 }
 0x58c   :  { %v6010_v27 = vpop.eup %6009 }
 0x58d   :  { %5588 = vmatpush3.bf16.msra.mxu1 %v5587_v28  ;;  %v1965_v35 = vpop.xlane.xlu1 %1964  ;;  %v1997_v49 = vmul.f32 %v6010_v27, %v7593_v42  ;;  %v5593_v42 = vpack.c.bf16 %v5818_v47, %v5817_v63  ;;  %v2998_v27 = vsub.f32 %v7603_v14, %v2973_v18 }
 0x58e   :  { %5589 = vmatprep.subr.bf16.mxu1 %v8595_v16  ;;  %6013 = vrcp.f32 %v1965_v35 }
 0x58f   :  { %5132 = vmatmul.mubr.msk.f32.gmra.mrb[74].mxu1 %vm1883_vm5, %v1997_v49 }
 0x590   :  { %v6012_v20 = vpop.eup %6011  ;;  %5134 = vmatprep.mubr.msk.f32.mxu1 %vm6166_vm2, %v8594_v13 }
 0x591   :  { %5591 = vmatpush3.bf16.msra.mxu1 %v5590_v17  ;;  %v1968_v38 = vpop.xlane.xlu1 %1967  ;;  %v1998_v21 = vmul.f32 %v6012_v20, %v7597_v19 }
 0x592   :  { %6015 = vrcp.f32 %v1968_v38  ;;  %5592 = vmatprep.subr.bf16.mxu1 %v8595_v16 }
 0x593   :  { %5135 = vmatmul.mubr.msk.f32.gmra.mrb[76].mxu1 %vm1883_vm5, %v1998_v21 }
 0x594   :  { %5137 = vmatprep.mubr.msk.f32.mxu1 %vm6166_vm2, %v8594_v13 }
 0x595   :  { %5594 = vmatpush3.bf16.msra.mxu1 %v5593_v42  ;;  %v2979_v15 = vpop.xlane.xlu1 %2978 }
 0x596   :  { %5233 = vmatprep.subr.mxu1 %v8594_v13 }
 0x598   :  { %v6014_v62 = vpop.eup %6013 }
 0x599   :  { %5234 = vmatpush3.msk.msra.mxu1 %vm2071_vm6, %v7542_v11  ;;  %v1971_v31 = vpop.xlane.xlu1 %1970  ;;  %v1999_v19 = vmul.f32 %v6014_v62, %v7610_v53  ;;  %v2996_v11 = vsub.f32 %v7586_v3, %v7812_v24  ;;  %v3012_v3 = vmul.f32 1.442695, %v2998_v27 }
 0x59a   :  { %5615 = vmatprep.subr.bf16.mxu1 %v8595_v16  ;;  %6017 = vrcp.f32 %v1971_v31 }
 0x59b   :  { %5138 = vmatmul.mubr.msk.f32.gmra.mrb[78].mxu1 %vm1883_vm5, %v1999_v19  ;;  %v3008_v28 = vmul.f32 1.442695, %v2996_v11 }
 0x59c   :  { %v6016_v8 = vpop.eup %6015  ;;  %5140 = vmatprep.mubr.msk.f32.mxu1 %vm6166_vm2, %v8594_v13 }
 0x59d   :  { %v1974_v37 = vpop.xlane.xlu1 %1973  ;;  %v2000_v54 = vmul.f32 %v6016_v8, %v7614_v12 }
 0x59e   :  { %6019 = vrcp.f32 %v1974_v37 }
 0x59f   :  { %5141 = vmatmul.mubr.msk.f32.gmra.mrb[80].mxu1 %vm1883_vm5, %v2000_v54 }
 0x5a0   :  { %5143 = vmatprep.mubr.msk.f32.mxu1 %vm6166_vm2, %v8594_v13 }
 0x5a2   :  { %v2456_v53 = vpop.xlane.xlu0 %2455 }
 0x5a3   :  { %v2467_v51 = vsub.f32 %v7639_v26, %v2456_v53 }
 0x5a4   :  { %v6018_v46 = vpop.eup %6017 }
 0x5a5   :  { %v2488_v35 = vmul.f32 1.442695, %v2467_v51  ;;  %v2001_v49 = vmul.f32 %v6018_v46, %v7625_v55 }
 0x5a6   :  { %v2964_v12 = vpop.xlane.xlu0 %2963 }
 0x5a7   :  { %6021 = vpow2.f32 %v2488_v35  ;;  %v2995_v17 = vsub.f32 %v7645_v61, %v2964_v12  ;;  %5144 = vmatmul.mubr.msk.f32.gmra.mrb[82].mxu1 %vm1883_vm5, %v2001_v49  ;;  %v3000_v61 = vsub.f32 %v7617_v23, %v2979_v15 }
 0x5a8   :  { %v6020_v47 = vpop.eup %6019  ;;  %6023 = vpow2.f32 %v3008_v28  ;;  %5146 = vmatprep.mubr.msk.f32.mxu1 %vm6166_vm2, %v8594_v13 }
 0x5a9   :  { %v3006_v24 = vmul.f32 1.442695, %v2995_v17  ;;  %v2002_v26 = vmul.f32 %v6020_v47, %v7631_v33  ;;  %v3016_v33 = vmul.f32 1.442695, %v3000_v61 }
 0x5aa   :  { %v2970_v63 = vpop.xlane.xlu0 %2969 }
 0x5ab   :  { %6025 = vpow2.f32 %v3006_v24  ;;  %v2997_v14 = vsub.f32 %v7652_v40, %v2970_v63  ;;  %5147 = vmatmul.mubr.msk.f32.gmra.mrb[84].mxu1 %vm1883_vm5, %v2002_v26 }
 0x5ac   :  { %6027 = vpow2.f32 %v3012_v3  ;;  %5149 = vmatprep.mubr.msk.f32.mxu1 %vm6166_vm2, %v8594_v13 }
 0x5ad   :  { %v3010_v55 = vmul.f32 1.442695, %v2997_v14 }
 0x5ae   :  { %v2976_v18 = vpop.xlane.xlu0 %2975 }
 0x5af   :  { %6029 = vpow2.f32 %v3010_v55  ;;  %v2999_v20 = vsub.f32 %v7664_v41, %v2976_v18 }
 0x5b1   :  { %v7880_v38 = vpop.eup %6021  ;;  %v3014_v21 = vmul.f32 1.442695, %v2999_v20 }
 0x5b2   :  { %v2982_v42 = vpop.xlane.xlu0 %2981  ;;  %v2520_v40 = vsel %vm1914_vm7, %v7880_v38, 0.0  ;;  %v7884_v62 = vpop.eup %6023 }
 0x5b3   :  { %6031 = vpow2.f32 %v3014_v21  ;;  %v3001_v23 = vsub.f32 %v7669_v56, %v2982_v42  ;;  %2521 = vadd.xlane.f32.xlu0 %v2520_v40  ;;  %v3031_v8 = vsel %vm1883_vm5, %v7884_v62, 0.0 }
 0x5b4   :  { %6033 = vpow2.f32 %v3016_v33 }
 0x5b5   :  { %v7887_v15 = vpop.eup %6025  ;;  %v3018_v31 = vmul.f32 1.442695, %v3001_v23 }
 0x5b6   :  { %v2985_v19 = vpop.xlane.xlu0 %2984  ;;  %v3028_v41 = vsel %vm1883_vm5, %v7887_v15, 0.0  ;;  %v7893_v37 = vpop.eup %6027 }
 0x5b7   :  { %6035 = vpow2.f32 %v3018_v31  ;;  %v3002_v54 = vsub.f32 %v7681_v34, %v2985_v19  ;;  %3029 = vadd.xlane.f32.xlu1 %v3028_v41  ;;  %3032 = vadd.xlane.f32.xlu0 %v3031_v8  ;;  %v3037_v51 = vsel %vm1883_vm5, %v7893_v37, 0.0 }
 0x5b9   :  { %v7896_v56 = vpop.eup %6029  ;;  %v3020_v11 = vmul.f32 1.442695, %v3002_v54 }
 0x5ba   :  { %v1977_v53 = vpop.xlane.xlu0 %1976  ;;  %v3034_v46 = vsel %vm1883_vm5, %v7896_v56, 0.0 }
 0x5bb   :  { %6037 = vpow2.f32 %v3020_v11  ;;  %3038 = vadd.xlane.f32.xlu1 %v3037_v51  ;;  %3035 = vadd.xlane.f32.xlu0 %v3034_v46 }
 0x5bc   :  { %6039 = vrcp.f32 %v1977_v53 }
 0x5bd   :  { %v7902_v28 = vpop.eup %6031 }
 0x5be   :  { %v2988_v27 = vpop.xlane.xlu0 %2987  ;;  %v3040_v34 = vsel %vm1883_vm5, %v7902_v28, 0.0  ;;  %v7906_v35 = vpop.eup %6033 }
 0x5bf   :  { %v3003_v12 = vsub.f32 %v7699_v22, %v2988_v27  ;;  %3041 = vadd.xlane.f32.xlu0 %v3040_v34  ;;  %v3043_v3 = vsel %vm1883_vm5, %v7906_v35, 0.0  ;;  %v8596_v34 = vld [vmem:[#allocation26_spill] sm:$0xff] }
 0x5c1   :  { %v7909_v49 = vpop.eup %6035  ;;  %v3022_v17 = vmul.f32 1.442695, %v3003_v12 }
 0x5c2   :  { %v3046_v47 = vsel %vm1883_vm5, %v7909_v49, 0.0 }
 0x5c3   :  { %6041 = vpow2.f32 %v3022_v17  ;;  %3047 = vadd.xlane.f32.xlu1 %v3046_v47  ;;  %3044 = vadd.xlane.f32.xlu0 %v3043_v3 }
 0x5c5   :  { %v7915_v24 = vpop.eup %6037  ;;  %v1980_v26 = vpop.xlane.xlu0 %1979 }
 0x5c6   :  { %v6040_v63 = vpop.eup %6039  ;;  %6043 = vrcp.f32 %v1980_v26  ;;  %v3049_v22 = vsel %vm1883_vm5, %v7915_v24, 0.0 }
 0x5c7   :  { %3050 = vadd.xlane.f32.xlu0 %v3049_v22  ;;  %v2003_v14 = vmul.f32 %v6040_v63, %v7691_v43  ;;  %v3505_v43 = vpop.xlane.xlu1 %3504 }
 0x5c8   :  { %v3534_v31 = vsub.f32 %v7657_v29, %v3505_v43 }
 0x5c9   :  { %5150 = vmatmul.mubr.msk.f32.gmra.mrb[86].mxu1 %vm1883_vm5, %v2003_v14  ;;  %v2991_v61 = vpop.xlane.xlu0 %2990 }
 0x5ca   :  { %v3004_v55 = vsub.f32 %v7710_v30, %v2991_v61  ;;  %5152 = vmatprep.mubr.msk.f32.mxu1 %vm6166_vm2, %v8594_v13  ;;  %v3546_v11 = vmul.f32 1.442695, %v3534_v31 }
 0x5cc   :  { %v3024_v18 = vmul.f32 1.442695, %v3004_v55 }
 0x5cd   :  { %v7924_v20 = vpop.eup %6041  ;;  %v1983_v33 = vpop.xlane.xlu0 %1982 }
 0x5ce   :  { %6045 = vpow2.f32 %v3024_v18  ;;  %v3052_v21 = vsel %vm1883_vm5, %v7924_v20, 0.0 }
 0x5cf   :  { %6047 = vrcp.f32 %v1983_v33  ;;  %3053 = vadd.xlane.f32.xlu1 %v3052_v21 }
 0x5d0   :  { %v6044_v42 = vpop.eup %6043 }
 0x5d1   :  { %v2994_v40 = vpop.xlane.xlu0 %2993  ;;  %v2004_v23 = vmul.f32 %v6044_v42, %v7707_v60  ;;  %v3511_v60 = vpop.xlane.xlu1 %3510 }
 0x5d2   :  { %v3005_v30 = vsub.f32 %v7720_v0, %v2994_v40  ;;  %v3536_v12 = vsub.f32 %v8596_v34, %v3511_v60 }
 0x5d3   :  { %5153 = vmatmul.mubr.msk.f32.gmra.mrb[88].mxu1 %vm1883_vm5, %v2004_v23 }
 0x5d4   :  { %v3026_v19 = vmul.f32 1.442695, %v3005_v30  ;;  %5155 = vmatprep.mubr.msk.f32.mxu1 %vm6166_vm2, %v8594_v13  ;;  %v3550_v26 = vmul.f32 1.442695, %v3536_v12 }
 0x5d5   :  { %v3502_v41 = vpop.xlane.xlu0 %3501 }
 0x5d6   :  { %6049 = vpow2.f32 %v3026_v19  ;;  %v3533_v8 = vsub.f32 %v7726_v36, %v3502_v41  ;;  %v8597_v19 = vld [vmem:[#allocation19_spill] sm:$0xff] }
 0x5d7   :  { %v5823_v41 = vunpack.i.h.bf16 %v8597_v19 }
 0x5d8   :  { %v7935_v54 = vpop.eup %6045  ;;  %v3544_v53 = vmul.f32 1.442695, %v3533_v8  ;;  %v5822_v8 = vunpack.i.l.bf16 %v8597_v19 }
 0x5d9   :  { %v6048_v51 = vpop.eup %6047  ;;  %v3508_v46 = vpop.xlane.xlu0 %3507  ;;  %v3055_v0 = vsel %vm1883_vm5, %v7935_v54, 0.0 }
 0x5da   :  { %6051 = vpow2.f32 %v3544_v53  ;;  %v3535_v29 = vsub.f32 %v7732_v10, %v3508_v46  ;;  %3056 = vadd.xlane.f32.xlu1 %v3055_v0  ;;  %v2005_v27 = vmul.f32 %v6048_v51, %v7717_v1  ;;  %v5616_v46 = vpack.c.bf16 %v5823_v41, %v5822_v8  ;;  %v8598_v0 = vld [vmem:[#allocation21_spill] sm:$0xff]  ;;  %v8602_v8 = vld [vmem:[#allocation23_spill] sm:$0xff] }
 0x5db   :  { %6053 = vpow2.f32 %v3546_v11 }
 0x5dc   :  { %v3548_v36 = vmul.f32 1.442695, %v3535_v29  ;;  %5156 = vmatmul.mubr.msk.f32.gmra.mrb[90].mxu1 %vm1883_vm5, %v2005_v27  ;;  %v5828_v29 = vunpack.i.h.bf16 %v8598_v0  ;;  %v5827_v27 = vunpack.i.l.bf16 %v8598_v0 }
 0x5dd   :  { %v3514_v17 = vpop.xlane.xlu0 %3513  ;;  %5235 = vmatprep.mubr.msk.f32.mxu1 %vm6166_vm2, %v8594_v13 }
 0x5de   :  { %v3537_v47 = vsub.f32 %v7737_v59, %v3514_v17  ;;  %6055 = vpow2.f32 %v3548_v36  ;;  %v7956_v59 = vpop.xlane.xlu1 %3516  ;;  %v5619_v17 = vpack.c.bf16 %v5828_v29, %v5827_v27 }
 0x5e0   :  { %v7946_v3 = vpop.eup %6049  ;;  %v3552_v10 = vmul.f32 1.442695, %v3537_v47  ;;  %v8599_v47 = vld [vmem:[#allocation22_spill] sm:$0xff] }
 0x5e1   :  { %v3058_v1 = vsel %vm1914_vm7, %v7946_v3, 0.0  ;;  %v7970_v40 = vpop.xlane.xlu0 %3519 }
 0x5e2   :  { %6057 = vpow2.f32 %v3552_v10  ;;  %3059 = vadd.xlane.f32.xlu1 %v3058_v1  ;;  %v5832_v10 = vunpack.i.l.bf16 %v8599_v47 }
 0x5e3   :  { %6059 = vpow2.f32 %v3550_v26  ;;  %v5833_v26 = vunpack.i.h.bf16 %v8599_v47  ;;  %v8604_v47 = vld [vmem:[#allocation25_spill] sm:$0xff] }
 0x5e4   :  { %v7950_v63 = vpop.eup %6051 }
 0x5e5   :  { %v3566_v22 = vsel %vm1883_vm5, %v7950_v63, 0.0  ;;  %v7954_v14 = vpop.eup %6053  ;;  %v7976_v11 = vpop.xlane.xlu0 %3522 }
 0x5e6   :  { %3567 = vadd.xlane.f32.xlu1 %v3566_v22  ;;  %v3569_v61 = vsel %vm1883_vm5, %v7954_v14, 0.0 }
 0x5e8   :  { %v7960_v55 = vpop.eup %6055 }
 0x5e9   :  { %v3572_v21 = vsel %vm1883_vm5, %v7960_v55, 0.0  ;;  %v7984_v12 = vpop.xlane.xlu0 %3525 }
 0x5ea   :  { %3570 = vadd.xlane.f32.xlu1 %v3569_v61 }
 0x5eb   :  { %v2492_v18 = vpop.xlane.xlu1 %2491 }
 0x5ec   :  { %v7962_v33 = vpop.eup %6057  ;;  %6061 = vrcp.f32 %v2492_v18  ;;  %v8600_v18 = vld [vmem:[#allocation20_spill] sm:$0xff] }
 0x5ed   :  { %v3578_v42 = vsel %vm1883_vm5, %v7962_v33, 0.0  ;;  %v7968_v43 = vpop.eup %6059 }
 0x5ee   :  { %3573 = vadd.xlane.f32.xlu1 %v3572_v21  ;;  %3579 = vadd.xlane.f32.xlu0 %v3578_v42  ;;  %v3575_v30 = vsel %vm1883_vm5, %v7968_v43, 0.0  ;;  %v5837_v21 = vunpack.i.l.bf16 %v8600_v18  ;;  %v5622_v42 = vpack.c.bf16 %v5833_v26, %v5832_v10 }
 0x5ef   :  { %v2495_v23 = vpop.xlane.xlu1 %2494 }
 0x5f0   :  { %6063 = vrcp.f32 %v2495_v23  ;;  %v7997_v23 = vpop.xlane.xlu0 %3528 }
 0x5f2   :  { %3576 = vadd.xlane.f32.xlu1 %v3575_v30 }
 0x5f3   :  { %v2498_v31 = vpop.xlane.xlu1 %2497 }
 0x5f4   :  { %6065 = vrcp.f32 %v2498_v31  ;;  %v8601_v31 = vld [vmem:[#allocation17_spill] sm:$0xff]  ;;  %v3532_v0 = vpop.xlane.xlu0 %3531 }
 0x5f6   :  { %v6062_v53 = vpop.eup %6061 }
 0x5f7   :  { %v2534_v51 = vmul.f32 %v6062_v53, %v7765_v7  ;;  %v2501_v60 = vpop.xlane.xlu1 %2500  ;;  %v5843_v53 = vunpack.i.h.bf16 %v8602_v8 }
 0x5f8   :  { %6067 = vrcp.f32 %v2501_v60  ;;  %v8603_v60 = vld [vmem:[#allocation18_spill] sm:$0xff] }
 0x5f9   :  { %5236 = vmatmul.mubr.msk.f32.vlgmr.msra.gmra.mrb[92].mxu1 %vm1883_vm5, %v2534_v51  ;;  %v5842_v51 = vunpack.i.l.bf16 %v8602_v8 }
 0x5fa   :  { %v6064_v34 = vpop.eup %6063  ;;  %5617 = vmatpush3.bf16.msra.mxu1 %v5616_v46  ;;  %5238 = vmatprep.mubr.msk.f32.mxu1 %vm6166_vm2, %v8594_v13 }
 0x5fb   :  { %v2504_v36 = vpop.xlane.xlu1 %2503  ;;  %5618 = vmatprep.subr.bf16.mxu1 %v8595_v16  ;;  %v2535_v7 = vmul.f32 %v6064_v34, %v7775_v50  ;;  %v5838_v50 = vunpack.i.h.bf16 %v8600_v18  ;;  %v5628_v27 = vpack.c.bf16 %v5843_v53, %v5842_v51 }
 0x5fc   :  { %6069 = vrcp.f32 %v2504_v36 }
 0x5fd   :  { %5239 = vmatmul.mubr.msk.f32.gmra.mrb[94].mxu1 %vm1883_vm5, %v2535_v7  ;;  %v5625_v41 = vpack.c.bf16 %v5838_v50, %v5837_v21 }
 0x5fe   :  { %v6066_v1 = vpop.eup %6065  ;;  %5620 = vmatpush3.bf16.msra.mxu1 %v5619_v17  ;;  %5241 = vmatprep.mubr.msk.f32.mxu1 %vm6166_vm2, %v8594_v13  ;;  %v3540_v17 = vsub.f32 %v7749_v9, %v7976_v11  ;;  %v3541_v9 = vsub.f32 %v7755_v2, %v7984_v12 }
 0x5ff   :  { %v2507_v22 = vpop.xlane.xlu1 %2506  ;;  %5621 = vmatprep.subr.bf16.mxu1 %v8595_v16  ;;  %v2536_v61 = vmul.f32 %v6066_v1, %v7782_v39 }
 0x600   :  { %6071 = vrcp.f32 %v2507_v22  ;;  %v3558_v22 = vmul.f32 1.442695, %v3540_v17  ;;  %v3560_v50 = vmul.f32 1.442695, %v3541_v9  ;;  %v8132_v9 = vld [vmem:[%s8535_s7 + $0x38] sm:$0xff] }
 0x601   :  { %5242 = vmatmul.mubr.msk.f32.gmra.mrb[96].mxu1 %vm1883_vm5, %v2536_v61 }
 0x602   :  { %v6068_v30 = vpop.eup %6067  ;;  %5623 = vmatpush3.bf16.msra.mxu1 %v5622_v42  ;;  %5244 = vmatprep.mubr.msk.f32.mxu1 %vm6166_vm2, %v8594_v13 }
 0x603   :  { %5865 = vrot.lane.b32.xlu1 %v8601_v31, %s6174_s3  ;;  %v2510_v19 = vpop.xlane.xlu1 %2509  ;;  %5624 = vmatprep.subr.bf16.mxu1 %v8595_v16  ;;  %v2537_v39 = vmul.f32 %v6068_v30, %v7787_v48 }
 0x604   :  { %6073 = vrcp.f32 %v2510_v19  ;;  %3641 = vrot.lane.b32.xlu0 %v8603_v60, %s6174_s3  ;;  %v8080_v60 = vld [vmem:[%s8535_s7] sm:$0xff] }
 0x605   :  { %5245 = vmatmul.mubr.msk.f32.gmra.mrb[98].mxu1 %vm1883_vm5, %v2537_v39 }
 0x606   :  { %v6070_v46 = vpop.eup %6069  ;;  %5626 = vmatpush3.bf16.msra.mxu1 %v5625_v41  ;;  %5247 = vmatprep.mubr.msk.f32.mxu1 %vm6166_vm2, %v8594_v13 }
 0x607   :  { %v2513_v29 = vpop.xlane.xlu1 %2512  ;;  %5627 = vmatprep.subr.bf16.mxu1 %v8595_v16  ;;  %v2538_v48 = vmul.f32 %v6070_v46, %v7792_v6  ;;  %v8085_v46 = vld [vmem:[%s8535_s7 + $0x8] sm:$0xff] }
 0x608   :  { %6075 = vrcp.f32 %v2513_v29  ;;  %v8092_v29 = vld [vmem:[%s8535_s7 + $0x10] sm:$0xff] }
 0x609   :  { %5248 = vmatmul.mubr.msk.f32.gmra.mrb[100].mxu1 %vm1883_vm5, %v2538_v48  ;;  %v8099_v48 = vld [vmem:[%s8535_s7 + $0x18] sm:$0xff] }
 0x60a   :  { %v6072_v34 = vpop.eup %6071  ;;  %5629 = vmatpush3.bf16.msra.mxu1 %v5628_v27  ;;  %5250 = vmatprep.mubr.msk.f32.mxu1 %vm6166_vm2, %v8594_v13 }
 0x60b   :  { %v2516_v36 = vpop.xlane.xlu0 %2515  ;;  %5343 = vmatprep.subr.mxu1 %v8594_v13  ;;  %v2539_v7 = vmul.f32 %v6072_v34, %v7797_v57  ;;  %v8605_v57 = vld [vmem:[#allocation29_spill] sm:$0xff] }
 0x60c   :  { %6077 = vrcp.f32 %v2516_v36  ;;  %v3538_v1 = vsub.f32 %v8605_v57, %v7956_v59  ;;  %v3543_v59 = vsub.f32 %v7771_v32, %v3532_v0  ;;  %v8106_v36 = vld [vmem:[%s8535_s7 + $0x20] sm:$0xff] }
 0x60d   :  { %5251 = vmatmul.mubr.msk.f32.gmra.mrb[102].mxu1 %vm1883_vm5, %v2539_v7  ;;  %v8113_v7 = vld [vmem:[%s8535_s7 + $0x28] sm:$0xff]  ;;  %v8606_v57 = vld [vmem:[#allocation24_spill] sm:$0xff] }
 0x60e   :  { %v6074_v6 = vpop.eup %6073  ;;  %5344 = vmatpush3.msk.msra.mxu1 %vm2071_vm6, %v8604_v47  ;;  %5253 = vmatprep.mubr.msk.f32.mxu1 %vm6166_vm2, %v8594_v13  ;;  %v3554_v18 = vmul.f32 1.442695, %v3538_v1  ;;  %v3564_v42 = vmul.f32 1.442695, %v3543_v59  ;;  %v5848_v1 = vunpack.i.h.bf16 %v8606_v57 }
 0x60f   :  { %v2519_v26 = vpop.xlane.xlu0 %2518  ;;  %v2540_v10 = vmul.f32 %v6074_v6, %v7802_v25  ;;  %5650 = vmatprep.subr.bf16.mxu1 %v8595_v16  ;;  %v3539_v25 = vsub.f32 %v7743_v44, %v7970_v40  ;;  %v8120_v6 = vld [vmem:[%s8535_s7 + $0x30] sm:$0xff] }
 0x610   :  { %6079 = vrcp.f32 %v2519_v26 }
 0x611   :  { %5254 = vmatmul.mubr.msk.f32.gmra.mrb[104].mxu1 %vm1883_vm5, %v2540_v10  ;;  %6081 = vpow2.f32 %v3558_v22  ;;  %v3556_v12 = vmul.f32 1.442695, %v3539_v25  ;;  %v5847_v22 = vunpack.i.l.bf16 %v8606_v57 }
 0x612   :  { %v6076_v11 = vpop.eup %6075  ;;  %5256 = vmatprep.mubr.msk.f32.mxu1 %vm6166_vm2, %v8594_v13  ;;  %6083 = vpow2.f32 %v3554_v18 }
 0x613   :  { %v2541_v61 = vmul.f32 %v6076_v11, %v7806_v5  ;;  %6085 = vpow2.f32 %v3560_v50  ;;  %v3542_v5 = vsub.f32 %v7761_v4, %v7997_v23  ;;  %v5651_v25 = vpack.c.bf16 %v5848_v1, %v5847_v22  ;;  %v8607_v50 = vld [vmem:[#allocation28_spill] sm:$0xff] }
 0x614   :  { %6087 = vpow2.f32 %v3556_v12  ;;  %v5853_v59 = vunpack.i.h.bf16 %v8607_v50 }
 0x615   :  { %5257 = vmatmul.mubr.msk.f32.gmra.mrb[106].mxu1 %vm1883_vm5, %v2541_v61  ;;  %v3562_v40 = vmul.f32 1.442695, %v3542_v5  ;;  %6089 = vpow2.f32 %v3564_v42 }
 0x616   :  { %v6078_v21 = vpop.eup %6077  ;;  %5259 = vmatprep.mubr.msk.f32.mxu1 %vm6166_vm2, %v8594_v13 }
 0x617   :  { %v2542_v2 = vmul.f32 %v6078_v21, %v7810_v45  ;;  %6091 = vpow2.f32 %v3562_v40  ;;  %v5852_v21 = vunpack.i.l.bf16 %v8607_v50 }
 0x619   :  { %5260 = vmatmul.mubr.msk.f32.gmra.mrb[108].mxu1 %vm1883_vm5, %v2542_v2 }
 0x61a   :  { %v6080_v44 = vpop.eup %6079  ;;  %5262 = vmatprep.mubr.msk.f32.mxu1 %vm6166_vm2, %v8594_v13 }
 0x61b   :  { %v2543_v32 = vmul.f32 %v6080_v44, %v7818_v52  ;;  %v8053_v45 = vpop.eup %6081 }
 0x61c   :  { %v8055_v4 = vpop.eup %6083  ;;  %v3587_v23 = vsel %vm1883_vm5, %v8053_v45, 0.0 }
 0x61d   :  { %5263 = vmatmul.mubr.msk.f32.gmra.mrb[110].mxu1 %vm1883_vm5, %v2543_v32  ;;  %v8059_v30 = vpop.eup %6085  ;;  %v3581_v31 = vsel %vm1883_vm5, %v8055_v4, 0.0  ;;  %v5654_v32 = vpack.c.bf16 %v5853_v59, %v5852_v21 }
 0x61e   :  { %5265 = vmatprep.mubr.msk.f32.mxu1 %vm6166_vm2, %v8594_v13  ;;  %v8061_v52 = vpop.eup %6087  ;;  %v3590_v19 = vsel %vm1883_vm5, %v8059_v30, 0.0 }
 0x61f   :  { %v8067_v39 = vpop.eup %6089  ;;  %v3584_v41 = vsel %vm1883_vm5, %v8061_v52, 0.0 }
 0x620   :  { %v3596_v8 = vsel %vm1914_vm7, %v8067_v39, 0.0 }
 0x621   :  { %v8073_v53 = vpop.eup %6091 }
 0x622   :  { %v3593_v51 = vsel %vm1883_vm5, %v8073_v53, 0.0 }
 0x623   :  { %3588 = vadd.xlane.f32.xlu0 %v3587_v23 }
 0x627   :  { %3582 = vadd.xlane.f32.xlu1 %v3581_v31  ;;  %3591 = vadd.xlane.f32.xlu0 %v3590_v19 }
 0x62b   :  { %3585 = vadd.xlane.f32.xlu1 %v3584_v41  ;;  %3597 = vadd.xlane.f32.xlu0 %v3596_v8  ;;  %v5863_v8 = vunpack.i.h.bf16 %v7859_v58 }
 0x62f   :  { %3594 = vadd.xlane.f32.xlu1 %v3593_v51  ;;  %v5862_v51 = vunpack.i.l.bf16 %v7859_v58 }
 0x640   :  { %v2522_v0 = vpop.xlane.xlu0 %2521  ;;  %4082 = vrot.lane.b32.xlu1 %v8080_v60, %s6171_s29 }
 0x641   :  { %6093 = vrcp.f32 %v2522_v0  ;;  %4084 = vrot.lane.b32.xlu0 %v8085_v46, %s6171_s29 }
 0x644   :  { %v3030_v27 = vpop.xlane.xlu1 %3029  ;;  %v3033_v34 = vpop.xlane.xlu0 %3032  ;;  %4086 = vrot.lane.b32.xlu1 %v8092_v29, %s6171_s29 }
 0x645   :  { %6095 = vrcp.f32 %v3030_v27  ;;  %4088 = vrot.lane.b32.xlu0 %v8099_v48, %s6171_s29 }
 0x646   :  { %6097 = vrcp.f32 %v3033_v34 }
 0x648   :  { %v3036_v17 = vpop.xlane.xlu0 %3035  ;;  %4090 = vrot.lane.b32.xlu1 %v8106_v36, %s6171_s29  ;;  %v3039_v26 = vpop.xlane.xlu1 %3038 }
 0x649   :  { %4092 = vrot.lane.b32.xlu0 %v8113_v7, %s6171_s29  ;;  %6099 = vrcp.f32 %v3036_v17 }
 0x64a   :  { %6101 = vrcp.f32 %v3039_v26 }
 0x64b   :  { %v6094_v47 = vpop.eup %6093 }
 0x64c   :  { %v2544_v10 = vmul.f32 %v6094_v47, %v7880_v38  ;;  %4094 = vrot.lane.b32.xlu1 %v8120_v6, %s6171_s29  ;;  %v3042_v11 = vpop.xlane.xlu0 %3041  ;;  %v5660_v47 = vpack.c.bf16 %v5863_v8, %v5862_v51 }
 0x64d   :  { %4096 = vrot.lane.b32.xlu0 %v8132_v9, %s6171_s29  ;;  %6103 = vrcp.f32 %v3042_v11 }
 0x64e   :  { %5266 = vmatmul.mubr.msk.f32.gmra.mrb[112].mxu1 %vm1883_vm5, %v2544_v10 }
 0x64f   :  { %v6096_v61 = vpop.eup %6095  ;;  %5345 = vmatprep.mubr.msk.f32.mxu1 %vm6166_vm2, %v8594_v13 }
 0x650   :  { %v3072_v38 = vmul.f32 %v6096_v61, %v7887_v15  ;;  %v6098_v18 = vpop.eup %6097  ;;  %v3045_v2 = vpop.xlane.xlu0 %3044  ;;  %v8608_v15 = vld [vmem:[#allocation27_spill] sm:$0xff] }
 0x651   :  { %v3073_v12 = vmul.f32 %v6098_v18, %v7884_v62  ;;  %v5858_v42 = vunpack.i.h.bf16 %v8608_v15  ;;  %v5857_v44 = vunpack.i.l.bf16 %v8608_v15  ;;  %6105 = vrcp.f32 %v3045_v2  ;;  %v3048_v23 = vpop.xlane.xlu1 %3047 }
 0x652   :  { %5346 = vmatmul.mubr.msk.f32.vlgmr.msra.gmra.mrb[114].mxu1 %vm1883_vm5, %v3072_v38  ;;  %6107 = vrcp.f32 %v3048_v23 }
 0x653   :  { %5652 = vmatpush3.bf16.msra.mxu1 %v5651_v25  ;;  %5348 = vmatprep.mubr.msk.f32.mxu1 %vm6166_vm2, %v8594_v13  ;;  %v6100_v5 = vpop.eup %6099  ;;  %v5657_v41 = vpack.c.bf16 %v5858_v42, %v5857_v44 }
 0x654   :  { %5653 = vmatprep.subr.bf16.mxu1 %v8595_v16  ;;  %v3074_v62 = vmul.f32 %v6100_v5, %v7896_v56  ;;  %v6102_v19 = vpop.eup %6101  ;;  %v3051_v27 = vpop.xlane.xlu0 %3050 }
 0x655   :  { %v3075_v56 = vmul.f32 %v6102_v19, %v7893_v37  ;;  %6109 = vrcp.f32 %v3051_v27 }
 0x656   :  { %5349 = vmatmul.mubr.msk.f32.gmra.mrb[116].mxu1 %vm1883_vm5, %v3073_v12 }
 0x657   :  { %v8150_v40 = vpop.f32.mrb[70].mxu1  ;;  %5655 = vmatpush3.bf16.msra.mxu1 %v5654_v32  ;;  %5351 = vmatprep.mubr.msk.f32.mxu1 %vm6166_vm2, %v8594_v13  ;;  %v6104_v17 = vpop.eup %6103 }
 0x658   :  { %v5127_v31 = vpop.f32.mrb[71].mxu1  ;;  %5656 = vmatprep.subr.bf16.mxu1 %v8595_v16  ;;  %v3076_v26 = vmul.f32 %v6104_v17, %v7902_v28 }
 0x65a   :  { %5352 = vmatmul.mubr.msk.f32.gmra.mrb[118].mxu1 %vm1883_vm5, %v3074_v62 }
 0x65b   :  { %v8159_v0 = vpop.f32.mrb[72].mxu1  ;;  %5658 = vmatpush3.bf16.msra.mxu1 %v5657_v41  ;;  %5354 = vmatprep.mubr.msk.f32.mxu1 %vm6166_vm2, %v8594_v13  ;;  %v6106_v10 = vpop.eup %6105 }
 0x65c   :  { %v5130_v34 = vpop.f32.mrb[73].mxu1  ;;  %5659 = vmatprep.subr.bf16.mxu1 %v8595_v16  ;;  %v3054_v58 = vpop.xlane.xlu1 %3053  ;;  %v3077_v1 = vmul.f32 %v6106_v10, %v7906_v35 }
 0x65d   :  { %6111 = vrcp.f32 %v3054_v58  ;;  %v6108_v22 = vpop.eup %6107 }
 0x65e   :  { %5355 = vmatmul.mubr.msk.f32.gmra.mrb[120].mxu1 %vm1883_vm5, %v3075_v56  ;;  %v3078_v38 = vmul.f32 %v6108_v22, %v7909_v49 }
 0x65f   :  { %5661 = vmatpush3.bf16.msra.mxu1 %v5660_v47  ;;  %5357 = vmatprep.mubr.msk.f32.mxu1 %vm6166_vm2, %v8594_v13  ;;  %v6110_v18 = vpop.eup %6109 }
 0x660   :  { %5662 = vmatprep.subr.bf16.mxu1 %v8595_v16  ;;  %v3079_v35 = vmul.f32 %v6110_v18, %v7915_v24 }
 0x662   :  { %5358 = vmatmul.mubr.msk.f32.gmra.mrb[122].mxu1 %vm1883_vm5, %v3076_v26  ;;  %v8171_v57 = vpop.f32.mrb[74].mxu1 }
 0x663   :  { %5360 = vmatprep.mubr.msk.f32.mxu1 %vm6166_vm2, %v8594_v13  ;;  %v5133_v37 = vpop.f32.mrb[75].mxu1 }
 0x666   :  { %5361 = vmatmul.mubr.msk.f32.gmra.mrb[124].mxu1 %vm1883_vm5, %v3077_v1  ;;  %v8177_v11 = vpop.f32.mrb[76].mxu1 }
 0x667   :  { %v3057_v28 = vpop.xlane.xlu1 %3056  ;;  %5363 = vmatprep.mubr.msk.f32.mxu1 %vm6166_vm2, %v8594_v13  ;;  %v5136_v61 = vpop.f32.mrb[77].mxu1 }
 0x668   :  { %6113 = vrcp.f32 %v3057_v28  ;;  %v6112_v25 = vpop.eup %6111 }
 0x669   :  { %v3080_v49 = vmul.f32 %v6112_v25, %v7924_v20 }
 0x66a   :  { %5364 = vmatmul.mubr.msk.f32.gmra.mrb[126].mxu1 %vm1883_vm5, %v3078_v38 }
 0x66b   :  { %5366 = vmatprep.mubr.msk.f32.mxu1 %vm6166_vm2, %v8594_v13 }
 0x66e   :  { %5367 = vmatmul.mubr.msk.f32.gmra.mrb[128].mxu1 %vm1883_vm5, %v3079_v35  ;;  %v8187_v50 = vpop.f32.mrb[78].mxu1 }
 0x66f   :  { %v3060_v59 = vpop.xlane.xlu1 %3059  ;;  %5369 = vmatprep.mubr.msk.f32.mxu1 %vm6166_vm2, %v8594_v13  ;;  %v5139_v21 = vpop.f32.mrb[79].mxu1 }
 0x670   :  { %6115 = vrcp.f32 %v3060_v59 }
 0x672   :  { %v6114_v2 = vpop.eup %6113  ;;  %5370 = vmatmul.mubr.msk.f32.gmra.mrb[130].mxu1 %vm1883_vm5, %v3080_v49  ;;  %v8193_v12 = vpop.f32.mrb[80].mxu1 }
 0x673   :  { %v3568_v5 = vpop.xlane.xlu1 %3567  ;;  %5372 = vmatprep.mubr.msk.f32.mxu1 %vm6166_vm2, %v8594_v13  ;;  %v3081_v24 = vmul.f32 %v6114_v2, %v7935_v54  ;;  %v5142_v15 = vpop.f32.mrb[81].mxu1 }
 0x674   :  { %6117 = vrcp.f32 %v3568_v5 }
 0x676   :  { %5373 = vmatmul.mubr.msk.f32.gmra.mrb[132].mxu1 %vm1883_vm5, %v3081_v24 }
 0x677   :  { %v3571_v42 = vpop.xlane.xlu1 %3570  ;;  %5375 = vmatprep.mubr.msk.f32.mxu1 %vm6166_vm2, %v8594_v13 }
 0x678   :  { %6119 = vrcp.f32 %v3571_v42 }
 0x67a   :  { %v6116_v44 = vpop.eup %6115  ;;  %v8201_v20 = vpop.f32.mrb[82].mxu1 }
 0x67b   :  { %v3574_v32 = vpop.xlane.xlu1 %3573  ;;  %v3082_v23 = vmul.f32 %v6116_v44, %v7946_v3  ;;  %v5145_v31 = vpop.f32.mrb[83].mxu1 }
 0x67c   :  { %v3580_v27 = vpop.xlane.xlu0 %3579  ;;  %6121 = vrcp.f32 %v3574_v32 }
 0x67d   :  { %5376 = vmatmul.mubr.msk.f32.gmra.mrb[134].mxu1 %vm1883_vm5, %v3082_v23 }
 0x67e   :  { %5455 = vmatprep.mubr.msk.f32.mxu1 %vm6166_vm2, %v8594_v13  ;;  %v8207_v54 = vpop.f32.mrb[84].mxu1  ;;  %v6118_v56 = vpop.eup %6117 }
 0x67f   :  { %v3577_v62 = vpop.xlane.xlu1 %3576  ;;  %v5148_v19 = vpop.f32.mrb[85].mxu1  ;;  %v3610_v3 = vmul.f32 %v6118_v56, %v7950_v63 }
 0x680   :  { %6123 = vrcp.f32 %v3577_v62  ;;  %v3642_v17 = vpop.permute.xlu0 %3641 }
 0x681   :  { %6125 = vrcp.f32 %v3580_v27 }
 0x682   :  { %v6120_v47 = vpop.eup %6119 }
 0x683   :  { %v5866_v41 = vpop.permute.xlu1 %5865  ;;  %v3611_v58 = vmul.f32 %v6120_v47, %v7954_v14 }
 0x684   :  { %v5868_v8 = vunpack.i.h.bf16 %v5866_v41  ;;  %v5867_v51 = vunpack.i.l.bf16 %v5866_v41 }
 0x686   :  { %v5663_v34 = vpack.c.bf16 %v5868_v8, %v5867_v51  ;;  %v6122_v26 = vpop.eup %6121 }
 0x687   :  { %v3612_v63 = vmul.f32 %v6122_v26, %v7960_v55 }
 0x688   :  { %5664 = vmatpush3.bf16.msra.mxu1 %v5663_v34 }
 0x689   :  { %5453 = vmatprep.subr.mxu1 %v8594_v13 }
 0x68a   :  { %v6124_v10 = vpop.eup %6123 }
 0x68b   :  { %v3613_v37 = vmul.f32 %v6124_v10, %v7968_v43  ;;  %v6126_v1 = vpop.eup %6125 }
 0x68c   :  { %5454 = vmatpush3.msk.msra.mxu1 %vm2071_vm6, %v3642_v17  ;;  %v3614_v14 = vmul.f32 %v6126_v1, %v7962_v33 }
 0x68d   :  { %5456 = vmatmul.mubr.msk.f32.vlgmr.msra.gmra.mrb[136].mxu1 %vm1883_vm5, %v3610_v3 }
 0x68e   :  { %5458 = vmatprep.mubr.msk.f32.mxu1 %vm6166_vm2, %v8594_v13 }
 0x691   :  { %5459 = vmatmul.mubr.msk.f32.gmra.mrb[138].mxu1 %vm1883_vm5, %v3611_v58 }
 0x692   :  { %5461 = vmatprep.mubr.msk.f32.mxu1 %vm6166_vm2, %v8594_v13 }
 0x695   :  { %5462 = vmatmul.mubr.msk.f32.gmra.mrb[140].mxu1 %vm1883_vm5, %v3612_v63 }
 0x696   :  { %5464 = vmatprep.mubr.msk.f32.mxu1 %vm6166_vm2, %v8594_v13 }
 0x699   :  { %5465 = vmatmul.mubr.msk.f32.gmra.mrb[142].mxu1 %vm1883_vm5, %v3613_v37 }
 0x69a   :  { %5467 = vmatprep.mubr.msk.f32.mxu1 %vm6166_vm2, %v8594_v13 }
 0x69c   :  { %v8228_v22 = vpop.f32.mrb[86].mxu1 }
 0x69d   :  { %v5151_v28 = vpop.f32.mrb[87].mxu1  ;;  %5468 = vmatmul.mubr.msk.f32.gmra.mrb[144].mxu1 %vm1883_vm5, %v3614_v14 }
 0x69e   :  { %5470 = vmatprep.mubr.msk.f32.mxu1 %vm6166_vm2, %v8594_v13 }
 0x6a6   :  { %v8233_v55 = vpop.f32.mrb[88].mxu1 }
 0x6a7   :  { %v5154_v61 = vpop.f32.mrb[89].mxu1 }
 0x6af   :  { %v8235_v43 = vpop.f32.mrb[90].mxu1 }
 0x6b0   :  { %v5157_v38 = vpop.f32.mrb[91].mxu1  ;;  %v3589_v35 = vpop.xlane.xlu0 %3588 }
 0x6b4   :  { %v3583_v18 = vpop.xlane.xlu1 %3582  ;;  %v3592_v33 = vpop.xlane.xlu0 %3591 }
 0x6b5   :  { %6127 = vrcp.f32 %v3583_v18 }
 0x6b8   :  { %v3586_v25 = vpop.xlane.xlu1 %3585  ;;  %v3598_v5 = vpop.xlane.xlu0 %3597 }
 0x6b9   :  { %6129 = vrcp.f32 %v3586_v25 }
 0x6ba   :  { %6131 = vrcp.f32 %v3589_v35 }
 0x6bb   :  { %6133 = vrcp.f32 %v3592_v33 }
 0x6bc   :  { %v3595_v21 = vpop.xlane.xlu1 %3594 }
 0x6bd   :  { %6135 = vrcp.f32 %v3595_v21  ;;  %v8274_v21 = vpop.permute.xlu0 %4084 }
 0x6be   :  { %6137 = vrcp.f32 %v3598_v5 }
 0x6bf   :  { %v6128_v59 = vpop.eup %6127 }
 0x6c0   :  { %v3615_v49 = vmul.f32 %v6128_v59, %v8055_v4 }
 0x6c2   :  { %5471 = vmatmul.mubr.msk.f32.gmra.mrb[146].mxu1 %vm1883_vm5, %v3615_v49  ;;  %v8276_v49 = vpop.permute.xlu1 %4082 }
 0x6c3   :  { %v6130_v2 = vpop.eup %6129  ;;  %5473 = vmatprep.mubr.msk.f32.mxu1 %vm6166_vm2, %v8594_v13 }
 0x6c4   :  { %v3616_v24 = vmul.f32 %v6130_v2, %v8061_v52  ;;  %v6132_v15 = vpop.eup %6131 }
 0x6c5   :  { %v3617_v42 = vmul.f32 %v6132_v15, %v8053_v45  ;;  %v6134_v4 = vpop.eup %6133 }
 0x6c6   :  { %5474 = vmatmul.mubr.msk.f32.gmra.mrb[148].mxu1 %vm1883_vm5, %v3616_v24  ;;  %v3618_v32 = vmul.f32 %v6134_v4, %v8059_v30  ;;  %v8279_v24 = vpop.permute.xlu0 %4088  ;;  %v8281_v15 = vpop.permute.xlu1 %4086 }
 0x6c7   :  { %5476 = vmatprep.mubr.msk.f32.mxu1 %vm6166_vm2, %v8594_v13  ;;  %v6136_v23 = vpop.eup %6135 }
 0x6c8   :  { %v3619_v31 = vmul.f32 %v6136_v23, %v8073_v53  ;;  %v6138_v62 = vpop.eup %6137 }
 0x6c9   :  { %v3620_v41 = vmul.f32 %v6138_v62, %v8067_v39 }
 0x6ca   :  { %5477 = vmatmul.mubr.msk.f32.gmra.mrb[150].mxu1 %vm1883_vm5, %v3617_v42 }
 0x6cb   :  { %5479 = vmatprep.mubr.msk.f32.mxu1 %vm6166_vm2, %v8594_v13 }
 0x6cc   :  { %v2678_v44 = vpop.f32.mrb[92].mxu1 }
 0x6cd   :  { %v5237_v52 = vpop.f32.mrb[93].mxu1  ;;  %3819 = vrot.lane.b32.xlu1 %v2678_v44, %s6175_s4 }
 0x6ce   :  { %5480 = vmatmul.mubr.msk.f32.gmra.mrb[152].mxu1 %vm1883_vm5, %v3618_v32  ;;  %v8284_v32 = vpop.permute.xlu0 %4092  ;;  %v8287_v52 = vpop.permute.xlu1 %4090 }
 0x6cf   :  { %5482 = vmatprep.mubr.msk.f32.mxu1 %vm6166_vm2, %v8594_v13 }
 0x6d0   :  { %v2683_v45 = vpop.f32.mrb[94].mxu1 }
 0x6d1   :  { %v5240_v19 = vpop.f32.mrb[95].mxu1  ;;  %3821 = vrot.lane.b32.xlu0 %v2683_v45, %s6175_s4 }
 0x6d2   :  { %5483 = vmatmul.mubr.msk.f32.gmra.mrb[154].mxu1 %vm1883_vm5, %v3619_v31  ;;  %v8290_v62 = vpop.permute.xlu0 %4096  ;;  %v8292_v19 = vpop.permute.xlu1 %4094 }
 0x6d3   :  { %5485 = vmatprep.mubr.msk.f32.mxu1 %vm6166_vm2, %v8594_v13 }
 0x6d4   :  { %v2688_v30 = vpop.f32.mrb[96].mxu1 }
 0x6d5   :  { %v5243_v8 = vpop.f32.mrb[97].mxu1  ;;  %3823 = vrot.lane.b32.xlu1 %v2688_v30, %s6175_s4 }
 0x6d6   :  { %5486 = vmatmul.mubr.msk.f32.gmra.mrb[156].mxu1 %vm1883_vm5, %v3620_v41 }
 0x6d8   :  { %v2693_v51 = vpop.f32.mrb[98].mxu1 }
 0x6d9   :  { %v5246_v27 = vpop.f32.mrb[99].mxu1  ;;  %3825 = vrot.lane.b32.xlu0 %v2693_v51, %s6175_s4 }
 0x6dc   :  { %v2698_v53 = vpop.f32.mrb[100].mxu1 }
 0x6dd   :  { %v5249_v34 = vpop.f32.mrb[101].mxu1  ;;  %3827 = vrot.lane.b32.xlu1 %v2698_v53, %s6175_s4 }
 0x6e0   :  { %v2703_v56 = vpop.f32.mrb[102].mxu1 }
 0x6e1   :  { %v5252_v3 = vpop.f32.mrb[103].mxu1  ;;  %3829 = vrot.lane.b32.xlu0 %v2703_v56, %s6175_s4 }
 0x6e4   :  { %v2708_v17 = vpop.f32.mrb[104].mxu1 }
 0x6e5   :  { %v5255_v47 = vpop.f32.mrb[105].mxu1  ;;  %3831 = vrot.lane.b32.xlu1 %v2708_v17, %s6175_s4 }
 0x6e8   :  { %v2713_v39 = vpop.f32.mrb[106].mxu1 }
 0x6e9   :  { %v5258_v58 = vpop.f32.mrb[107].mxu1  ;;  %3833 = vrot.lane.b32.xlu0 %v2713_v39, %s6175_s4 }
 0x6ec   :  { %v2718_v26 = vpop.f32.mrb[108].mxu1 }
 0x6ed   :  { %3835 = vrot.lane.b32.xlu1 %v2718_v26, %s6175_s4  ;;  %v5261_v63 = vpop.f32.mrb[109].mxu1 }
 0x6f0   :  { %v2723_v10 = vpop.f32.mrb[110].mxu1 }
 0x6f1   :  { %3837 = vrot.lane.b32.xlu0 %v2723_v10, %s6175_s4  ;;  %v5264_v37 = vpop.f32.mrb[111].mxu1 }
 0x721   :  { %v2728_v1 = vpop.f32.mrb[112].mxu1 }
 0x722   :  { %3839 = vrot.lane.b32.xlu1 %v2728_v1, %s6175_s4  ;;  %v5267_v14 = vpop.f32.mrb[113].mxu1 }
 0x725   :  { %v3216_v28 = vpop.f32.mrb[114].mxu1 }
 0x726   :  { %3863 = vrot.lane.b32.xlu1 %v3216_v28, %s6176_s21  ;;  %v5347_v61 = vpop.f32.mrb[115].mxu1 }
 0x729   :  { %v3221_v38 = vpop.f32.mrb[116].mxu1 }
 0x72a   :  { %3865 = vrot.lane.b32.xlu1 %v3221_v38, %s6176_s21  ;;  %v5350_v18 = vpop.f32.mrb[117].mxu1 }
 0x72d   :  { %v3226_v35 = vpop.f32.mrb[118].mxu1 }
 0x72e   :  { %3867 = vrot.lane.b32.xlu1 %v3226_v35, %s6176_s21  ;;  %v5353_v25 = vpop.f32.mrb[119].mxu1 }
 0x731   :  { %v3231_v33 = vpop.f32.mrb[120].mxu1 }
 0x732   :  { %3869 = vrot.lane.b32.xlu0 %v3231_v33, %s6176_s21  ;;  %v5356_v59 = vpop.f32.mrb[121].mxu1 }
 0x735   :  { %v3236_v2 = vpop.f32.mrb[122].mxu1 }
 0x736   :  { %3871 = vrot.lane.b32.xlu1 %v3236_v2, %s6176_s21  ;;  %v5359_v5 = vpop.f32.mrb[123].mxu1 }
 0x739   :  { %v3241_v42 = vpop.f32.mrb[124].mxu1 }
 0x73a   :  { %3873 = vrot.lane.b32.xlu0 %v3241_v42, %s6176_s21  ;;  %v5362_v4 = vpop.f32.mrb[125].mxu1 }
 0x73d   :  { %v3246_v44 = vpop.f32.mrb[126].mxu1 }
 0x73e   :  { %3875 = vrot.lane.b32.xlu1 %v3246_v44, %s6176_s21  ;;  %v5365_v23 = vpop.f32.mrb[127].mxu1 }
 0x73f   :  { %v8296_v27 = vpop.permute.xlu1 %3819 }
 0x741   :  { %v3251_v45 = vpop.f32.mrb[128].mxu1 }
 0x742   :  { %3877 = vrot.lane.b32.xlu0 %v3251_v45, %s6176_s21  ;;  %v5368_v31 = vpop.f32.mrb[129].mxu1 }
 0x743   :  { %v8298_v53 = vpop.permute.xlu0 %3821 }
 0x745   :  { %v3256_v30 = vpop.f32.mrb[130].mxu1 }
 0x746   :  { %3879 = vrot.lane.b32.xlu1 %v3256_v30, %s6176_s21  ;;  %v5371_v41 = vpop.f32.mrb[131].mxu1 }
 0x747   :  { %v8300_v34 = vpop.permute.xlu1 %3823 }
 0x749   :  { %v3261_v8 = vpop.f32.mrb[132].mxu1 }
 0x74a   :  { %3881 = vrot.lane.b32.xlu0 %v3261_v8, %s6176_s21  ;;  %v5374_v51 = vpop.f32.mrb[133].mxu1 }
 0x74b   :  { %v8302_v56 = vpop.permute.xlu0 %3825 }
 0x74f   :  { %v8305_v47 = vpop.permute.xlu1 %3827 }
 0x750   :  { %v3266_v3 = vpop.f32.mrb[134].mxu1 }
 0x751   :  { %3883 = vrot.lane.b32.xlu0 %v3266_v3, %s6176_s21  ;;  %v5377_v17 = vpop.f32.mrb[135].mxu1  ;;  %v8332_v3 = vld [vmem:[%s8535_s7 + $0x40] sm:$0xff] }
 0x753   :  { %v3830_v39 = vpop.permute.xlu0 %3829 }
 0x754   :  { %v3945_v58 = vsel %vm1674_vm3, %v8193_v12, %v3830_v39 }
 0x757   :  { %v3832_v26 = vpop.permute.xlu1 %3831 }
 0x758   :  { %v3946_v63 = vsel %vm1674_vm3, %v8201_v20, %v3832_v26 }
 0x75b   :  { %v3834_v10 = vpop.permute.xlu0 %3833 }
 0x75c   :  { %v3947_v37 = vsel %vm1674_vm3, %v8207_v54, %v3834_v10 }
 0x75f   :  { %v3836_v1 = vpop.permute.xlu1 %3835 }
 0x760   :  { %v3948_v14 = vsel %vm1674_vm3, %v8228_v22, %v3836_v1  ;;  %v3754_v28 = vpop.f32.mrb[136].mxu1  ;;  %v8340_v1 = vld [vmem:[%s8535_s7 + $0x48] sm:$0xff] }
 0x761   :  { %3907 = vrot.lane.b32.xlu1 %v3754_v28, %s6177_s22  ;;  %v5457_v61 = vpop.f32.mrb[137].mxu1  ;;  %v8345_v28 = vld [vmem:[%s8535_s7 + $0x50] sm:$0x3] }
 0x763   :  { %v3838_v38 = vpop.permute.xlu0 %3837 }
 0x764   :  { %v3949_v12 = vsel %vm1674_vm3, %v8233_v55, %v3838_v38  ;;  %v3759_v18 = vpop.f32.mrb[138].mxu1 }
 0x765   :  { %3909 = vrot.lane.b32.xlu0 %v3759_v18, %s6177_s22  ;;  %v5460_v20 = vpop.f32.mrb[139].mxu1 }
 0x768   :  { %v3764_v35 = vpop.f32.mrb[140].mxu1 }
 0x769   :  { %3911 = vrot.lane.b32.xlu1 %v3764_v35, %s6177_s22  ;;  %v5463_v54 = vpop.f32.mrb[141].mxu1 }
 0x76c   :  { %v3769_v25 = vpop.f32.mrb[142].mxu1 }
 0x76d   :  { %3913 = vrot.lane.b32.xlu0 %v3769_v25, %s6177_s22  ;;  %v5466_v22 = vpop.f32.mrb[143].mxu1 }
 0x770   :  { %v3774_v33 = vpop.f32.mrb[144].mxu1 }
 0x771   :  { %3915 = vrot.lane.b32.xlu1 %v3774_v33, %s6177_s22  ;;  %v5469_v59 = vpop.f32.mrb[145].mxu1 }
 0x794   :  { %v3840_v2 = vpop.permute.xlu1 %3839 }
 0x795   :  { %v3950_v55 = vsel %vm1674_vm3, %v8235_v43, %v3840_v2  ;;  %v3779_v5 = vpop.f32.mrb[146].mxu1 }
 0x796   :  { %3917 = vrot.lane.b32.xlu0 %v3779_v5, %s6177_s22  ;;  %v5472_v42 = vpop.f32.mrb[147].mxu1 }
 0x797   :  { %v8609_v42 = vld [vmem:[#allocation5_spill] sm:$0xff] }
 0x798   :  { %v3864_v23 = vpop.permute.xlu1 %3863 }
 0x799   :  { %v3784_v4 = vpop.f32.mrb[148].mxu1 }
 0x79a   :  { %3919 = vrot.lane.b32.xlu1 %v3784_v4, %s6177_s22  ;;  %v5475_v44 = vpop.f32.mrb[149].mxu1  ;;  %v3988_v4 = vsub.s32 5, %v8609_v42 }
 0x79c   :  { %v3866_v41 = vpop.permute.xlu1 %3865 }
 0x79d   :  { %v3789_v45 = vpop.f32.mrb[150].mxu1 }
 0x79e   :  { %3921 = vrot.lane.b32.xlu0 %v3789_v45, %s6177_s22  ;;  %v5478_v31 = vpop.f32.mrb[151].mxu1 }
 0x79f   :  { %v8610_v31 = vld [vmem:[#allocation6_spill] sm:$0xff] }
 0x7a0   :  { %v3868_v17 = vpop.permute.xlu1 %3867 }
 0x7a1   :  { %v3794_v30 = vpop.f32.mrb[152].mxu1 }
 0x7a2   :  { %3923 = vrot.lane.b32.xlu1 %v3794_v30, %s6177_s22  ;;  %v5481_v8 = vpop.f32.mrb[153].mxu1 }
 0x7a4   :  { %v3870_v39 = vpop.permute.xlu0 %3869 }
 0x7a5   :  { %v3799_v51 = vpop.f32.mrb[154].mxu1 }
 0x7a6   :  { %3925 = vrot.lane.b32.xlu0 %v3799_v51, %s6177_s22  ;;  %v5484_v43 = vpop.f32.mrb[155].mxu1 }
 0x7a8   :  { %v3872_v61 = vpop.permute.xlu1 %3871 }
 0x7a9   :  { %v3804_v26 = vpop.f32.mrb[156].mxu1 }
 0x7aa   :  { %4098 = vrot.lane.b32.xlu0 %v8332_v3, %s6171_s29  ;;  %3927 = vrot.lane.b32.xlu1 %v3804_v26, %s6177_s22  ;;  %v5487_v10 = vpop.f32.mrb[157].mxu1  ;;  %v8611_v26 = vld [vmem:[#allocation7_spill] sm:$0xff] }
 0x7ac   :  { %v3874_v38 = vpop.permute.xlu0 %3873 }
 0x7ad   :  { %v8348_v18 = vsel %vm3951_vm8, %v3945_v58, %v3874_v38 }
 0x7ae   :  { %4100 = vrot.lane.b32.xlu1 %v8340_v1, %s6171_s29  ;;  %4102 = vrot.lane.b32.xlu0 %v8345_v28, %s6171_s29 }
 0x7b0   :  { %v3876_v20 = vpop.permute.xlu1 %3875 }
 0x7b1   :  { %v8355_v35 = vsel %vm3951_vm8, %v3946_v63, %v3876_v20  ;;  %v4003_v63 = vsub.s32 6, %v8609_v42  ;;  %v3942_v20 = vsel %vm1674_vm3, %v8171_v57, %v8300_v34  ;;  %v3943_v57 = vsel %vm1674_vm3, %v8177_v11, %v8302_v56 }
 0x7b2   :  { %v3944_v11 = vsel %vm1674_vm3, %v8187_v50, %v8305_v47 }
 0x7b3   :  { %v3956_v56 = vsel %vm3951_vm8, %v3944_v11, %v3872_v61 }
 0x7b4   :  { %v3878_v54 = vpop.permute.xlu0 %3877 }
 0x7b5   :  { %v8358_v25 = vsel %vm3951_vm8, %v3947_v37, %v3878_v54  ;;  %v3940_v37 = vsel %vm1674_vm3, %v8150_v40, %v8296_v27  ;;  %v3941_v40 = vsel %vm1674_vm3, %v8159_v0, %v8298_v53  ;;  %v3954_v54 = vsel %vm3951_vm8, %v3942_v20, %v3868_v17 }
 0x7b6   :  { %v3953_v27 = vsel %vm3951_vm8, %v3941_v40, %v3866_v41 }
 0x7b8   :  { %v3880_v22 = vpop.permute.xlu1 %3879 }
 0x7b9   :  { %v8361_v33 = vsel %vm3951_vm8, %v3948_v14, %v3880_v22  ;;  %v3952_v14 = vsel %vm3951_vm8, %v3940_v37, %v3864_v23 }
 0x7bc   :  { %v3882_v58 = vpop.permute.xlu0 %3881 }
 0x7bd   :  { %v8364_v59 = vsel %vm3951_vm8, %v3949_v12, %v3882_v58  ;;  %v8378_v12 = vld [vmem:[%s8533_s5] sm:$0xff] }
 0x7be   :  { %v8381_v44 = vrot.slane %v8378_v12, %v3988_v4  ;;  %v8386_v8 = vrot.slane %v8378_v12, %v4003_v63 }
 0x7c3   :  { %v3884_v2 = vpop.permute.xlu0 %3883 }
 0x7c4   :  { %v8367_v5 = vsel %vm3951_vm8, %v3950_v55, %v3884_v2  ;;  %v8612_v2 = vld [vmem:[#allocation8_spill] sm:$0xff] }
 0x7d3   :  { %v3908_v55 = vpop.permute.xlu1 %3907 }
 0x7d4   :  { %v3964_v45 = vsel %vm3963_vm9, %v3952_v14, %v3908_v55 }
 0x7d5   :  { %v3975_v30 = vadd.f32 %v3964_v45, %v8610_v31  ;;  %v8613_v31 = vld [vmem:[#allocation9_spill] sm:$0xff] }
 0x7d7   :  { %v3990_v23 = vmul.f32 %v8381_v44, %v3975_v30  ;;  %v3910_v51 = vpop.permute.xlu0 %3909 }
 0x7d8   :  { %v3965_v43 = vsel %vm3963_vm9, %v3953_v27, %v3910_v51 }
 0x7d9   :  { %v3976_v10 = vadd.f32 %v3965_v43, %v8611_v26  ;;  %v4005_v38 = vadd.f32 %v8386_v8, %v3990_v23  ;;  %v8614_v43 = vld [vmem:[#allocation10_spill] sm:$0xff] }
 0x7db   :  { %v3991_v22 = vmul.f32 %v8381_v44, %v3976_v10  ;;  %v3912_v0 = vpop.permute.xlu1 %3911  ;;  %v4115_v53 = vmul.f32 %v8276_v49, %v4005_v38  ;;  %v4027_v41 = vmul.f32 %v8080_v60, %v4005_v38  ;;  %v3955_v49 = vsel %vm3951_vm8, %v3943_v57, %v3870_v39 }
 0x7dc   :  { %v3966_v58 = vsel %vm3963_vm9, %v3954_v54, %v3912_v0 }
 0x7dd   :  { %v3977_v4 = vadd.f32 %v3966_v58, %v8612_v2  ;;  %v4126_v63 = vsel %vm1154_vm0, %v4115_v53, 0.0  ;;  %v4038_v37 = vsel %vm1154_vm0, %v4027_v41, 0.0  ;;  %v4006_v14 = vadd.f32 %v8386_v8, %v3991_v22 }
 0x7de   :  { %4127 = vadd.xlane.f32.xlu0 %v4126_v63  ;;  %4039 = vadd.xlane.f32.xlu1 %v4038_v37 }
 0x7df   :  { %v3992_v60 = vmul.f32 %v8381_v44, %v3977_v4  ;;  %v3914_v34 = vpop.permute.xlu0 %3913  ;;  %v4028_v17 = vmul.f32 %v8085_v46, %v4006_v14  ;;  %v4116_v55 = vmul.f32 %v8274_v21, %v4006_v14  ;;  %v8616_v14 = vld [vmem:[#allocation12_spill] sm:$0xff] }
 0x7e0   :  { %v3967_v45 = vsel %vm3963_vm9, %v3955_v49, %v3914_v34 }
 0x7e1   :  { %v3978_v30 = vadd.f32 %v3967_v45, %v8613_v31  ;;  %v4041_v40 = vsel %vm1154_vm0, %v4028_v17, 0.0  ;;  %v4007_v27 = vadd.f32 %v8386_v8, %v3992_v60  ;;  %v4129_v51 = vsel %vm1154_vm0, %v4116_v55, 0.0  ;;  %v8617_v55 = vld [vmem:[#allocation13_spill] sm:$0xff] }
 0x7e2   :  { %4042 = vadd.xlane.f32.xlu0 %v4041_v40 }
 0x7e3   :  { %v3993_v39 = vmul.f32 %v8381_v44, %v3978_v30  ;;  %v3916_v46 = vpop.permute.xlu1 %3915  ;;  %v4029_v21 = vmul.f32 %v8092_v29, %v4007_v27  ;;  %v4117_v38 = vmul.f32 %v8281_v15, %v4007_v27 }
 0x7e4   :  { %v3968_v23 = vsel %vm3963_vm9, %v3956_v56, %v3916_v46 }
 0x7e5   :  { %v3979_v26 = vadd.f32 %v3968_v23, %v8614_v43  ;;  %v4044_v10 = vsel %vm1154_vm0, %v4029_v21, 0.0  ;;  %v4008_v50 = vadd.f32 %v8386_v8, %v3993_v39  ;;  %v4132_v29 = vsel %vm1154_vm0, %v4117_v38, 0.0  ;;  %v8619_v43 = vld [vmem:[#allocation15_spill] sm:$0xff] }
 0x7e6   :  { %4045 = vadd.xlane.f32.xlu1 %v4044_v10  ;;  %4130 = vadd.xlane.f32.xlu0 %v4129_v51 }
 0x7e7   :  { %v3994_v47 = vmul.f32 %v8381_v44, %v3979_v26  ;;  %v4030_v61 = vmul.f32 %v8099_v48, %v4008_v50  ;;  %v4118_v22 = vmul.f32 %v8279_v24, %v4008_v50  ;;  %v8615_v24 = vld [vmem:[#allocation11_spill] sm:$0xff] }
 0x7e9   :  { %v4047_v20 = vsel %vm1154_vm0, %v4030_v61, 0.0  ;;  %v4009_v54 = vadd.f32 %v8386_v8, %v3994_v47  ;;  %v4135_v53 = vsel %vm1154_vm0, %v4118_v22, 0.0 }
 0x7ea   :  { %4133 = vadd.xlane.f32.xlu1 %v4132_v29  ;;  %4048 = vadd.xlane.f32.xlu0 %v4047_v20  ;;  %v8620_v29 = vld [vmem:[#allocation16_spill] sm:$0xff] }
 0x7eb   :  { %v4031_v15 = vmul.f32 %v8106_v36, %v4009_v54  ;;  %v4119_v41 = vmul.f32 %v8287_v52, %v4009_v54 }
 0x7ed   :  { %v4050_v0 = vsel %vm1154_vm0, %v4031_v15, 0.0  ;;  %v4138_v48 = vsel %vm1154_vm0, %v4119_v41, 0.0 }
 0x7ee   :  { %4051 = vadd.xlane.f32.xlu1 %v4050_v0  ;;  %4136 = vadd.xlane.f32.xlu0 %v4135_v53 }
 0x7f2   :  { %4139 = vadd.xlane.f32.xlu1 %v4138_v48 }
 0x808   :  { %v3918_v58 = vpop.permute.xlu0 %3917 }
 0x809   :  { %v3969_v2 = vsel %vm3963_vm9, %v8348_v18, %v3918_v58 }
 0x80a   :  { %v3980_v4 = vadd.f32 %v3969_v2, %v8615_v24 }
 0x80c   :  { %v3995_v63 = vmul.f32 %v8381_v44, %v3980_v4  ;;  %v3920_v36 = vpop.permute.xlu1 %3919 }
 0x80d   :  { %v3970_v37 = vsel %vm3963_vm9, %v8355_v35, %v3920_v36 }
 0x80e   :  { %v3981_v57 = vadd.f32 %v3970_v37, %v8616_v14  ;;  %v4010_v52 = vadd.f32 %v8386_v8, %v3995_v63 }
 0x810   :  { %v3996_v49 = vmul.f32 %v8381_v44, %v3981_v57  ;;  %v3922_v60 = vpop.permute.xlu0 %3921  ;;  %v4032_v34 = vmul.f32 %v8113_v7, %v4010_v52  ;;  %v4120_v17 = vmul.f32 %v8284_v32, %v4010_v52 }
 0x811   :  { %v3971_v18 = vsel %vm3963_vm9, %v8358_v25, %v3922_v60  ;;  %v8618_v25 = vld [vmem:[#allocation14_spill] sm:$0xff] }
 0x812   :  { %v3982_v45 = vadd.f32 %v3971_v18, %v8617_v55  ;;  %v4053_v31 = vsel %vm1154_vm0, %v4032_v34, 0.0  ;;  %v4011_v35 = vadd.f32 %v8386_v8, %v3996_v49  ;;  %v4141_v11 = vsel %vm1154_vm0, %v4120_v17, 0.0 }
 0x813   :  { %4054 = vadd.xlane.f32.xlu0 %v4053_v31 }
 0x814   :  { %v3997_v30 = vmul.f32 %v8381_v44, %v3982_v45  ;;  %v3924_v40 = vpop.permute.xlu1 %3923  ;;  %v4033_v27 = vmul.f32 %v8120_v6, %v4011_v35  ;;  %v4121_v39 = vmul.f32 %v8292_v19, %v4011_v35 }
 0x815   :  { %v3972_v7 = vsel %vm3963_vm9, %v8361_v33, %v3924_v40 }
 0x816   :  { %v3983_v56 = vadd.f32 %v3972_v7, %v8618_v25  ;;  %v4056_v32 = vsel %vm1154_vm0, %v4033_v27, 0.0  ;;  %v4012_v46 = vadd.f32 %v8386_v8, %v3997_v30  ;;  %v4144_v10 = vsel %vm1154_vm0, %v4121_v39, 0.0 }
 0x817   :  { %4057 = vadd.xlane.f32.xlu1 %v4056_v32  ;;  %4142 = vadd.xlane.f32.xlu0 %v4141_v11 }
 0x818   :  { %v3926_v21 = vpop.permute.xlu0 %3925  ;;  %v4034_v23 = vmul.f32 %v8132_v9, %v4012_v46  ;;  %v3998_v6 = vmul.f32 %v8381_v44, %v3983_v56  ;;  %v4122_v51 = vmul.f32 %v8290_v62, %v4012_v46 }
 0x819   :  { %v3973_v33 = vsel %vm3963_vm9, %v8364_v59, %v3926_v21 }
 0x81a   :  { %v3984_v26 = vadd.f32 %v3973_v33, %v8619_v43  ;;  %v4059_v19 = vsel %vm1154_vm0, %v4034_v23, 0.0  ;;  %v4013_v38 = vadd.f32 %v8386_v8, %v3998_v6  ;;  %v4147_v62 = vsel %vm1154_vm0, %v4122_v51, 0.0 }
 0x81b   :  { %4145 = vadd.xlane.f32.xlu1 %v4144_v10  ;;  %4060 = vadd.xlane.f32.xlu0 %v4059_v19 }
 0x81c   :  { %v3928_v50 = vpop.permute.xlu1 %3927  ;;  %v4099_v47 = vpop.permute.xlu0 %4098  ;;  %v4035_v9 = vmul.f32 %v8332_v3, %v4013_v38  ;;  %v3999_v61 = vmul.f32 %v8381_v44, %v3984_v26 }
 0x81d   :  { %v3974_v59 = vsel %vm3963_vm9, %v8367_v5, %v3928_v50  ;;  %v4123_v54 = vmul.f32 %v4099_v47, %v4013_v38  ;;  %v4171_v47 = vld [vmem:[%s8536_s8] sm:$0x3] }
 0x81e   :  { %v3985_v20 = vadd.f32 %v3974_v59, %v8620_v29  ;;  %v4062_v22 = vsel %vm1154_vm0, %v4035_v9, 0.0  ;;  %v4014_v15 = vadd.f32 %v8386_v8, %v3999_v61 }
 0x81f   :  { %4063 = vadd.xlane.f32.xlu1 %v4062_v22  ;;  %4148 = vadd.xlane.f32.xlu0 %v4147_v62  ;;  %v4150_v5 = vsel %vm1154_vm0, %v4123_v54, 0.0 }
 0x820   :  { %v4101_v0 = vpop.permute.xlu1 %4100  ;;  %v4036_v53 = vmul.f32 %v8340_v1, %v4014_v15  ;;  %v4000_v3 = vmul.f32 %v8381_v44, %v3985_v20  ;;  %v4103_v2 = vpop.permute.xlu0 %4102 }
 0x821   :  { %v4124_v41 = vmul.f32 %v4101_v0, %v4014_v15 }
 0x822   :  { %v4065_v48 = vsel %vm1154_vm0, %v4036_v53, 0.0  ;;  %v4015_v58 = vadd.f32 %v8386_v8, %v4000_v3 }
 0x823   :  { %4066 = vadd.xlane.f32.xlu0 %v4065_v48  ;;  %4151 = vadd.xlane.f32.xlu1 %v4150_v5  ;;  %v4153_v63 = vsel %vm1154_vm0, %v4124_v41, 0.0 }
 0x824   :  { %v4037_v24 = vmul.f32 %v8345_v28, %v4015_v58  ;;  %v4125_v4 = vmul.f32 %v4103_v2, %v4015_v58 }
 0x826   :  { %v4068_v36 = vsel %vm1185_vm1, %v4037_v24, 0.0  ;;  %v4156_v1 = vsel %vm1185_vm1, %v4125_v4, 0.0 }
 0x827   :  { %4154 = vadd.xlane.f32.xlu0 %v4153_v63  ;;  %4069 = vadd.xlane.f32.xlu1 %v4068_v36 }
 0x82b   :  { %4157 = vadd.xlane.f32.xlu0 %v4156_v1 }
 0x86b   :  { %v4128_v44 = vpop.xlane.xlu0 %4127  ;;  %v4040_v37 = vpop.xlane.xlu1 %4039 }
 0x86c   :  { %v4160_v52 = vsel %vm4159_vm10, %v4040_v37, %v4128_v44 }
 0x86f   :  { %v4043_v14 = vpop.xlane.xlu0 %4042 }
 0x873   :  { %v4046_v8 = vpop.xlane.xlu1 %4045  ;;  %v4131_v57 = vpop.xlane.xlu0 %4130 }
 0x874   :  { %v4161_v28 = vsel %vm4159_vm10, %v4043_v14, %v4131_v57 }
 0x875   :  { %v5666_v49 = vpack.c.bf16 %v4161_v28, %v4160_v52 }
 0x877   :  { %5667 = vmatpush3.bf16.msra.mxu0 %v5666_v49  ;;  %v4049_v60 = vpop.xlane.xlu0 %4048  ;;  %v4134_v34 = vpop.xlane.xlu1 %4133 }
 0x878   :  { %5668 = vmatprep.subr.bf16.mxu0 %v8595_v16  ;;  %v4162_v17 = vsel %vm4159_vm10, %v4046_v8, %v4134_v34 }
 0x87b   :  { %v4137_v18 = vpop.xlane.xlu0 %4136  ;;  %v4052_v31 = vpop.xlane.xlu1 %4051 }
 0x87c   :  { %v4163_v55 = vsel %vm4159_vm10, %v4049_v60, %v4137_v18 }
 0x87d   :  { %v5669_v45 = vpack.c.bf16 %v4163_v55, %v4162_v17 }
 0x87f   :  { %5670 = vmatpush3.bf16.msra.mxu0 %v5669_v45  ;;  %v4140_v35 = vpop.xlane.xlu1 %4139 }
 0x880   :  { %5671 = vmatprep.subr.bf16.mxu0 %v8595_v16  ;;  %v4164_v7 = vsel %vm4159_vm10, %v4052_v31, %v4140_v35 }
 0x8a0   :  { %v4055_v30 = vpop.xlane.xlu0 %4054 }
 0x8a4   :  { %v4058_v40 = vpop.xlane.xlu1 %4057  ;;  %v4143_v27 = vpop.xlane.xlu0 %4142 }
 0x8a5   :  { %v4165_v11 = vsel %vm4159_vm10, %v4055_v30, %v4143_v27 }
 0x8a6   :  { %v5672_v25 = vpack.c.bf16 %v4165_v11, %v4164_v7 }
 0x8a8   :  { %v4146_v56 = vpop.xlane.xlu1 %4145  ;;  %5673 = vmatpush3.bf16.msra.mxu0 %v5672_v25  ;;  %v4061_v32 = vpop.xlane.xlu0 %4060 }
 0x8a9   :  { %5674 = vmatprep.subr.bf16.mxu0 %v8595_v16  ;;  %v4166_v21 = vsel %vm4159_vm10, %v4058_v40, %v4146_v56 }
 0x8ac   :  { %v4064_v39 = vpop.xlane.xlu1 %4063  ;;  %v4149_v46 = vpop.xlane.xlu0 %4148 }
 0x8ad   :  { %v4167_v23 = vsel %vm4159_vm10, %v4061_v32, %v4149_v46 }
 0x8ae   :  { %v5675_v6 = vpack.c.bf16 %v4167_v23, %v4166_v21 }
 0x8b0   :  { %5676 = vmatpush3.bf16.msra.mxu0 %v5675_v6  ;;  %v4067_v33 = vpop.xlane.xlu0 %4066  ;;  %v4152_v51 = vpop.xlane.xlu1 %4151 }
 0x8b1   :  { %5677 = vmatprep.subr.bf16.mxu0 %v8595_v16  ;;  %v4168_v26 = vsel %vm4159_vm10, %v4064_v39, %v4152_v51  ;;  %v4174_v16 = vsub.s32 7, %v8609_v42 }
 0x8b3   :  { %v4175_v61 = vrot.slane %v8378_v12, %v4174_v16 }
 0x8b4   :  { %v4155_v43 = vpop.xlane.xlu0 %4154  ;;  %v4070_v50 = vpop.xlane.xlu1 %4069 }
 0x8b5   :  { %v4169_v10 = vsel %vm4159_vm10, %v4067_v33, %v4155_v43 }
 0x8b6   :  { %v5678_v19 = vpack.c.bf16 %v4169_v10, %v4168_v26 }
 0x8b8   :  { %5679 = vmatpush3.bf16.msra.mxu0 %v5678_v19  ;;  %v4158_v38 = vpop.xlane.xlu0 %4157 }
 0x8b9   :  { %5508 = vmatprep.subr.mxu0 %v8594_v13  ;;  %v4170_v9 = vsel %vm4159_vm10, %v4070_v50, %v4158_v38 }
 0x8bc   :  { %5509 = vmatpush3.msk.msra.mxu0 %vm2071_vm6, %v4170_v9 }
 0x8bd   :  { %5511 = vmatmul.mubr.msk.f32.vlgmr.msra.gmra.mrb[158].mxu0 %vm1883_vm5, %v4171_v47 }
 0x990   :  { %v4248_v59 = vpop.f32.mrb[158].mxu0 }
 0x991   :  { %v4249_v13 = vadd.f32 %v4248_v59, %v4175_v61  ;;  %v5512_v62 = vpop.f32.mrb[159].mxu0 }
 0x993   :  { %4253 = vst.msk [vmem:[#allocation2] sm:$0x3] %vm4252_vm11, %v4249_v13 }
 0x994   :  { %6152 = shalt.err (!%p6149_p4)
}
 0x995   :  { %s6153_s11 = scalar_lea.hbm %s8537_s9, 32 }
 0x996   :  { %p6154_p5 = scmp.ne.s32.totalorder %s8537_s9, %s6153_s11  ;;  %p6157_p6 = scmp.lt.u32.totalorder %s6153_s11, %s8537_s9 }
 0x998   :  { %p6159_p7 = pnand %p6157_p6, %p6154_p5 }
 0x99a   :  { %6162 = shalt.err (!%p6159_p7)
}
 0x99b   :  { %4263 = dma.vmem_to_hbm [thread:$0]  %s4261_s30, 32, %s8537_s9, [#allocation3]  }
 0x99c   :  { %6163 = dma.done.wait [#allocation3], 32  }
 0x99d   :  { %6164 = vsyncadd [#allocation3], 4294967264 }
 0x99e   :  { %4267 = vsyncpa [#allocation3], 1 }

</bundles_post_ra>
